<compile_context>
chip_gen: v7x
topology: tpu7x:2x2x1
jax: 0.10.0
libtpu: 0.0.40
codegen_flags: <defaults>
</compile_context>

<pallas_src>
import functools

import jax
import jax.numpy as jnp
from jax import lax
from jax.experimental import pallas as pl
from jax.experimental.pallas import tpu as pltpu


# reflect = eye(3) with [2,2] = -1 (the nn.Parameter in the module, no grad)
_REFLECT = jnp.diag(jnp.array([1.0, 1.0, -1.0], dtype=jnp.float32))


# ----------------------------------------------------------------------------
# Fused Pallas kernel: nearest neighbour + correspondence statistics.
# Grid = (B, N // TILE_I).  The i (src-point tile) axis is the innermost
# reduction axis; the four small outputs keep a constant block index over it
# and are accumulated in VMEM (init at i == 0).  dst's index_map is constant
# in i, so it is DMA'd once per batch, not once per tile.
# ----------------------------------------------------------------------------
def _nn_stats_kernel(src_ref, dst_ref, m_ref, ssum_ref, csum_ref, val_ref):
    @pl.when(pl.program_id(1) == 0)
    def _init():
        m_ref[...] = jnp.zeros_like(m_ref)
        ssum_ref[...] = jnp.zeros_like(ssum_ref)
        csum_ref[...] = jnp.zeros_like(csum_ref)
        val_ref[...] = jnp.zeros_like(val_ref)

    s = src_ref[0]                                   # (3, TI)
    d = dst_ref[0]                                   # (3, N)
    ti = s.shape[1]
    n = d.shape[1]

    # pd[i, j] = 2 s_i.d_j - ||d_j||^2.  The -||s_i||^2 term is constant per
    # row, so it is dropped from the argmax/max path (saves a full N^2 pass
    # and the degenerate "ones" matmul) and re-added to `val` as a scalar sum.
    inner2 = lax.dot_general(s + s, d, (((0,), (0,)), ((), ())),
                             preferred_element_type=jnp.float32)      # (TI, N)
    yy_row = jnp.sum(d * d, axis=0, keepdims=True)                    # (1, N)
    pd = inner2 - yy_row                                              # (TI, N)

    rowmax = jnp.max(pd, axis=-1, keepdims=True)                      # (TI, 1)
    col = lax.broadcasted_iota(jnp.int32, (ti, n), 1)                 # (TI, N)
    # First index achieving the max (matches torch.topk(k=1) tie-break).
    # TODO(synk): jnp.argmax lowering on Mosaic is not guaranteed across jax
    # versions; keep the (max, first-index) two-pass form that compiles today.
    idx = jnp.min(jnp.where(pd == rowmax, col, n), axis=-1, keepdims=True)
    onehot = (col == idx).astype(jnp.float32)                         # (TI, N)

    # corr_t[i, c] = dst[c, idx[i]] — gather via matmul; contraction is on the
    # one-hot's natural last dim, only the tiny (3, N) rhs is transposed
    # (never an NxN transpose).
    corr_t = lax.dot_general(onehot, d, (((1,), (1,)), ((), ())),
                             preferred_element_type=jnp.float32)      # (TI, 3)

    # Accumulate partial statistics into the VMEM-resident output blocks.
    m_ref[0] += lax.dot_general(s, corr_t, (((1,), (0,)), ((), ())),
                                preferred_element_type=jnp.float32)   # (3, 3)
    ssum_ref[0] += jnp.sum(s, axis=1, keepdims=True)                  # (3, 1)
    csum_ref[0] += jnp.sum(corr_t, axis=0, keepdims=True)             # (1, 3)
    xx_sum = jnp.sum(jnp.sum(s * s, axis=1, keepdims=True),
                     axis=0, keepdims=True)                           # (1, 1)
    val_ref[0] += jnp.sum(rowmax, axis=0, keepdims=True) - xx_sum     # (1, 1)


def _pick_tile_i(n):
    """Largest i-tile (multiple of 128 dividing n, <= 512) whose N x TILE_I
    f32 intermediates stay inside the scoped-VMEM defaults on v5e/v6e/v7x."""
    if n <= 512:
        return n
    budget = 4 * 1024 * 1024                       # bytes per NxTI f32 buffer
    for t in (512, 256, 128):
        if n % t == 0 and n * t * 4 <= budget:
            return t
    for t in (512, 256, 128):
        if n % t == 0:
            return t
    return n                                       # fallback: single tile


def _nn_stats(src, dst):
    B, _, N = src.shape
    tile_i = _pick_tile_i(N)
    return pl.pallas_call(
        _nn_stats_kernel,
        out_shape=(jax.ShapeDtypeStruct((B, 3, 3), jnp.float32),   # M
                   jax.ShapeDtypeStruct((B, 3, 1), jnp.float32),   # Ssum
                   jax.ShapeDtypeStruct((B, 1, 3), jnp.float32),   # Csum (row)
                   jax.ShapeDtypeStruct((B, 1, 1), jnp.float32)),  # val sum
        grid=(B, N // tile_i),
        in_specs=[pl.BlockSpec((1, 3, tile_i), lambda b, i: (b, 0, i)),
                  pl.BlockSpec((1, 3, N), lambda b, i: (b, 0, 0))],
        out_specs=(pl.BlockSpec((1, 3, 3), lambda b, i: (b, 0, 0)),
                   pl.BlockSpec((1, 3, 1), lambda b, i: (b, 0, 0)),
                   pl.BlockSpec((1, 1, 3), lambda b, i: (b, 0, 0)),
                   pl.BlockSpec((1, 1, 1), lambda b, i: (b, 0, 0))),
        compiler_params=pltpu.CompilerParams(
            dimension_semantics=("parallel", "arbitrary")),
    )(src, dst)


# ----------------------------------------------------------------------------
# Glue (plain JAX): rigid fit from statistics, 3x3 SVD, transform application
# ----------------------------------------------------------------------------
def _rigid_from_stats(H, s_mean, c_mean):
    # torch.svd: H = U diag(S) V^T ; jnp: H = U diag(S) Vh  => V = Vh^T
    # TODO(synk): batched 3x3 SVD stays a plain-JAX op (no Pallas equivalent);
    # an analytic 3x3 SVD would fuse better but risks drift on the det<0 branch.
    U, _, Vh = jnp.linalg.svd(H)
    V = jnp.swapaxes(Vh, -1, -2)
    Ut = jnp.swapaxes(U, -1, -2)
    R = jnp.matmul(V, Ut)
    det = jnp.linalg.det(R)
    R_fix = jnp.matmul(jnp.matmul(V, _REFLECT), Ut)
    R = jnp.where((det < 0)[:, None, None], R_fix, R)
    t = jnp.matmul(-R, s_mean) + c_mean               # (B, 3, 1)
    return R, t[:, :, 0]


def _icp_iteration_stats(src, dst):
    """One ICP iteration's nearest-neighbour pass, fully fused in Pallas."""
    B, _, N = src.shape
    M, s_sum, c_sum_row, val_sum = _nn_stats(src, dst)
    s_mean = s_sum / N                                # (B, 3, 1)
    c_mean = jnp.swapaxes(c_sum_row, 1, 2) / N        # (B, 3, 1)
    # H = sum_i (s_i - s_mean)(c_i - c_mean)^T = M - Ssum Csum^T / N
    H = M - jnp.matmul(s_sum, c_sum_row) / N          # (B, 3, 3)
    mean_error = jnp.sum(val_sum) / (B * N)           # mean neg. sq. distance
    return mean_error, H, s_mean, c_mean


def best_fit_transform(src, corr):
    # Dense version, used once for the final srcInit -> src fit (tiny, 1 call).
    s_mean = jnp.mean(src, axis=2, keepdims=True)
    c_mean = jnp.mean(corr, axis=2, keepdims=True)
    H = jnp.matmul(src - s_mean, jnp.swapaxes(corr - c_mean, 1, 2))
    return _rigid_from_stats(H, s_mean, c_mean)


def transform_point_cloud(pc, rotation, translation):
    return jnp.matmul(rotation, pc) + translation[:, :, None]


@functools.partial(jax.jit, static_argnames=("max_iterations", "tolerance"))
def icp_forward(src_init, dst, max_iterations=10, tolerance=0.001):
    src = src_init
    prev_error = jnp.float32(0.0)
    done = jnp.bool_(False)
    # TODO(synk): the data-dependent early `break` has no direct equivalent in
    # an unrolled jit loop; emulated by freezing the state once converged.
    for _ in range(max_iterations):
        mean_error, H, s_mean, c_mean = _icp_iteration_stats(src, dst)
        R, t = _rigid_from_stats(H, s_mean, c_mean)
        src_new = transform_point_cloud(src, R, t)
        src = jnp.where(done, src, src_new)
        break_now = jnp.abs(prev_error - mean_error) < tolerance
        prev_error = jnp.where(done | break_now, prev_error, mean_error)
        done = done | break_now

    rotation_ab, translation_ab = best_fit_transform(src_init, src)
    rotation_ba = jnp.swapaxes(rotation_ab, 2, 1)
    translation_ba = -jnp.matmul(rotation_ba, translation_ab[:, :, None])[:, :, 0]
    return src_init, src, rotation_ab, translation_ab, rotation_ba, translation_ba


if __name__ == "__main__":
    key = jax.random.PRNGKey(0)
    k1, k2, k3, _ = jax.random.split(key, 4)
    B, N = 2, 128
    src_init = jax.random.normal(k1, (B, 3, N), dtype=jnp.float32)
    # dst = small rigid-ish perturbation of src plus noise (deterministic)
    dst = (src_init[:, ::-1, :] * 0.9
           + 0.05 * jax.random.normal(k2, (B, 3, N), dtype=jnp.float32)
           + 0.1 * jax.random.normal(k3, (B, 3, 1), dtype=jnp.float32))

    outs = icp_forward(src_init, dst)
    outs = jax.block_until_ready(outs)

    src0, src_final, r_ab, t_ab, r_ba, t_ba = outs
    assert src_final.shape == (B, 3, N)
    assert r_ab.shape == (B, 3, 3) and t_ab.shape == (B, 3)
    assert r_ba.shape == (B, 3, 3) and t_ba.shape == (B, 3)
    assert all(bool(jnp.all(jnp.isfinite(x))) for x in (src_final, r_ab, t_ab, r_ba, t_ba))
    print("KERNEL_OK")
</pallas_src>

<mosaic_0001>
module attributes {stable_mosaic.version = 11 : i64} {
  func.func @_nn_stats_kernel(%arg0: i32, %arg1: i32, %arg2: memref<1x3x128xf32, #tpu.memory_space<vmem>>, %arg3: memref<1x3x128xf32, #tpu.memory_space<vmem>>, %arg4: memref<1x3x3xf32, #tpu.memory_space<vmem>>, %arg5: memref<1x3x1xf32, #tpu.memory_space<vmem>>, %arg6: memref<1x1x3xf32, #tpu.memory_space<vmem>>, %arg7: memref<1x1x1xf32, #tpu.memory_space<vmem>>) attributes {dimension_semantics = [#tpu.dimension_semantics<parallel>, #tpu.dimension_semantics<arbitrary>], iteration_bounds = array<i64: 2, 1>, scalar_prefetch = 0 : i64, scratch_operands = 0 : i64, tpu.core_type = #tpu.core_type<tc>, window_params = [{transform_indices = @transform_0, window_bounds = array<i64: 1, 3, 128>}, {transform_indices = @transform_1, window_bounds = array<i64: 1, 3, 128>}, {transform_indices = @transform_2, window_bounds = array<i64: 1, 3, 3>}, {transform_indices = @transform_3, window_bounds = array<i64: 1, 3, 1>}, {transform_indices = @transform_4, window_bounds = array<i64: 1, 1, 3>}, {transform_indices = @transform_5, window_bounds = array<i64: 1, 1, 1>}]} {
    %c0_i32 = arith.constant 0 : i32
    %0 = arith.cmpi eq, %arg1, %c0_i32 : i32
    %1 = arith.extui %0 : i1 to i32
    %c0_i32_0 = arith.constant 0 : i32
    %2 = arith.cmpi ne, %1, %c0_i32_0 : i32
    scf.if %2 {
      %cst_40 = arith.constant 0.000000e+00 : f32
      %65 = vector.broadcast %cst_40 : f32 to vector<1x3x3xf32>
      %c0_41 = arith.constant 0 : index
      %c0_42 = arith.constant 0 : index
      %c0_43 = arith.constant 0 : index
      %66 = vector.load %arg4[%c0_41, %c0_42, %c0_43] : memref<1x3x3xf32, #tpu.memory_space<vmem>>, vector<1x3x3xf32>
      tpu.vector_store %arg4[%c0_41, %c0_42, %c0_43], %65 {strides = array<i32>} : memref<1x3x3xf32, #tpu.memory_space<vmem>>, vector<1x3x3xf32>,
      %cst_44 = arith.constant 0.000000e+00 : f32
      %67 = vector.broadcast %cst_44 : f32 to vector<1x3x1xf32>
      %c0_45 = arith.constant 0 : index
      %c0_46 = arith.constant 0 : index
      %c0_47 = arith.constant 0 : index
      %68 = vector.load %arg5[%c0_45, %c0_46, %c0_47] : memref<1x3x1xf32, #tpu.memory_space<vmem>>, vector<1x3x1xf32>
      tpu.vector_store %arg5[%c0_45, %c0_46, %c0_47], %67 {strides = array<i32>} : memref<1x3x1xf32, #tpu.memory_space<vmem>>, vector<1x3x1xf32>,
      %cst_48 = arith.constant 0.000000e+00 : f32
      %69 = vector.broadcast %cst_48 : f32 to vector<1x1x3xf32>
      %c0_49 = arith.constant 0 : index
      %c0_50 = arith.constant 0 : index
      %c0_51 = arith.constant 0 : index
      %70 = vector.load %arg6[%c0_49, %c0_50, %c0_51] : memref<1x1x3xf32, #tpu.memory_space<vmem>>, vector<1x1x3xf32>
      tpu.vector_store %arg6[%c0_49, %c0_50, %c0_51], %69 {strides = array<i32>} : memref<1x1x3xf32, #tpu.memory_space<vmem>>, vector<1x1x3xf32>,
      %cst_52 = arith.constant 0.000000e+00 : f32
      %71 = vector.broadcast %cst_52 : f32 to vector<1x1x1xf32>
      %c0_53 = arith.constant 0 : index
      %c0_54 = arith.constant 0 : index
      %c0_55 = arith.constant 0 : index
      %72 = vector.load %arg7[%c0_53, %c0_54, %c0_55] : memref<1x1x1xf32, #tpu.memory_space<vmem>>, vector<1x1x1xf32>
      tpu.vector_store %arg7[%c0_53, %c0_54, %c0_55], %71 {strides = array<i32>} : memref<1x1x1xf32, #tpu.memory_space<vmem>>, vector<1x1x1xf32>,
    } else {
    }
    %c0 = arith.constant 0 : index
    %c0_1 = arith.constant 0 : index
    %c0_2 = arith.constant 0 : index
    %3 = vector.load %arg2[%c0, %c0_1, %c0_2] : memref<1x3x128xf32, #tpu.memory_space<vmem>>, vector<1x3x128xf32>
    %4 = vector.shape_cast %3 : vector<1x3x128xf32> to vector<3x128xf32>
    %c0_3 = arith.constant 0 : index
    %c0_4 = arith.constant 0 : index
    %c0_5 = arith.constant 0 : index
    %5 = vector.load %arg3[%c0_3, %c0_4, %c0_5] : memref<1x3x128xf32, #tpu.memory_space<vmem>>, vector<1x3x128xf32>
    %6 = vector.shape_cast %5 : vector<1x3x128xf32> to vector<3x128xf32>
    %7 = arith.addf %4, %4 : vector<3x128xf32>
    %cst = arith.constant dense<0.000000e+00> : vector<128x128xf32>
    %8 = tpu.matmul %7, %6, %cst {dimension_numbers = #tpu.dot_dimension_numbers<[0], [0], [1], [1], [0, 1, 1, 1], [], []>} : vector<3x128xf32>, vector<3x128xf32>, vector<128x128xf32> -> vector<128x128xf32>
    %9 = arith.mulf %6, %6 : vector<3x128xf32>
    %cst_6 = arith.constant dense<0.000000e+00> : vector<128xf32>
    %10 = vector.multi_reduction <add>, %9, %cst_6 [0] : vector<3x128xf32> to vector<128xf32>
    %11 = vector.shape_cast %10 : vector<128xf32> to vector<1x128xf32>
    %12 = vector.broadcast %11 : vector<1x128xf32> to vector<128x128xf32>
    %13 = arith.subf %8, %12 : vector<128x128xf32>
    %cst_7 = arith.constant dense<0xFF800000> : vector<128xf32>
    %14 = vector.multi_reduction <maximumf>, %13, %cst_7 [1] : vector<128x128xf32> to vector<128xf32>
    %15 = vector.shape_cast %14 : vector<128xf32> to vector<128x1xf32>
    %16 = tpu.iota {dimensions = array<i32: 1>} : vector<128x128xi32>
    %17 = vector.broadcast %15 : vector<128x1xf32> to vector<128x128xf32>
    %18 = arith.cmpf oeq, %13, %17 : vector<128x128xf32>
    %c128_i32 = arith.constant 128 : i32
    %19 = vector.broadcast %c128_i32 : i32 to vector<128x128xi32>
    %20 = arith.select %18, %16, %19 : vector<128x128xi1>, vector<128x128xi32>
    %cst_8 = arith.constant dense<2147483647> : vector<128xi32>
    %21 = vector.multi_reduction <minsi>, %20, %cst_8 [1] : vector<128x128xi32> to vector<128xi32>
    %22 = vector.shape_cast %21 : vector<128xi32> to vector<128x1xi32>
    %23 = vector.broadcast %22 : vector<128x1xi32> to vector<128x128xi32>
    %24 = arith.cmpi eq, %16, %23 : vector<128x128xi32>
    %25 = arith.extui %24 : vector<128x128xi1> to vector<128x128xi32>
    %26 = arith.sitofp %25 : vector<128x128xi32> to vector<128x128xf32>
    %cst_9 = arith.constant dense<0.000000e+00> : vector<128x3xf32>
    %27 = tpu.matmul %26, %6, %cst_9 {dimension_numbers = #tpu.dot_dimension_numbers<[1], [1], [0], [0], [0, 0, 1, 0], [], []>} : vector<128x128xf32>, vector<3x128xf32>, vector<128x3xf32> -> vector<128x3xf32>
    %c0_10 = arith.constant 0 : index
    %c0_11 = arith.constant 0 : index
    %c0_12 = arith.constant 0 : index
    %28 = vector.load %arg4[%c0_10, %c0_11, %c0_12] : memref<1x3x3xf32, #tpu.memory_space<vmem>>, vector<1x3x3xf32>
    %29 = vector.shape_cast %28 : vector<1x3x3xf32> to vector<3x3xf32>
    %cst_13 = arith.constant dense<0.000000e+00> : vector<3x3xf32>
    %30 = tpu.matmul %4, %27, %cst_13 {dimension_numbers = #tpu.dot_dimension_numbers<[1], [0], [0], [1], [0, 0, 1, 1], [], []>} : vector<3x128xf32>, vector<128x3xf32>, vector<3x3xf32> -> vector<3x3xf32>
    %31 = arith.addf %29, %30 : vector<3x3xf32>
    %c0_14 = arith.constant 0 : index
    %c0_15 = arith.constant 0 : index
    %c0_16 = arith.constant 0 : index
    %32 = vector.load %arg4[%c0_14, %c0_15, %c0_16] : memref<1x3x3xf32, #tpu.memory_space<vmem>>, vector<1x3x3xf32>
    %33 = vector.shape_cast %32 : vector<1x3x3xf32> to vector<3x3xf32>
    %34 = vector.shape_cast %31 : vector<3x3xf32> to vector<1x3x3xf32>
    tpu.vector_store %arg4[%c0_14, %c0_15, %c0_16], %34 {strides = array<i32>} : memref<1x3x3xf32, #tpu.memory_space<vmem>>, vector<1x3x3xf32>,
    %c0_17 = arith.constant 0 : index
    %c0_18 = arith.constant 0 : index
    %c0_19 = arith.constant 0 : index
    %35 = vector.load %arg5[%c0_17, %c0_18, %c0_19] : memref<1x3x1xf32, #tpu.memory_space<vmem>>, vector<1x3x1xf32>
    %36 = vector.shape_cast %35 : vector<1x3x1xf32> to vector<3x1xf32>
    %cst_20 = arith.constant dense<0.000000e+00> : vector<3xf32>
    %37 = vector.multi_reduction <add>, %4, %cst_20 [1] : vector<3x128xf32> to vector<3xf32>
    %38 = vector.shape_cast %37 : vector<3xf32> to vector<3x1xf32>
    %39 = arith.addf %36, %38 : vector<3x1xf32>
    %c0_21 = arith.constant 0 : index
    %c0_22 = arith.constant 0 : index
    %c0_23 = arith.constant 0 : index
    %40 = vector.load %arg5[%c0_21, %c0_22, %c0_23] : memref<1x3x1xf32, #tpu.memory_space<vmem>>, vector<1x3x1xf32>
    %41 = vector.shape_cast %40 : vector<1x3x1xf32> to vector<3x1xf32>
    %42 = vector.shape_cast %39 : vector<3x1xf32> to vector<1x3x1xf32>
    tpu.vector_store %arg5[%c0_21, %c0_22, %c0_23], %42 {strides = array<i32>} : memref<1x3x1xf32, #tpu.memory_space<vmem>>, vector<1x3x1xf32>,
    %c0_24 = arith.constant 0 : index
    %c0_25 = arith.constant 0 : index
    %c0_26 = arith.constant 0 : index
    %43 = vector.load %arg6[%c0_24, %c0_25, %c0_26] : memref<1x1x3xf32, #tpu.memory_space<vmem>>, vector<1x1x3xf32>
    %44 = vector.shape_cast %43 : vector<1x1x3xf32> to vector<1x3xf32>
    %cst_27 = arith.constant dense<0.000000e+00> : vector<3xf32>
    %45 = vector.multi_reduction <add>, %27, %cst_27 [0] : vector<128x3xf32> to vector<3xf32>
    %46 = vector.shape_cast %45 : vector<3xf32> to vector<1x3xf32>
    %47 = arith.addf %44, %46 : vector<1x3xf32>
    %c0_28 = arith.constant 0 : index
    %c0_29 = arith.constant 0 : index
    %c0_30 = arith.constant 0 : index
    %48 = vector.load %arg6[%c0_28, %c0_29, %c0_30] : memref<1x1x3xf32, #tpu.memory_space<vmem>>, vector<1x1x3xf32>
    %49 = vector.shape_cast %48 : vector<1x1x3xf32> to vector<1x3xf32>
    %50 = vector.shape_cast %47 : vector<1x3xf32> to vector<1x1x3xf32>
    tpu.vector_store %arg6[%c0_28, %c0_29, %c0_30], %50 {strides = array<i32>} : memref<1x1x3xf32, #tpu.memory_space<vmem>>, vector<1x1x3xf32>,
    %51 = arith.mulf %4, %4 : vector<3x128xf32>
    %cst_31 = arith.constant dense<0.000000e+00> : vector<3xf32>
    %52 = vector.multi_reduction <add>, %51, %cst_31 [1] : vector<3x128xf32> to vector<3xf32>
    %53 = vector.shape_cast %52 : vector<3xf32> to vector<3x1xf32>
    %cst_32 = arith.constant dense<0.000000e+00> : vector<1xf32>
    %54 = vector.multi_reduction <add>, %53, %cst_32 [0] : vector<3x1xf32> to vector<1xf32>
    %55 = vector.shape_cast %54 : vector<1xf32> to vector<1x1xf32>
    %c0_33 = arith.constant 0 : index
    %c0_34 = arith.constant 0 : index
    %c0_35 = arith.constant 0 : index
    %56 = vector.load %arg7[%c0_33, %c0_34, %c0_35] : memref<1x1x1xf32, #tpu.memory_space<vmem>>, vector<1x1x1xf32>
    %57 = vector.shape_cast %56 : vector<1x1x1xf32> to vector<1x1xf32>
    %cst_36 = arith.constant dense<0.000000e+00> : vector<1xf32>
    %58 = vector.multi_reduction <add>, %15, %cst_36 [0] : vector<128x1xf32> to vector<1xf32>
    %59 = vector.shape_cast %58 : vector<1xf32> to vector<1x1xf32>
    %60 = arith.subf %59, %55 : vector<1x1xf32>
    %61 = arith.addf %57, %60 : vector<1x1xf32>
    %c0_37 = arith.constant 0 : index
    %c0_38 = arith.constant 0 : index
    %c0_39 = arith.constant 0 : index
    %62 = vector.load %arg7[%c0_37, %c0_38, %c0_39] : memref<1x1x1xf32, #tpu.memory_space<vmem>>, vector<1x1x1xf32>
    %63 = vector.shape_cast %62 : vector<1x1x1xf32> to vector<1x1xf32>
    %64 = vector.shape_cast %61 : vector<1x1xf32> to vector<1x1x1xf32>
    tpu.vector_store %arg7[%c0_37, %c0_38, %c0_39], %64 {strides = array<i32>} : memref<1x1x1xf32, #tpu.memory_space<vmem>>, vector<1x1x1xf32>,
    return
  }
  func.func @transform_0(%arg0: i32, %arg1: i32) -> (i32, i32, i32) {
    %c0_i32 = arith.constant 0 : i32
    %c0_i32_0 = arith.constant 0 : i32
    return %arg0, %c0_i32, %arg1 : i32, i32, i32
  }
  func.func @transform_1(%arg0: i32, %arg1: i32) -> (i32, i32, i32) {
    %c0_i32 = arith.constant 0 : i32
    %c0_i32_0 = arith.constant 0 : i32
    %c0_i32_1 = arith.constant 0 : i32
    return %arg0, %c0_i32, %c0_i32_0 : i32, i32, i32
  }
  func.func @transform_2(%arg0: i32, %arg1: i32) -> (i32, i32, i32) {
    %c0_i32 = arith.constant 0 : i32
    %c0_i32_0 = arith.constant 0 : i32
    %c0_i32_1 = arith.constant 0 : i32
    return %arg0, %c0_i32, %c0_i32_0 : i32, i32, i32
  }
  func.func @transform_3(%arg0: i32, %arg1: i32) -> (i32, i32, i32) {
    %c0_i32 = arith.constant 0 : i32
    %c0_i32_0 = arith.constant 0 : i32
    %c0_i32_1 = arith.constant 0 : i32
    return %arg0, %c0_i32, %c0_i32_0 : i32, i32, i32
  }
  func.func @transform_4(%arg0: i32, %arg1: i32) -> (i32, i32, i32) {
    %c0_i32 = arith.constant 0 : i32
    %c0_i32_0 = arith.constant 0 : i32
    %c0_i32_1 = arith.constant 0 : i32
    return %arg0, %c0_i32, %c0_i32_0 : i32, i32, i32
  }
  func.func @transform_5(%arg0: i32, %arg1: i32) -> (i32, i32, i32) {
    %c0_i32 = arith.constant 0 : i32
    %c0_i32_0 = arith.constant 0 : i32
    %c0_i32_1 = arith.constant 0 : i32
    return %arg0, %c0_i32, %c0_i32_0 : i32, i32, i32
  }
}

module attributes {stable_mosaic.version = 11 : i64} {
  func.func @_nn_stats_kernel(%arg0: i32, %arg1: i32, %arg2: memref<1x3x128xf32, #tpu.memory_space<vmem>>, %arg3: memref<1x3x128xf32, #tpu.memory_space<vmem>>, %arg4: memref<1x3x3xf32, #tpu.memory_space<vmem>>, %arg5: memref<1x3x1xf32, #tpu.memory_space<vmem>>, %arg6: memref<1x1x3xf32, #tpu.memory_space<vmem>>, %arg7: memref<1x1x1xf32, #tpu.memory_space<vmem>>) attributes {dimension_semantics = [#tpu.dimension_semantics<parallel>, #tpu.dimension_semantics<arbitrary>], iteration_bounds = array<i64: 2, 1>, scalar_prefetch = 0 : i64, scratch_operands = 0 : i64, tpu.core_type = #tpu.core_type<tc>, window_params = [{transform_indices = @transform_0, window_bounds = array<i64: 1, 3, 128>}, {transform_indices = @transform_1, window_bounds = array<i64: 1, 3, 128>}, {transform_indices = @transform_2, window_bounds = array<i64: 1, 3, 3>}, {transform_indices = @transform_3, window_bounds = array<i64: 1, 3, 1>}, {transform_indices = @transform_4, window_bounds = array<i64: 1, 1, 3>}, {transform_indices = @transform_5, window_bounds = array<i64: 1, 1, 1>}]} {
    %c0_i32 = arith.constant 0 : i32
    %0 = arith.cmpi eq, %arg1, %c0_i32 : i32
    %1 = arith.extui %0 : i1 to i32
    %c0_i32_0 = arith.constant 0 : i32
    %2 = arith.cmpi ne, %1, %c0_i32_0 : i32
    scf.if %2 {
      %cst_40 = arith.constant 0.000000e+00 : f32
      %65 = vector.broadcast %cst_40 : f32 to vector<1x3x3xf32>
      %c0_41 = arith.constant 0 : index
      %c0_42 = arith.constant 0 : index
      %c0_43 = arith.constant 0 : index
      %66 = vector.load %arg4[%c0_41, %c0_42, %c0_43] : memref<1x3x3xf32, #tpu.memory_space<vmem>>, vector<1x3x3xf32>
      tpu.vector_store %arg4[%c0_41, %c0_42, %c0_43], %65 {strides = array<i32>} : memref<1x3x3xf32, #tpu.memory_space<vmem>>, vector<1x3x3xf32>,
      %cst_44 = arith.constant 0.000000e+00 : f32
      %67 = vector.broadcast %cst_44 : f32 to vector<1x3x1xf32>
      %c0_45 = arith.constant 0 : index
      %c0_46 = arith.constant 0 : index
      %c0_47 = arith.constant 0 : index
      %68 = vector.load %arg5[%c0_45, %c0_46, %c0_47] : memref<1x3x1xf32, #tpu.memory_space<vmem>>, vector<1x3x1xf32>
      tpu.vector_store %arg5[%c0_45, %c0_46, %c0_47], %67 {strides = array<i32>} : memref<1x3x1xf32, #tpu.memory_space<vmem>>, vector<1x3x1xf32>,
      %cst_48 = arith.constant 0.000000e+00 : f32
      %69 = vector.broadcast %cst_48 : f32 to vector<1x1x3xf32>
      %c0_49 = arith.constant 0 : index
      %c0_50 = arith.constant 0 : index
      %c0_51 = arith.constant 0 : index
      %70 = vector.load %arg6[%c0_49, %c0_50, %c0_51] : memref<1x1x3xf32, #tpu.memory_space<vmem>>, vector<1x1x3xf32>
      tpu.vector_store %arg6[%c0_49, %c0_50, %c0_51], %69 {strides = array<i32>} : memref<1x1x3xf32, #tpu.memory_space<vmem>>, vector<1x1x3xf32>,
      %cst_52 = arith.constant 0.000000e+00 : f32
      %71 = vector.broadcast %cst_52 : f32 to vector<1x1x1xf32>
      %c0_53 = arith.constant 0 : index
      %c0_54 = arith.constant 0 : index
      %c0_55 = arith.constant 0 : index
      %72 = vector.load %arg7[%c0_53, %c0_54, %c0_55] : memref<1x1x1xf32, #tpu.memory_space<vmem>>, vector<1x1x1xf32>
      tpu.vector_store %arg7[%c0_53, %c0_54, %c0_55], %71 {strides = array<i32>} : memref<1x1x1xf32, #tpu.memory_space<vmem>>, vector<1x1x1xf32>,
    } else {
    }
    %c0 = arith.constant 0 : index
    %c0_1 = arith.constant 0 : index
    %c0_2 = arith.constant 0 : index
    %3 = vector.load %arg2[%c0, %c0_1, %c0_2] : memref<1x3x128xf32, #tpu.memory_space<vmem>>, vector<1x3x128xf32>
    %4 = vector.shape_cast %3 : vector<1x3x128xf32> to vector<3x128xf32>
    %c0_3 = arith.constant 0 : index
    %c0_4 = arith.constant 0 : index
    %c0_5 = arith.constant 0 : index
    %5 = vector.load %arg3[%c0_3, %c0_4, %c0_5] : memref<1x3x128xf32, #tpu.memory_space<vmem>>, vector<1x3x128xf32>
    %6 = vector.shape_cast %5 : vector<1x3x128xf32> to vector<3x128xf32>
    %7 = arith.addf %4, %4 : vector<3x128xf32>
    %cst = arith.constant dense<0.000000e+00> : vector<128x128xf32>
    %8 = tpu.matmul %7, %6, %cst {dimension_numbers = #tpu.dot_dimension_numbers<[0], [0], [1], [1], [0, 1, 1, 1], [], []>} : vector<3x128xf32>, vector<3x128xf32>, vector<128x128xf32> -> vector<128x128xf32>
    %9 = arith.mulf %6, %6 : vector<3x128xf32>
    %cst_6 = arith.constant dense<0.000000e+00> : vector<128xf32>
    %10 = vector.multi_reduction <add>, %9, %cst_6 [0] : vector<3x128xf32> to vector<128xf32>
    %11 = vector.shape_cast %10 : vector<128xf32> to vector<1x128xf32>
    %12 = vector.broadcast %11 : vector<1x128xf32> to vector<128x128xf32>
    %13 = arith.subf %8, %12 : vector<128x128xf32>
    %cst_7 = arith.constant dense<0xFF800000> : vector<128xf32>
    %14 = vector.multi_reduction <maximumf>, %13, %cst_7 [1] : vector<128x128xf32> to vector<128xf32>
    %15 = vector.shape_cast %14 : vector<128xf32> to vector<128x1xf32>
    %16 = tpu.iota {dimensions = array<i32: 1>} : vector<128x128xi32>
    %17 = vector.broadcast %15 : vector<128x1xf32> to vector<128x128xf32>
    %18 = arith.cmpf oeq, %13, %17 : vector<128x128xf32>
    %c128_i32 = arith.constant 128 : i32
    %19 = vector.broadcast %c128_i32 : i32 to vector<128x128xi32>
    %20 = arith.select %18, %16, %19 : vector<128x128xi1>, vector<128x128xi32>
    %cst_8 = arith.constant dense<2147483647> : vector<128xi32>
    %21 = vector.multi_reduction <minsi>, %20, %cst_8 [1] : vector<128x128xi32> to vector<128xi32>
    %22 = vector.shape_cast %21 : vector<128xi32> to vector<128x1xi32>
    %23 = vector.broadcast %22 : vector<128x1xi32> to vector<128x128xi32>
    %24 = arith.cmpi eq, %16, %23 : vector<128x128xi32>
    %25 = arith.extui %24 : vector<128x128xi1> to vector<128x128xi32>
    %26 = arith.sitofp %25 : vector<128x128xi32> to vector<128x128xf32>
    %cst_9 = arith.constant dense<0.000000e+00> : vector<128x3xf32>
    %27 = tpu.matmul %26, %6, %cst_9 {dimension_numbers = #tpu.dot_dimension_numbers<[1], [1], [0], [0], [0, 0, 1, 0], [], []>} : vector<128x128xf32>, vector<3x128xf32>, vector<128x3xf32> -> vector<128x3xf32>
    %c0_10 = arith.constant 0 : index
    %c0_11 = arith.constant 0 : index
    %c0_12 = arith.constant 0 : index
    %28 = vector.load %arg4[%c0_10, %c0_11, %c0_12] : memref<1x3x3xf32, #tpu.memory_space<vmem>>, vector<1x3x3xf32>
    %29 = vector.shape_cast %28 : vector<1x3x3xf32> to vector<3x3xf32>
    %cst_13 = arith.constant dense<0.000000e+00> : vector<3x3xf32>
    %30 = tpu.matmul %4, %27, %cst_13 {dimension_numbers = #tpu.dot_dimension_numbers<[1], [0], [0], [1], [0, 0, 1, 1], [], []>} : vector<3x128xf32>, vector<128x3xf32>, vector<3x3xf32> -> vector<3x3xf32>
    %31 = arith.addf %29, %30 : vector<3x3xf32>
    %c0_14 = arith.constant 0 : index
    %c0_15 = arith.constant 0 : index
    %c0_16 = arith.constant 0 : index
    %32 = vector.load %arg4[%c0_14, %c0_15, %c0_16] : memref<1x3x3xf32, #tpu.memory_space<vmem>>, vector<1x3x3xf32>
    %33 = vector.shape_cast %32 : vector<1x3x3xf32> to vector<3x3xf32>
    %34 = vector.shape_cast %31 : vector<3x3xf32> to vector<1x3x3xf32>
    tpu.vector_store %arg4[%c0_14, %c0_15, %c0_16], %34 {strides = array<i32>} : memref<1x3x3xf32, #tpu.memory_space<vmem>>, vector<1x3x3xf32>,
    %c0_17 = arith.constant 0 : index
    %c0_18 = arith.constant 0 : index
    %c0_19 = arith.constant 0 : index
    %35 = vector.load %arg5[%c0_17, %c0_18, %c0_19] : memref<1x3x1xf32, #tpu.memory_space<vmem>>, vector<1x3x1xf32>
    %36 = vector.shape_cast %35 : vector<1x3x1xf32> to vector<3x1xf32>
    %cst_20 = arith.constant dense<0.000000e+00> : vector<3xf32>
    %37 = vector.multi_reduction <add>, %4, %cst_20 [1] : vector<3x128xf32> to vector<3xf32>
    %38 = vector.shape_cast %37 : vector<3xf32> to vector<3x1xf32>
    %39 = arith.addf %36, %38 : vector<3x1xf32>
    %c0_21 = arith.constant 0 : index
    %c0_22 = arith.constant 0 : index
    %c0_23 = arith.constant 0 : index
    %40 = vector.load %arg5[%c0_21, %c0_22, %c0_23] : memref<1x3x1xf32, #tpu.memory_space<vmem>>, vector<1x3x1xf32>
    %41 = vector.shape_cast %40 : vector<1x3x1xf32> to vector<3x1xf32>
    %42 = vector.shape_cast %39 : vector<3x1xf32> to vector<1x3x1xf32>
    tpu.vector_store %arg5[%c0_21, %c0_22, %c0_23], %42 {strides = array<i32>} : memref<1x3x1xf32, #tpu.memory_space<vmem>>, vector<1x3x1xf32>,
    %c0_24 = arith.constant 0 : index
    %c0_25 = arith.constant 0 : index
    %c0_26 = arith.constant 0 : index
    %43 = vector.load %arg6[%c0_24, %c0_25, %c0_26] : memref<1x1x3xf32, #tpu.memory_space<vmem>>, vector<1x1x3xf32>
    %44 = vector.shape_cast %43 : vector<1x1x3xf32> to vector<1x3xf32>
    %cst_27 = arith.constant dense<0.000000e+00> : vector<3xf32>
    %45 = vector.multi_reduction <add>, %27, %cst_27 [0] : vector<128x3xf32> to vector<3xf32>
    %46 = vector.shape_cast %45 : vector<3xf32> to vector<1x3xf32>
    %47 = arith.addf %44, %46 : vector<1x3xf32>
    %c0_28 = arith.constant 0 : index
    %c0_29 = arith.constant 0 : index
    %c0_30 = arith.constant 0 : index
    %48 = vector.load %arg6[%c0_28, %c0_29, %c0_30] : memref<1x1x3xf32, #tpu.memory_space<vmem>>, vector<1x1x3xf32>
    %49 = vector.shape_cast %48 : vector<1x1x3xf32> to vector<1x3xf32>
    %50 = vector.shape_cast %47 : vector<1x3xf32> to vector<1x1x3xf32>
    tpu.vector_store %arg6[%c0_28, %c0_29, %c0_30], %50 {strides = array<i32>} : memref<1x1x3xf32, #tpu.memory_space<vmem>>, vector<1x1x3xf32>,
    %51 = arith.mulf %4, %4 : vector<3x128xf32>
    %cst_31 = arith.constant dense<0.000000e+00> : vector<3xf32>
    %52 = vector.multi_reduction <add>, %51, %cst_31 [1] : vector<3x128xf32> to vector<3xf32>
    %53 = vector.shape_cast %52 : vector<3xf32> to vector<3x1xf32>
    %cst_32 = arith.constant dense<0.000000e+00> : vector<1xf32>
    %54 = vector.multi_reduction <add>, %53, %cst_32 [0] : vector<3x1xf32> to vector<1xf32>
    %55 = vector.shape_cast %54 : vector<1xf32> to vector<1x1xf32>
    %c0_33 = arith.constant 0 : index
    %c0_34 = arith.constant 0 : index
    %c0_35 = arith.constant 0 : index
    %56 = vector.load %arg7[%c0_33, %c0_34, %c0_35] : memref<1x1x1xf32, #tpu.memory_space<vmem>>, vector<1x1x1xf32>
    %57 = vector.shape_cast %56 : vector<1x1x1xf32> to vector<1x1xf32>
    %cst_36 = arith.constant dense<0.000000e+00> : vector<1xf32>
    %58 = vector.multi_reduction <add>, %15, %cst_36 [0] : vector<128x1xf32> to vector<1xf32>
    %59 = vector.shape_cast %58 : vector<1xf32> to vector<1x1xf32>
    %60 = arith.subf %59, %55 : vector<1x1xf32>
    %61 = arith.addf %57, %60 : vector<1x1xf32>
    %c0_37 = arith.constant 0 : index
    %c0_38 = arith.constant 0 : index
    %c0_39 = arith.constant 0 : index
    %62 = vector.load %arg7[%c0_37, %c0_38, %c0_39] : memref<1x1x1xf32, #tpu.memory_space<vmem>>, vector<1x1x1xf32>
    %63 = vector.shape_cast %62 : vector<1x1x1xf32> to vector<1x1xf32>
    %64 = vector.shape_cast %61 : vector<1x1xf32> to vector<1x1x1xf32>
    tpu.vector_store %arg7[%c0_37, %c0_38, %c0_39], %64 {strides = array<i32>} : memref<1x1x1xf32, #tpu.memory_space<vmem>>, vector<1x1x1xf32>,
    return
  }
  func.func @transform_0(%arg0: i32, %arg1: i32) -> (i32, i32, i32) {
    %c0_i32 = arith.constant 0 : i32
    %c0_i32_0 = arith.constant 0 : i32
    return %arg0, %c0_i32, %arg1 : i32, i32, i32
  }
  func.func @transform_1(%arg0: i32, %arg1: i32) -> (i32, i32, i32) {
    %c0_i32 = arith.constant 0 : i32
    %c0_i32_0 = arith.constant 0 : i32
    %c0_i32_1 = arith.constant 0 : i32
    return %arg0, %c0_i32, %c0_i32_0 : i32, i32, i32
  }
  func.func @transform_2(%arg0: i32, %arg1: i32) -> (i32, i32, i32) {
    %c0_i32 = arith.constant 0 : i32
    %c0_i32_0 = arith.constant 0 : i32
    %c0_i32_1 = arith.constant 0 : i32
    return %arg0, %c0_i32, %c0_i32_0 : i32, i32, i32
  }
  func.func @transform_3(%arg0: i32, %arg1: i32) -> (i32, i32, i32) {
    %c0_i32 = arith.constant 0 : i32
    %c0_i32_0 = arith.constant 0 : i32
    %c0_i32_1 = arith.constant 0 : i32
    return %arg0, %c0_i32, %c0_i32_0 : i32, i32, i32
  }
  func.func @transform_4(%arg0: i32, %arg1: i32) -> (i32, i32, i32) {
    %c0_i32 = arith.constant 0 : i32
    %c0_i32_0 = arith.constant 0 : i32
    %c0_i32_1 = arith.constant 0 : i32
    return %arg0, %c0_i32, %c0_i32_0 : i32, i32, i32
  }
  func.func @transform_5(%arg0: i32, %arg1: i32) -> (i32, i32, i32) {
    %c0_i32 = arith.constant 0 : i32
    %c0_i32_0 = arith.constant 0 : i32
    %c0_i32_1 = arith.constant 0 : i32
    return %arg0, %c0_i32, %c0_i32_0 : i32, i32, i32
  }
}

</mosaic_0001>

<bundles_post_ra>
// kernel: custom-call.356
= control target key start
LH: loop header
LB: loop body
LE: loop exit
PB: predicated region body
PF: predicated region fallthrough
CT: control target
= control target key end

     0   :  { %s645_s9 = smov 0   ;;  %s647_s10 = smov 0   ;;  %s795_s0 = inlined_call_operand.vmem [shape: f32[2,6,3], index: 0, kind: input, shape index: {}]   ;;  %s796_s1 = inlined_call_operand.vmem [shape: f32[2,6,3], index: 1, kind: output, shape index: {0}]   ;;  %s797_s2 = inlined_call_operand.vmem [shape: f32[2,3], index: 2, kind: output, shape index: {1}]  }
   0x1   :  { %s649_s11 = smov 0   ;;  %s651_s12 = smov 0  }
   0x2   :  { %s653_s13 = smov 0  }
   0x3 LB: > { %s28_s14 = sadd.s32 1, %s618_s12  ;;  %s500_s15 = sadd.s32 4294967295, %s622_s13   ;;  %s622_s13 = sphi %s653_s13, %s9_s13   ;;  %s618_s12 = sphi %s651_s12, %s804_s12   ;;  %s614_s11 = sphi %s649_s11, %s803_s11   ;;  %s610_s10 = sphi %s647_s10, %s802_s10   ;;  %s606_s9 = sphi %s645_s9, %s801_s9  }
   0x4   : > { %p30_p0 = scmp.ge.s32.totalorder %s28_s14, 2  ;;  %s33_s16 = ssub.s32 0, %s618_s12 }
   0x5   : > { %s502_s17 = smin.u32 %s618_s12, %s33_s16  ;;  %p57_p1 = scmp.ne.s32.totalorder %s610_s10, %s606_s9 }
   0x6   : > { %s806_s14 = smov (%p30_p0, %s28_s14), 0  ;;  %s35_s18 = sshrl.u32 %s502_s17, 3 }
   0x7   : > { %s39_s19 = ssub.s32 0, %s806_s14  ;;  %p58_p2 = scmp.eq.s32.totalorder %s500_s15, 1 }
   0x8   : > { %s503_s20 = smin.u32 %s39_s19, %s806_s14  ;;  %s47_s24 = sadd.s32 1, %s610_s10 }
   0x9   : > { %s41_s21 = sshrl.u32 %s503_s20, 3  ;;  %p680_p3 = por %p58_p2, %p57_p1 }
   0xa   : > { %s44_s23 = ssub.s32 %s35_s18, %s41_s21  ;;  %p505_p5 = scmp.ge.s32.totalorder %s622_s13, 2 }
   0xb   : > { %p45_p4 = scmp.eq.s32.totalorder %s44_s23, 0  ;;  %s82_s26 = sand.u32 (!%p505_p5), 1, %s622_s13  }
   0xc   : > { %80 = sbr.rel (%p505_p5) target bundleno = 19 (0x13), region = 16  ;;  %s507_s27 = sshll.u32 (!%p505_p5), %s618_s12, 3 }
   0xd   : > { %s686_s25 = scalar_select %p45_p4, %s610_s10, %s47_s24  }
   0xe   : > { %s506_s28 = sshll.u32 (!%p505_p5), %s82_s26, 3  ;;  %s88_s3 = scalar_lea.vmem (!%p505_p5), %s795_s0, %s507_s27 }
   0xf   : > { %v116_v0 = vld [vmem:[%s88_s3] sm:$0xff] (!%p505_p5)  ;;  %s84_s4 = scalar_lea.vmem (!%p505_p5), [#allocation0], %s506_s28 }
  0x10   : > { %117 = vst [vmem:[%s84_s4] sm:$0xff] (!%p505_p5), %v116_v0 }
  0x13 PF: > { %p508_p6 = scmp.ge.s32.totalorder %s622_s13, 1  ;;  %p122_p7 = scmp.lt.s32.totalorder %s622_s13, 3 }
  0x15   : > { %p123_p8 = pnand %p508_p6, %p122_p7 }
  0x17   : > { %126 = sbr.rel (%p123_p8) target bundleno = 330 (0x14a), region = 54 }
  0x1e   : > { %s129_s5 = sand.u32 1, %s500_s15   ;;  %s143_s6 = sand.u32 1, %s606_s9   ;;  %v628_v2 = vmov 0.0  }
  0x1f   : > { %s509_s7 = sshll.u32 %s129_s5, 3  ;;  %s697_s8 = sshll.u32 %s143_s6, 1 }
  0x20   : > { %s152_s16 = sand.u32 7, %s614_s11   ;;  %s131_s17 = scalar_lea.vmem [#allocation0], %s509_s7 }
  0x21   : > { %v154_v1 = vld [vmem:[%s131_s17] sm:$0xff]  ;;  %s700_s18 = scalar_lea.vmem [#allocation1], %s509_s7  ;;  %s703_s19 = scalar_lea.vmem [#allocation2], %s152_s16 }
  0x22   : > { %155 = vst [vmem:[%s700_s18] sm:$0xff] %v154_v1  ;;  %156 = vst [vmem:[%s703_s19] sm:$0x1] %v628_v2  ;;  %s145_s15 = scalar_lea.vmem [#allocation3], %s697_s8  ;;  %s707_s20 = smov 0  }
  0x23 LB: >> { %v164_v3 = vlaneseq  ;;  %v716_v5 = vstv %s626_s20  ;;  %s191_s9 = scalar_lea.vmem %s700_s18, %s626_s20 [#allocation1]  ;;  %s249_s21 = scalar_lea.vmem [#allocation4], %s626_s20  ;;  %v629_v59 = vmov 1.0   ;;  %s626_s20 = sphi %s707_s20, %s162_s20  }
  0x24   : >> { %s266_s23 = smov [#allocation4] }
  0x25   : >> { %v713_v4 = vshrl.u32 %v164_v3, 7  ;;  %v243_v48 = vand.u32 127, %v164_v3 }
  0x27   : >> { %vm168_vm0 = vcmp.gt.s32.totalorder %v713_v4, %v716_v5  ;;  %vm169_vm1 = vcmp.lt.s32.totalorder %v713_v4, 6  ;;  %v230_v4 = vmov %v713_v4  ;;  %vm734_vm12 = vcmp.eq.s32.totalorder %v243_v48, %v716_v5 }
  0x28   : >> { %vm170_vm2 = vmand %vm168_vm0, %vm169_vm1  ;;  %vm234_vm9 = vcmp.gt.s32.totalorder %v230_v4, %v716_v5  ;;  %vm235_vm10 = vcmp.lt.s32.totalorder %v230_v4, 6  ;;  %v269_v4 = vmov %v713_v4  ;;  %vm295_vm15 = vcmp.gt.s32.totalorder %v243_v48, %v716_v5 }
  0x29   : >> { %v163_v6 = vld [vmem:[%s700_s18] sm:$0xff]  ;;  %v192_v15 = vld [vmem:[%s191_s9] ss:$0 sm:$0xff]  ;;  %s227_s18 = smov %s700_s18  ;;  %vm236_vm11 = vmand %vm234_vm9, %vm235_vm10  ;;  %vm274_vm13 = vcmp.lt.s32.totalorder %v269_v4, 6  ;;  %v286_v4 = vmov %v713_v4 }
  0x2a   : >> { %v171_v7 = vsel %vm170_vm2, %v163_v6, 0.0  ;;  %v193_v16 = vand.u32 2147483647, %v192_v15  ;;  %vm218_vm8 = vcmp.lt.f32.partialorder %v192_v15, 0.0  ;;  %v231_v45 = vld [vmem:[%s227_s18] sm:$0xff]  ;;  %s265_s18 = smov %s700_s18  ;;  %vm303_vm14 = vcmp.ge.s32.totalorder %v286_v4, %v716_v5 }
  0x2b   : >> { %v172_v8 = vmul.f32 %v171_v7, %v171_v7  ;;  %v237_v49 = vsel %vm236_vm11, %v231_v45, 0.0  ;;  %v262_v60 = vld [vmem:[%s703_s19] ss:$0 sm:$0xff]  ;;  %vm304_vm0 = vmand %vm734_vm12, %vm303_vm14 }
  0x2c   : >> { %v194_v21 = vmax.f32 %v193_v16, 0.0  ;;  %v272_v63 = vld [vmem:[%s265_s18] sm:$0xff]  ;;  %s282_s18 = smov %s265_s18 }
  0x2d   : >> { %v173_v9 = vrot.slane %v172_v8, 4  ;;  %s307_s24 = scalar_lea.vmem %s282_s18, %s626_s20  ;;  %s162_s20 = sadd.s32 1, %s626_s20  }
  0x2e   : >> { %p159_p9 = scmp.ge.s32.totalorder %s162_s20, 3  }
  0x2f   : >> { %v174_v10 = vadd.f32 %v173_v9, %v172_v8  ;;  %s515_s26 = sshll.u32 (%p159_p9), %s614_s11, 3 }
  0x30   : > { %s332_s29 = scalar_lea.vmem (%p159_p9), %s796_s1, %s515_s26 }
  0x31   : >> { %v175_v11 = vrot.slane %v174_v10, 2 }
  0x33   : >> { %v176_v12 = vadd.f32 %v175_v11, %v174_v10 }
  0x35   : >> { %v177_v13 = vrot.slane %v176_v12, 1 }
  0x37   : >> { %v178_v14 = vadd.f32 %v177_v13, %v176_v12  ;;  %v293_v13 = vld [vmem:[%s282_s18] sm:$0xff] }
  0x39   : >> { %570 = vrsqrt.f32 %v178_v14  ;;  %vm181_vm3 = vcmp.eq.f32.partialorder %v178_v14, inf  ;;  %v184_v18 = vand.u32 2147483648, %v178_v14  ;;  %vm183_vm4 = vcmp.eq.f32.partialorder %v178_v14, 0.0 }
  0x43   : >> { %v571_v17 = vpop.eup %570 }
  0x44   : >> { %v180_v19 = vmul.f32 %v571_v17, %v178_v14 }
  0x46   : >> { %v182_v20 = vsel %vm181_vm3, %v178_v14, %v180_v19 }
  0x47   : >> { %v185_v22 = vsel %vm183_vm4, %v184_v18, %v182_v20 }
  0x48   : >> { %v195_v23 = vand.u32 2147483647, %v185_v22 }
  0x4a   : >> { %v196_v24 = vmax.f32 %v194_v21, %v195_v23 }
  0x4c   : >> { %572 = vrcp.f32 %v196_v24  ;;  %vm208_vm7 = vcmp.eq.f32.partialorder %v196_v24, 0.0 }
  0x56   : >> { %v573_v25 = vpop.eup %572 }
  0x57   : >> { %v198_v26 = vmul.f32 %v573_v25, %v193_v16  ;;  %v201_v27 = vmul.f32 0.0, %v573_v25  ;;  %v205_v28 = vmul.f32 %v573_v25, %v195_v23 }
  0x59   : >> { %v199_v29 = vmul.f32 %v198_v26, %v198_v26  ;;  %v202_v30 = vmul.f32 %v201_v27, %v201_v27  ;;  %v206_v31 = vmul.f32 %v205_v28, %v205_v28 }
  0x5b   : >> { %v203_v32 = vadd.f32 %v202_v30, %v199_v29 }
  0x5d   : >> { %v207_v33 = vadd.f32 %v206_v31, %v203_v32 }
  0x5f   : >> { %574 = vrsqrt.f32 %v207_v33  ;;  %vm211_vm5 = vcmp.eq.f32.partialorder %v207_v33, inf  ;;  %v214_v35 = vand.u32 2147483648, %v207_v33  ;;  %vm213_vm6 = vcmp.eq.f32.partialorder %v207_v33, 0.0 }
  0x69   : >> { %v575_v34 = vpop.eup %574 }
  0x6a   : >> { %v210_v36 = vmul.f32 %v575_v34, %v207_v33 }
  0x6c   : >> { %v212_v37 = vsel %vm211_vm5, %v207_v33, %v210_v36 }
  0x6d   : >> { %v215_v38 = vsel %vm213_vm6, %v214_v35, %v212_v37 }
  0x6e   : >> { %v216_v39 = vmul.f32 %v215_v38, %v196_v24 }
  0x70   : >> { %v217_v40 = vsel %vm208_vm7, 0.0, %v216_v39 }
  0x71   : >> { %v219_v41 = vxor.u32 2147483648, %v217_v40 }
  0x73   : >> { %v220_v42 = vsel %vm218_vm8, %v217_v40, %v219_v41 }
  0x74   : >> { %v726_v43 = vsel %vm183_vm4, %v192_v15, %v220_v42  ;;  %576 = vrcp.f32 %v220_v42  ;;  %v221_v46 = vsub.f32 %v220_v42, %v192_v15 }
  0x75   : >> { %v226_v44 = vsub.f32 %v192_v15, %v726_v43 }
  0x77   : >> { %578 = vrcp.f32 %v226_v44 }
  0x7e   : >> { %v577_v47 = vpop.eup %576 }
  0x7f   : >> { %v223_v50 = vmul.f32 %v577_v47, %v221_v46 }
  0x81   : >> { %v579_v51 = vpop.eup %578  ;;  %v225_v55 = vsel %vm183_vm4, 0.0, %v223_v50 }
  0x82   : >> { %v239_v52 = vmul.f32 %v579_v51, %v237_v49  ;;  %v255_v57 = vsel %vm734_vm12, %v225_v55, 0.0 }
  0x84   : >> { %v240_v54 = vsel %vm183_vm4, 0.0, %v239_v52 }
  0x85   : >> { %v245_v56 = vsel %vm734_vm12, %v240_v54, 0.0 }
  0x86   : >> { %246 = vadd.xlane.f32.xlu0 %v245_v56 }
  0x8a   : >> { %256 = vadd.xlane.f32.xlu0 %v255_v57 }
 0x113   : >> { %v247_v58 = vpop.xlane.xlu0 %246 }
 0x114   : >> { %248 = vst [vmem:[#allocation4] sm:$0xff] %v247_v58 }
 0x115   : >> { %250 = vst [vmem:[%s249_s21] sm:$0x1] %v629_v59 }
 0x117   : >> { %v257_v61 = vpop.xlane.xlu0 %256 }
 0x118   : >> { %v263_v62 = vsel %vm734_vm12, %v257_v61, %v262_v60 }
 0x119   : >> { %264 = vst [vmem:[%s703_s19] sm:$0x1] %v263_v62 }
 0x11c   : >> { %v271_v0 = vld [vmem:[%s266_s23] sm:$0xff]  ;;  %s283_s23 = smov %s266_s23 }
 0x11d   : >> { %v273_v1 = vmul.f32 %v272_v63, %v271_v0  ;;  %v291_v12 = vld [vmem:[%s283_s23] sm:$0xff] }
 0x11f   : >> { %v275_v2 = vsel %vm274_vm13, %v273_v1, 0.0 }
 0x120   : >> { %v276_v3 = vrot.slane %v275_v2, 4  ;;  %v318_v4 = vld [vmem:[#allocation2] sm:$0x3] (%p159_p9) }
 0x121   : > { %320 = vst [vmem:[%s145_s15] sm:$0x3] (%p159_p9), %v318_v4 }
 0x122   : >> { %v277_v6 = vadd.f32 %v276_v3, %v275_v2 }
 0x124   : >> { %v278_v7 = vrot.slane %v277_v6, 2 }
 0x126   : >> { %v279_v8 = vadd.f32 %v278_v7, %v277_v6 }
 0x128   : >> { %v280_v9 = vrot.slane %v279_v8, 1 }
 0x12a   : >> { %v281_v10 = vadd.f32 %v280_v9, %v279_v8 }
 0x12c   : >> { %v287_v11 = vmul.f32 %v281_v10, %v257_v61 }
 0x12e   : >> { %v292_v14 = vmul.f32 %v291_v12, %v287_v11 }
 0x130   : >> { %v296_v15 = vsub.f32 %v293_v13, %v292_v14 }
 0x132   : >> { %v297_v16 = vsel %vm295_vm15, %v296_v15, %v293_v13 }
 0x133   : >> { %v305_v17 = vsel %vm304_vm0, %v291_v12, %v297_v16 }
 0x134   : >> { %306 = vst [vmem:[%s282_s18] sm:$0xff] %v305_v17 }
 0x137   : > { %161 = sbr.rel (!%p159_p9) target bundleno = 35 (0x23), region = 175 }
 0x13b   : >> { %v308_v18 = vld [vmem:[%s307_s24] ss:$0 sm:$0xff] }
 0x13c   : >> { %v313_v19 = vsel %vm734_vm12, %v726_v43, %v308_v18 }
 0x13d   : >> { %314 = vst [vmem:[%s307_s24] sm:$0x1] %v313_v19 }
 0x13e   : > { %p368_p10 = scmp.lt.s32.totalorder (%p680_p3), %s614_s11, 0  ;;  %s369_s30 = ssub.s32 (%p680_p3), 0, %s614_s11  ;;  %v391_v20 = vld [vmem:[%s145_s15] sm:$0x3] (%p680_p3) }
 0x13f   : > { %367 = sbr.rel (!%p680_p3) target bundleno = 330 (0x14a), region = 99  ;;  %s516_s3 = smin.u32 (%p680_p3), %s614_s11, %s369_s30 }
 0x140   : > { %s371_s4 = sshrl.u32 (%p680_p3), %s516_s3, 3 }
 0x141   : > { %s372_s5 = ssub.s32 (%p680_p3), 0, %s371_s4 }
 0x144   : > { %v360_v5 = vld [vmem:[%s700_s18] sm:$0xff] }
 0x145   : > { %361 = vst [vmem:[%s332_s29] sm:$0xff] %v360_v5 }
 0x146   : > { %s808_s5 = smov (!%p368_p10, %s372_s5), %s371_s4 }
 0x147   : > { %s517_s6 = sshll.u32 %s808_s5, 1 }
 0x148   : > { %s375_s17 = scalar_lea.vmem %s797_s2, %s517_s6 }
 0x149   : > { %392 = vst [vmem:[%s375_s17] sm:$0x3] %v391_v20 }
 0x14a PF: > { %s9_s13 = sadd.s32 1, %s622_s13   ;;  %s801_s9 = smov %s610_s10 }
 0x14b   : > { %p6_p11 = scmp.ge.s32.totalorder %s9_s13, 4   ;;  %s802_s10 = smov %s686_s25 }
 0x14c   : > { %s803_s11 = smov %s618_s12  ;;  %s804_s12 = smov %s806_s14 }
 0x14d   :  { %8 = sbr.rel (!%p6_p11) target bundleno = 3 (0x3), region = 186 }

// kernel: custom-call.357
= control target key start
LH: loop header
LB: loop body
LE: loop exit
PB: predicated region body
PF: predicated region fallthrough
CT: control target
= control target key end

     0   :  { %s236_s6 = smov 0   ;;  %s263_s0 = inlined_call_operand.vmem [shape: f32[2,3,3], index: 0, kind: input, shape index: {}]   ;;  %s264_s1 = inlined_call_operand.vmem [shape: f32[2,3,3], index: 1, kind: output, shape index: {}]  }
   0x1 LB: > { %s198_s7 = sadd.s32 4294967295, %s224_s6   ;;  %p200_p0 = scmp.ge.s32.totalorder %s224_s6, 2  ;;  %s224_s6 = sphi %s236_s6, %s7_s6  }
   0x2   : > { %s23_s8 = sand.u32 (!%p200_p0), 1, %s224_s6   ;;  %s202_s9 = sshll.u32 (!%p200_p0), %s224_s6, 2 }
   0x3   : > { %21 = sbr.rel (%p200_p0) target bundleno = 10 (0xa), region = 16  ;;  %s201_s10 = sshll.u32 (!%p200_p0), %s23_s8, 2 }
   0x4   : > { %s27_s13 = scalar_lea.vmem (!%p200_p0), %s263_s0, %s202_s9  ;;  %s25_s14 = scalar_lea.vmem (!%p200_p0), [#allocation1], %s201_s10 }
   0x5   : > { %v43_v0 = vld [vmem:[%s27_s13] sm:$0xf] (!%p200_p0) }
   0x6   : > { %44 = vst [vmem:[%s25_s14] sm:$0xf] (!%p200_p0), %v43_v0 }
   0xa PF: > { %p203_p1 = scmp.ge.s32.totalorder %s224_s6, 1  ;;  %p60_p2 = scmp.lt.s32.totalorder %s224_s6, 3 }
   0xc   : > { %p61_p3 = pnand %p203_p1, %p60_p2 }
   0xd   : > { %s252_s15 = sand.u32 (!%p61_p3), 1, %s198_s7   ;;  %v82_v1 = vlaneseq (!%p61_p3)  ;;  %vm96_vm1 = vcmask (!%p61_p3), 23552   ;;  %s207_s19 = sshll.u32 (!%p61_p3), %s198_s7, 2 }
   0xe   : > { %64 = sbr.rel (%p61_p3) target bundleno = 334 (0x14e), region = 50  ;;  %s204_s16 = sshll.u32 (!%p61_p3), %s252_s15, 2 }
   0xf   : > { %s73_s17 = scalar_lea.vmem (!%p61_p3), [#allocation1], %s204_s16  ;;  %v83_v3 = vand.u32 (!%p61_p3), 127, %v82_v1  ;;  %v85_v4 = vshrl.u32 (!%p61_p3), %v82_v1, 7  ;;  %s77_s18 = scalar_lea.vmem (!%p61_p3), [#allocation3], %s204_s16 }
  0x10   : > { %v80_v2 = vld [vmem:[%s73_s17] sm:$0xf] (!%p61_p3)  ;;  %s128_s22 = scalar_lea.vmem (!%p61_p3), %s264_s1, %s207_s19 }
  0x11   : > { %81 = vst [vmem:[#allocation0] sm:$0xf] (!%p61_p3), %v80_v2  ;;  %vm91_vm0 = vcmp.eq.s32.totalorder (!%p61_p3), %v83_v3, 0  ;;  %vm87_vm2 = vcmp.eq.s32.totalorder (!%p61_p3), %v83_v3, %v85_v4  ;;  %vm100_vm3 = vcmp.eq.s32.totalorder (!%p61_p3), %v83_v3, 1  ;;  %vm111_vm4 = vcmp.eq.s32.totalorder (!%p61_p3), %v83_v3, 2 }
  0x18   : > { %v88_v5 = vld [vmem:[#allocation0] sm:$0xff] }
  0x19   : > { %v95_v6 = vld [vmem:[#allocation0 + $0x1] ss:$0 sm:$0xff]  ;;  %v92_v7 = vsel %vm91_vm0, %v88_v5, 1.0  ;;  %v106_v11 = vld [vmem:[#allocation0 + $0x2] ss:$0 sm:$0xff] }
  0x1a   : > { %v97_v8 = vsel %vm96_vm1, %v95_v6, 0.0  ;;  %v93_v9 = vsel %vm87_vm2, %v92_v7, 0.0  ;;  %v108_v12 = vsel %vm96_vm1, %v106_v11, 0.0 }
  0x1b   : > { %v101_v10 = vmul.f32 %v97_v8, %v93_v9 }
  0x1d   : > { %102 = vadd.xlane.f32.xlu0 %v101_v10 }
  0xaa   : > { %v103_v13 = vpop.xlane.xlu0 %102 }
  0xab   : > { %v104_v14 = vsel %vm100_vm3, %v103_v13, %v93_v9 }
  0xac   : > { %v112_v15 = vmul.f32 %v108_v12, %v104_v14 }
  0xae   : > { %113 = vadd.xlane.f32.xlu0 %v112_v15 }
 0x13b   : > { %v114_v16 = vpop.xlane.xlu0 %113 }
 0x13c   : > { %v115_v17 = vsel %vm111_vm4, %v114_v16, %v104_v14 }
 0x13d   : > { %116 = vst [vmem:[#allocation2] sm:$0xff] %v115_v17 }
 0x144   : > { %v120_v18 = vld [vmem:[#allocation2] sm:$0xf] }
 0x145   : > { %122 = vst [vmem:[%s77_s18] sm:$0xf] %v120_v18 }
 0x14c   : > { %v144_v19 = vld [vmem:[%s77_s18] sm:$0xf] }
 0x14d   : > { %145 = vst [vmem:[%s128_s22] sm:$0xf] %v144_v19 }
 0x14e PF: > { %s7_s6 = sadd.s32 1, %s224_s6  }
 0x14f   : > { %p4_p4 = scmp.ge.s32.totalorder %s7_s6, 4  }
 0x151   :  { %6 = sbr.rel (!%p4_p4) target bundleno = 1 (0x1), region = 112 }

// kernel: custom-call.358
= control target key start
LH: loop header
LB: loop body
LE: loop exit
PB: predicated region body
PF: predicated region fallthrough
CT: control target
= control target key end

     0   :  { %s343_s6 = smov 0   ;;  %s345_s7 = smov 0   ;;  %s390_s0 = inlined_call_operand.vmem [shape: f32[2,3,3], index: 0, kind: input, shape index: {}]   ;;  %s391_s1 = inlined_call_operand.vmem [shape: f32[2,3,3], index: 1, kind: output, shape index: {}]  }
   0x1   :  { %s347_s8 = smov 0  }
   0x2 LB: > { %s265_s9 = sadd.s32 4294967295, %s330_s8   ;;  %s26_s10 = sadd.s32 1, %s326_s7  ;;  %s330_s8 = sphi %s347_s8, %s7_s8   ;;  %s326_s7 = sphi %s345_s7, %s393_s7   ;;  %s322_s6 = sphi %s343_s6, %s392_s6  }
   0x3   : > { %p28_p0 = scmp.ge.s32.totalorder %s26_s10, 2  ;;  %p267_p1 = scmp.ge.s32.totalorder %s330_s8, 2 }
   0x4   : > { %s42_s11 = sand.u32 (!%p267_p1), 1, %s330_s8   ;;  %s269_s12 = sshll.u32 (!%p267_p1), %s326_s7, 2 }
   0x5   : > { %s395_s10 = smov (%p28_p0, %s26_s10), 0  ;;  %40 = sbr.rel (%p267_p1) target bundleno = 12 (0xc), region = 16 }
   0x6   : > { %s268_s13 = sshll.u32 (!%p267_p1), %s42_s11, 2  ;;  %s48_s16 = scalar_lea.vmem (!%p267_p1), %s390_s0, %s269_s12 }
   0x7   : > { %v64_v0 = vld [vmem:[%s48_s16] sm:$0xf] (!%p267_p1)  ;;  %s44_s17 = scalar_lea.vmem (!%p267_p1), [#allocation1], %s268_s13 }
   0x8   : > { %65 = vst [vmem:[%s44_s17] sm:$0xf] (!%p267_p1), %v64_v0 }
   0xc PF: > { %p270_p2 = scmp.ge.s32.totalorder %s330_s8, 1  ;;  %p81_p3 = scmp.lt.s32.totalorder %s330_s8, 3 }
   0xe   : > { %p82_p4 = pnand %p270_p2, %p81_p3 }
   0xf   : > { %v332_v1 = vmov (!%p82_p4), 0.0   ;;  %s370_s18 = sand.u32 (!%p82_p4), 1, %s265_s9   ;;  %vm104_vm0 = vcmask (!%p82_p4), 7168   ;;  %vm122_vm1 = vcmask (!%p82_p4), 15368   ;;  %vm139_vm2 = vcmask (!%p82_p4), 1047553   ;;  %s274_s22 = sshll.u32 (!%p82_p4), %s322_s6, 2 }
  0x10   : > { %85 = sbr.rel (%p82_p4) target bundleno = 541 (0x21d), region = 50  ;;  %103 = vst [vmem:[#allocation2] sm:$0xff] (!%p82_p4), %v332_v1  ;;  %s271_s19 = sshll.u32 (!%p82_p4), %s370_s18, 2  ;;  %vm140_vm3 = vmand (!%p82_p4), %vm122_vm1, %vm139_vm2  ;;  %vm144_vm4 = vcmask (!%p82_p4), 23568   ;;  %vm161_vm5 = vcmask (!%p82_p4), 1047554  }
  0x11   : > { %s94_s20 = scalar_lea.vmem (!%p82_p4), [#allocation1], %s271_s19  ;;  %vm162_vm6 = vmand (!%p82_p4), %vm144_vm4, %vm161_vm5  ;;  %s98_s21 = scalar_lea.vmem (!%p82_p4), [#allocation3], %s271_s19 }
  0x12   : > { %v101_v5 = vld [vmem:[%s94_s20] sm:$0xf] (!%p82_p4)  ;;  %s179_s25 = scalar_lea.vmem (!%p82_p4), %s391_s1, %s274_s22 }
  0x13   : > { %102 = vst [vmem:[#allocation0] sm:$0xf] (!%p82_p4), %v101_v5 }
  0x17   : > { %v105_v2 = vld [vmem:[#allocation2] ss:$0 sm:$0xff] }
  0x18   : > { %v107_v3 = vmul.f32 %v105_v2, %v105_v2  ;;  %v114_v4 = vmul.f32 0.0, %v105_v2 }
  0x1a   : > { %108 = vadd.xlane.f32.xlu0 %v107_v3  ;;  %v106_v6 = vld [vmem:[#allocation0] ss:$0 sm:$0xff]  ;;  %v126_v18 = vld [vmem:[#allocation0 + $0x1] ss:$0 sm:$0xff]  ;;  %v148_v30 = vld [vmem:[#allocation0 + $0x2] ss:$0 sm:$0xff] }
  0x1b   : > { %v112_v10 = vld [vmem:[#allocation0] sm:$0xff] }
  0x1e   : > { %115 = vadd.xlane.f32.xlu0 %v114_v4 }
  0xa7   : > { %v109_v7 = vpop.xlane.xlu0 %108 }
  0xa8   : > { %v110_v8 = vsub.f32 %v106_v6, %v109_v7 }
  0xaa   : > { %302 = vrsqrt.f32 %v110_v8 }
  0xab   : > { %v116_v9 = vpop.xlane.xlu0 %115 }
  0xac   : > { %v117_v11 = vsub.f32 %v112_v10, %v116_v9 }
  0xb4   : > { %v303_v12 = vpop.eup %302 }
  0xb5   : > { %v118_v13 = vmul.f32 %v303_v12, %v117_v11 }
  0xb7   : > { %v119_v14 = vsel %vm104_vm0, %v118_v13, 0.0 }
  0xb8   : > { %121 = vst [vmem:[#allocation2] sm:$0xff] %v119_v14 }
  0xbf   : > { %v124_v15 = vld [vmem:[#allocation2 + $0x1] ss:$0 sm:$0xff] }
  0xc0   : > { %v127_v16 = vmul.f32 %v124_v15, %v124_v15  ;;  %v134_v17 = vmul.f32 %v124_v15, %v119_v14 }
  0xc2   : > { %128 = vadd.xlane.f32.xlu1 %v127_v16 }
  0xc6   : > { %135 = vadd.xlane.f32.xlu1 %v134_v17 }
 0x14f   : > { %v129_v19 = vpop.xlane.xlu1 %128 }
 0x150   : > { %v130_v20 = vsub.f32 %v126_v18, %v129_v19 }
 0x152   : > { %304 = vrsqrt.f32 %v130_v20 }
 0x153   : > { %v136_v21 = vpop.xlane.xlu1 %135 }
 0x154   : > { %v137_v22 = vsub.f32 %v112_v10, %v136_v21 }
 0x15c   : > { %v305_v23 = vpop.eup %304 }
 0x15d   : > { %v138_v24 = vmul.f32 %v305_v23, %v137_v22 }
 0x15f   : > { %v141_v25 = vsel %vm140_vm3, %v138_v24, 0.0 }
 0x160   : > { %v142_v26 = vadd.f32 %v141_v25, %v119_v14 }
 0x162   : > { %143 = vst [vmem:[#allocation2] sm:$0xff] %v142_v26 }
 0x169   : > { %v146_v27 = vld [vmem:[#allocation2 + $0x2] ss:$0 sm:$0xff] }
 0x16a   : > { %v156_v28 = vmul.f32 %v146_v27, %v142_v26  ;;  %v149_v29 = vmul.f32 %v146_v27, %v146_v27 }
 0x16c   : > { %157 = vadd.xlane.f32.xlu1 %v156_v28  ;;  %150 = vadd.xlane.f32.xlu0 %v149_v29 }
 0x1f9   : > { %v151_v31 = vpop.xlane.xlu0 %150  ;;  %v158_v33 = vpop.xlane.xlu1 %157 }
 0x1fa   : > { %v152_v32 = vsub.f32 %v148_v30, %v151_v31  ;;  %v159_v34 = vsub.f32 %v112_v10, %v158_v33 }
 0x1fc   : > { %306 = vrsqrt.f32 %v152_v32 }
 0x206   : > { %v307_v35 = vpop.eup %306 }
 0x207   : > { %v160_v36 = vmul.f32 %v307_v35, %v159_v34 }
 0x209   : > { %v163_v37 = vsel %vm162_vm6, %v160_v36, 0.0 }
 0x20a   : > { %v164_v38 = vadd.f32 %v163_v37, %v142_v26 }
 0x20c   : > { %165 = vst [vmem:[#allocation2] sm:$0xff] %v164_v38 }
 0x213   : > { %v169_v39 = vld [vmem:[#allocation2] sm:$0xf] }
 0x214   : > { %171 = vst [vmem:[%s98_s21] sm:$0xf] %v169_v39 }
 0x21b   : > { %v195_v40 = vld [vmem:[%s98_s21] sm:$0xf] }
 0x21c   : > { %196 = vst [vmem:[%s179_s25] sm:$0xf] %v195_v40 }
 0x21d PF: > { %s7_s8 = sadd.s32 1, %s330_s8   ;;  %s392_s6 = smov %s326_s7 }
 0x21e   : > { %p4_p5 = scmp.ge.s32.totalorder %s7_s8, 4   ;;  %s393_s7 = smov %s395_s10 }
 0x220   :  { %6 = sbr.rel (!%p4_p5) target bundleno = 2 (0x2), region = 114 }

// kernel: custom-call.359
= control target key start
LH: loop header
LB: loop body
LE: loop exit
PB: predicated region body
PF: predicated region fallthrough
CT: control target
= control target key end

     0   :  { %s343_s6 = smov 0   ;;  %s345_s7 = smov 0   ;;  %s390_s0 = inlined_call_operand.vmem [shape: f32[2,1,3,3], index: 0, kind: input, shape index: {}]   ;;  %s391_s1 = inlined_call_operand.vmem [shape: f32[2,1,3,3], index: 1, kind: output, shape index: {}]  }
   0x1   :  { %s347_s8 = smov 0  }
   0x2 LB: > { %s269_s9 = sadd.s32 4294967295, %s330_s8   ;;  %s33_s10 = sadd.s32 1, %s326_s7  ;;  %s330_s8 = sphi %s347_s8, %s7_s8   ;;  %s326_s7 = sphi %s345_s7, %s393_s7   ;;  %s322_s6 = sphi %s343_s6, %s392_s6  }
   0x3   : > { %p35_p0 = scmp.ge.s32.totalorder %s33_s10, 2  ;;  %p271_p1 = scmp.ge.s32.totalorder %s330_s8, 2 }
   0x4   : > { %s49_s11 = sand.u32 (!%p271_p1), 1, %s330_s8   ;;  %s273_s12 = sshll.u32 (!%p271_p1), %s326_s7, 2 }
   0x5   : > { %s395_s10 = smov (%p35_p0, %s33_s10), 0  ;;  %47 = sbr.rel (%p271_p1) target bundleno = 12 (0xc), region = 16 }
   0x6   : > { %s272_s13 = sshll.u32 (!%p271_p1), %s49_s11, 2  ;;  %s56_s16 = scalar_lea.vmem (!%p271_p1), %s390_s0, %s273_s12 }
   0x7   : > { %v72_v0 = vld [vmem:[%s56_s16] sm:$0xf] (!%p271_p1)  ;;  %s51_s17 = scalar_lea.vmem (!%p271_p1), [#allocation1], %s272_s13 }
   0x8   : > { %73 = vst [vmem:[%s51_s17] sm:$0xf] (!%p271_p1), %v72_v0 }
   0xc PF: > { %p274_p2 = scmp.ge.s32.totalorder %s330_s8, 1  ;;  %p89_p3 = scmp.lt.s32.totalorder %s330_s8, 3 }
   0xe   : > { %p90_p4 = pnand %p274_p2, %p89_p3 }
  0x10   : > { %93 = sbr.rel (%p90_p4) target bundleno = 511 (0x1ff), region = 50 }
  0x17   : > { %s370_s18 = sand.u32 1, %s269_s9   ;;  %v111_v1 = vlaneseq  ;;  %v332_v11 = vmov -1.0   ;;  %s278_s22 = sshll.u32 %s322_s6, 2 }
  0x18   : > { %s275_s19 = sshll.u32 %s370_s18, 2  ;;  %s178_s25 = scalar_lea.vmem %s391_s1, %s278_s22 }
  0x19   : > { %s102_s20 = scalar_lea.vmem [#allocation1], %s275_s19  ;;  %v112_v3 = vand.u32 127, %v111_v1  ;;  %v115_v4 = vshrl.u32 %v111_v1, 7  ;;  %s106_s21 = scalar_lea.vmem [#allocation3], %s275_s19 }
  0x1a   : > { %v109_v2 = vld [vmem:[%s102_s20] sm:$0xf] }
  0x1b   : > { %110 = vst [vmem:[#allocation0] sm:$0xf] %v109_v2  ;;  %vm113_vm0 = vcmp.lt.s32.totalorder %v112_v3, 3  ;;  %vm122_vm1 = vcmp.ge.s32.totalorder %v115_v4, %v112_v3  ;;  %vm117_vm2 = vcmp.eq.s32.totalorder %v115_v4, %v112_v3  ;;  %vm136_vm4 = vcmp.eq.s32.totalorder %v112_v3, 0 }
  0x1c   : > { %vm123_vm3 = vmand %vm122_vm1, %vm113_vm0  ;;  %vm133_vm5 = vcmp.eq.s32.totalorder %v112_v3, %v115_v4  ;;  %v137_v12 = vsel %vm136_vm4, 1.0, %v332_v11  ;;  %vm144_vm6 = vcmp.eq.s32.totalorder %v112_v3, 1  ;;  %vm154_vm7 = vcmp.eq.s32.totalorder %v112_v3, 2 }
  0x1d   : > { %v138_v13 = vsel %vm133_vm5, %v137_v12, 0.0 }
  0x22   : > { %v118_v5 = vld [vmem:[#allocation0] sm:$0xff] }
  0x23   : > { %v119_v6 = vsel %vm117_vm2, %v118_v5, 0.0  ;;  %v124_v7 = vsel %vm123_vm3, %v118_v5, 0.0 }
  0x24   : > { %120 = vadd.xlane.f32.xlu0 %v119_v6 }
  0xb1   : > { %v121_v8 = vpop.xlane.xlu0 %120 }
  0xb2   : > { %306 = vrcp.f32 %v121_v8  ;;  %vm161_vm8 = vweird.f32 %v121_v8 }
  0xbc   : > { %v307_v9 = vpop.eup %306 }
  0xbd   : > { %v126_v10 = vmul.f32 %v307_v9, %v124_v7 }
  0xbf   : > { %127 = vst [vmem:[#allocation4] sm:$0xff] %v126_v10 }
  0xc6   : > { %v140_v14 = vld [vmem:[#allocation4 + $0x1] ss:$0 sm:$0xff]  ;;  %v150_v17 = vld [vmem:[#allocation4 + $0x2] ss:$0 sm:$0xff] }
  0xc7   : > { %v141_v15 = vxor.u32 2147483648, %v140_v14  ;;  %v151_v19 = vxor.u32 2147483648, %v150_v17 }
  0xc9   : > { %v145_v16 = vmul.f32 %v141_v15, %v138_v13 }
  0xcb   : > { %146 = vadd.xlane.f32.xlu0 %v145_v16 }
 0x158   : > { %v147_v18 = vpop.xlane.xlu0 %146 }
 0x159   : > { %v148_v20 = vsel %vm144_vm6, %v147_v18, %v138_v13 }
 0x15a   : > { %v155_v21 = vmul.f32 %v151_v19, %v148_v20 }
 0x15c   : > { %156 = vadd.xlane.f32.xlu1 %v155_v21 }
 0x1e9   : > { %v157_v22 = vpop.xlane.xlu1 %156 }
 0x1ea   : > { %v158_v23 = vsel %vm154_vm7, %v157_v22, %v148_v20 }
 0x1eb   : > { %v160_v24 = vmul.f32 %v307_v9, %v158_v23 }
 0x1ed   : > { %v162_v25 = vsel %vm161_vm8, %v158_v23, %v160_v24 }
 0x1ee   : > { %163 = vst [vmem:[#allocation2] sm:$0xff] %v162_v25 }
 0x1f5   : > { %v167_v26 = vld [vmem:[#allocation2] sm:$0xf] }
 0x1f6   : > { %169 = vst [vmem:[%s106_s21] sm:$0xf] %v167_v26 }
 0x1fd   : > { %v194_v27 = vld [vmem:[%s106_s21] sm:$0xf] }
 0x1fe   : > { %195 = vst [vmem:[%s178_s25] sm:$0xf] %v194_v27 }
 0x1ff PF: > { %s7_s8 = sadd.s32 1, %s330_s8   ;;  %s392_s6 = smov %s326_s7 }
 0x200   : > { %p4_p5 = scmp.ge.s32.totalorder %s7_s8, 4   ;;  %s393_s7 = smov %s395_s10 }
 0x202   :  { %6 = sbr.rel (!%p4_p5) target bundleno = 2 (0x2), region = 112 }

// kernel: icp_forward.10
= control target key start
LH: loop header
LB: loop body
LE: loop exit
PB: predicated region body
PF: predicated region fallthrough
CT: control target
= control target key end

     0   :  { %s1664_s18 = smov 0   ;;  %s1666_s19 = smov 0   ;;  %s2104_s0 = inlined_call_operand.vmem [shape: f32[2,3,128], index: 0, kind: input, shape index: {}]   ;;  %s2105_s1 = inlined_call_operand.vmem [shape: f32[2,3,128], index: 1, kind: input, shape index: {}]   ;;  %s2106_s2 = inlined_call_operand.vmem [shape: f32[2,3,3], index: 2, kind: output, shape index: {0}]   ;;  %s2107_s3 = inlined_call_operand.vmem [shape: f32[2,3,1], index: 3, kind: output, shape index: {1}]   ;;  %s2108_s4 = inlined_call_operand.vmem [shape: f32[2,1,3], index: 4, kind: output, shape index: {2}]   ;;  %s2109_s5 = inlined_call_operand.vmem [shape: f32[2,1,1], index: 5, kind: output, shape index: {3}]  }
   0x1   :  { %s1668_s20 = smov 0  }
   0x2 LB: > { %s28_s21 = sadd.s32 1, %s1624_s19  ;;  %p1359_p0 = scmp.ge.s32.totalorder %s1628_s20, 1  ;;  %s1628_s20 = sphi %s1668_s20, %s16_s20   ;;  %s1624_s19 = sphi %s1666_s19, %s2111_s19   ;;  %s1620_s18 = sphi %s1664_s18, %s2110_s18  }
   0x3   : > { %p30_p1 = scmp.ge.s32.totalorder %s28_s21, 2  ;;  %p219_p2 = scmp.lt.s32.totalorder %s1628_s20, 3 }
   0x5   : > { %s2113_s21 = smov (%p30_p1, %s28_s21), 0  ;;  %p220_p3 = pnand %p1359_p0, %p219_p2 }
   0x6   : > { %p262_p4 = scmp.lt.s32.totalorder (!%p220_p3), %s1620_s18, 1  ;;  %vm383_vm0 = vcmask (!%p220_p3), 1042432   ;;  %vm334_vm1 = vcmask (!%p220_p3), 23552   ;;  %v588_v59 = vlaneseq (!%p220_p3) }
   0x7   : > { %223 = sbr.rel (%p220_p3) target bundleno = 1300 (0x514), region = 28 }
   0x8   : > { %v1760_v60 = vand.u32 (!%p220_p3), 127, %v588_v59 }
   0xe   : > { %s2115_s18 = smov (!%p262_p4, %s1620_s18), 1 }
   0xf   : > { %s1685_s22 = sshll.u32 %s2115_s18, 2  ;;  %s1979_s6 = scalar_lea.vmem %s2109_s5, %s2115_s18 }
  0x10   : > { %s1691_s25 = scalar_lea.vmem %s2104_s0, %s1685_s22  ;;  %s272_s28 = scalar_lea.vmem %s2105_s1, %s1685_s22 }
  0x11   : > { %v1694_v0 = vld [vmem:[%s1691_s25] sm:$0x7]  ;;  %s2044_s9 = scalar_lea.vmem %s2108_s4, %s2115_s18  ;;  %s2055_s12 = scalar_lea.vmem %s2106_s2, %s1685_s22 }
  0x12   : > { %v301_v1 = vadd.f32 %v1694_v0, %v1694_v0  ;;  %v300_v2 = vld [vmem:[%s272_s28] sm:$0x7]  ;;  %s280_s15 = scalar_lea.vmem %s2107_s3, %s1685_s22 }
  0x13   : > { %1466 = vmatprep.subr.msk.mxu0 %vm383_vm0, %v300_v2  ;;  %1492 = vmatprep.subr.mxu1 %v300_v2  ;;  %v532_v19 = vmul.f32 %v300_v2, %v300_v2 }
  0x14   : > { %302 = vxpose.xlu0.b32.start.end [1/1] (short) %v301_v1, 128  ;;  %1467 = vmatpush3.msk.msra.mxu0 %vm383_vm0, %v300_v2 }
  0x15   : > { %1493 = vmatpush3.xpose.msra.mxu1 %v300_v2  ;;  %v533_v20 = vsel %vm383_vm0, %v532_v19, 0.0 }
  0x16   : > { %v534_v21 = vrot.slane %v533_v20, 4 }
  0x18   : > { %v535_v22 = vadd.f32 %v534_v21, %v533_v20 }
  0x1a   : > { %v536_v23 = vrot.slane %v535_v22, 2 }
  0x1c   : > { %v537_v24 = vadd.f32 %v536_v23, %v535_v22 }
  0x1e   : > { %v538_v25 = vrot.slane %v537_v24, 1 }
  0x20   : > { %v539_v26 = vadd.f32 %v538_v25, %v537_v24 }
  0x94   : > { %v318_v3 = vpop.trf.xlu0 }
  0x95   : > { %1468 = vmatprep.mubr.msk.f32.mxu0 %vm334_vm1, %v318_v3 }
  0x98   : > { %v319_v4 = vpop.trf.xlu0 }
  0x99   : > { %1469 = vmatmul.mubr.msk.f32.vlgmr.msra.gmra.mrb[0].mxu0 %vm334_vm1, %v319_v4 }
  0x9c   : > { %v320_v5 = vpop.trf.xlu0 }
  0x9d   : > { %1471 = vmatprep.mubr.msk.f32.mxu0 %vm334_vm1, %v320_v5 }
  0xa0   : > { %v321_v6 = vpop.trf.xlu0 }
  0xa1   : > { %1472 = vmatmul.mubr.msk.f32.gmra.mrb[2].mxu0 %vm334_vm1, %v321_v6 }
  0xa4   : > { %v322_v7 = vpop.trf.xlu0 }
  0xa5   : > { %1474 = vmatprep.mubr.msk.f32.mxu0 %vm334_vm1, %v322_v7 }
  0xa8   : > { %v323_v8 = vpop.trf.xlu0 }
  0xa9   : > { %1475 = vmatmul.mubr.msk.f32.gmra.mrb[4].mxu0 %vm334_vm1, %v323_v8 }
  0xac   : > { %v324_v9 = vpop.trf.xlu0 }
  0xad   : > { %1477 = vmatprep.mubr.msk.f32.mxu0 %vm334_vm1, %v324_v9 }
  0xb0   : > { %v325_v10 = vpop.trf.xlu0 }
  0xb1   : > { %1478 = vmatmul.mubr.msk.f32.gmra.mrb[6].mxu0 %vm334_vm1, %v325_v10 }
  0xb4   : > { %v326_v11 = vpop.trf.xlu0 }
  0xb5   : > { %1480 = vmatprep.mubr.msk.f32.mxu0 %vm334_vm1, %v326_v11 }
  0xb8   : > { %v327_v12 = vpop.trf.xlu0 }
  0xb9   : > { %1481 = vmatmul.mubr.msk.f32.gmra.mrb[8].mxu0 %vm334_vm1, %v327_v12 }
  0xbc   : > { %v328_v13 = vpop.trf.xlu0 }
  0xbd   : > { %1483 = vmatprep.mubr.msk.f32.mxu0 %vm334_vm1, %v328_v13 }
  0xc0   : > { %v329_v14 = vpop.trf.xlu0 }
  0xc1   : > { %1484 = vmatmul.mubr.msk.f32.gmra.mrb[10].mxu0 %vm334_vm1, %v329_v14 }
  0xc4   : > { %v330_v15 = vpop.trf.xlu0 }
  0xc5   : > { %1486 = vmatprep.mubr.msk.f32.mxu0 %vm334_vm1, %v330_v15 }
  0xc8   : > { %v331_v16 = vpop.trf.xlu0 }
  0xc9   : > { %1487 = vmatmul.mubr.msk.f32.gmra.mrb[12].mxu0 %vm334_vm1, %v331_v16 }
  0xcc   : > { %v332_v17 = vpop.trf.xlu0 }
  0xcd   : > { %1489 = vmatprep.mubr.msk.f32.mxu0 %vm334_vm1, %v332_v17 }
  0xd0   : > { %v333_v18 = vpop.trf.xlu0 }
  0xd1   : > { %1490 = vmatmul.mubr.msk.f32.gmra.mrb[14].mxu0 %vm334_vm1, %v333_v18 }
 0x16c   : > { %v1470_v27 = vpop.f32.mrb[0].mxu0 }
 0x16d   : > { %v541_v28 = vsub.f32 %v1470_v27, %v539_v26  ;;  %v453_v29 = vpop.f32.mrb[1].mxu0 }
 0x16e   : > { %v540_v30 = vsub.f32 %v453_v29, %v539_v26 }
 0x16f   : > { %558 = vmax.xlane.f32.xlu1 %v541_v28 }
 0x170   : > { %556 = vmax.xlane.f32.xlu0 %v540_v30 }
 0x174   : > { %v1473_v31 = vpop.f32.mrb[2].mxu0 }
 0x175   : > { %v543_v32 = vsub.f32 %v1473_v31, %v539_v26  ;;  %v463_v33 = vpop.f32.mrb[3].mxu0 }
 0x176   : > { %v1721_v34 = vsub.f32 %v463_v33, %v539_v26 }
 0x177   : > { %562 = vmax.xlane.f32.xlu1 %v543_v32 }
 0x17b   : > { %560 = vmax.xlane.f32.xlu1 %v1721_v34 }
 0x17c   : > { %v1476_v35 = vpop.f32.mrb[4].mxu0 }
 0x17d   : > { %v1724_v36 = vsub.f32 %v1476_v35, %v539_v26  ;;  %v473_v37 = vpop.f32.mrb[5].mxu0 }
 0x17e   : > { %v1726_v38 = vsub.f32 %v473_v37, %v539_v26 }
 0x17f   : > { %566 = vmax.xlane.f32.xlu1 %v1724_v36 }
 0x183   : > { %564 = vmax.xlane.f32.xlu1 %v1726_v38 }
 0x184   : > { %v1479_v39 = vpop.f32.mrb[6].mxu0 }
 0x185   : > { %v1730_v40 = vsub.f32 %v1479_v39, %v539_v26  ;;  %v483_v41 = vpop.f32.mrb[7].mxu0 }
 0x186   : > { %v1732_v42 = vsub.f32 %v483_v41, %v539_v26 }
 0x187   : > { %570 = vmax.xlane.f32.xlu1 %v1730_v40 }
 0x18b   : > { %568 = vmax.xlane.f32.xlu1 %v1732_v42 }
 0x18c   : > { %v1482_v43 = vpop.f32.mrb[8].mxu0 }
 0x18d   : > { %v1736_v44 = vsub.f32 %v1482_v43, %v539_v26  ;;  %v493_v45 = vpop.f32.mrb[9].mxu0 }
 0x18e   : > { %v1738_v46 = vsub.f32 %v493_v45, %v539_v26 }
 0x18f   : > { %574 = vmax.xlane.f32.xlu1 %v1736_v44 }
 0x193   : > { %572 = vmax.xlane.f32.xlu1 %v1738_v46 }
 0x194   : > { %v1485_v47 = vpop.f32.mrb[10].mxu0 }
 0x195   : > { %v1742_v48 = vsub.f32 %v1485_v47, %v539_v26  ;;  %v503_v49 = vpop.f32.mrb[11].mxu0 }
 0x196   : > { %v1744_v50 = vsub.f32 %v503_v49, %v539_v26 }
 0x197   : > { %578 = vmax.xlane.f32.xlu1 %v1742_v48 }
 0x19b   : > { %576 = vmax.xlane.f32.xlu1 %v1744_v50 }
 0x19c   : > { %v1488_v51 = vpop.f32.mrb[12].mxu0 }
 0x19d   : > { %v1748_v52 = vsub.f32 %v1488_v51, %v539_v26  ;;  %v513_v53 = vpop.f32.mrb[13].mxu0 }
 0x19e   : > { %v1750_v54 = vsub.f32 %v513_v53, %v539_v26 }
 0x19f   : > { %582 = vmax.xlane.f32.xlu1 %v1748_v52 }
 0x1a3   : > { %580 = vmax.xlane.f32.xlu1 %v1750_v54 }
 0x1a4   : > { %v1491_v55 = vpop.f32.mrb[14].mxu0 }
 0x1a5   : > { %v1754_v56 = vsub.f32 %v1491_v55, %v539_v26  ;;  %v523_v57 = vpop.f32.mrb[15].mxu0 }
 0x1a6   : > { %v1756_v58 = vsub.f32 %v523_v57, %v539_v26 }
 0x1a8   : > { %584 = vmax.xlane.f32.xlu1 %v1756_v58 }
 0x1ac   : > { %586 = vmax.xlane.f32.xlu1 %v1754_v56 }
 0x1fc   : > { %v559_v61 = vpop.xlane.xlu1 %558 }
 0x1fd   : > { %vm591_vm2 = vcmp.eq.f32.partialorder %v541_v28, %v559_v61  ;;  %v557_v62 = vpop.xlane.xlu0 %556 }
 0x1fe   : > { %v1763_v63 = vsel %vm591_vm2, %v1760_v60, 128  ;;  %vm590_vm3 = vcmp.eq.f32.partialorder %v540_v30, %v557_v62  ;;  %v1173_v8 = vadd.f32 %v559_v61, %v557_v62 }
 0x1ff   : > { %v1766_v1 = vsel %vm590_vm3, %v1760_v60, 128  ;;  %v637_v2 = vshra.s32 %v1763_v63, 16 }
 0x200   : > { %v623_v4 = vshra.s32 %v1766_v1, 16 }
 0x201   : > { %v1769_v3 = vcvt.s32.f32 %v637_v2 }
 0x202   : > { %v1773_v6 = vcvt.s32.f32 %v623_v4 }
 0x203   : > { %640 = vmin.xlane.f32.xlu1 %v1769_v3 }
 0x204   : > { %v563_v5 = vpop.xlane.xlu1 %562 }
 0x205   : > { %vm593_vm4 = vcmp.eq.f32.partialorder %v543_v32, %v563_v5 }
 0x206   : > { %v1776_v7 = vsel %vm593_vm4, %v1760_v60, 128 }
 0x207   : > { %626 = vmin.xlane.f32.xlu1 %v1773_v6  ;;  %v665_v9 = vshra.s32 %v1776_v7, 16 }
 0x208   : > { %v561_v10 = vpop.xlane.xlu1 %560 }
 0x209   : > { %vm592_vm5 = vcmp.eq.f32.partialorder %v1721_v34, %v561_v10  ;;  %v1174_v11 = vadd.f32 %v1173_v8, %v561_v10  ;;  %v1781_v12 = vcvt.s32.f32 %v665_v9 }
 0x20a   : > { %v1784_v13 = vsel %vm592_vm5, %v1760_v60, 128 }
 0x20b   : > { %668 = vmin.xlane.f32.xlu1 %v1781_v12  ;;  %v651_v14 = vshra.s32 %v1784_v13, 16  ;;  %v1175_v15 = vadd.f32 %v1174_v11, %v563_v5 }
 0x20c   : > { %v567_v16 = vpop.xlane.xlu1 %566 }
 0x20d   : > { %vm595_vm6 = vcmp.eq.f32.partialorder %v1724_v36, %v567_v16  ;;  %v1789_v17 = vcvt.s32.f32 %v651_v14 }
 0x20e   : > { %v1792_v18 = vsel %vm595_vm6, %v1760_v60, 128 }
 0x20f   : > { %654 = vmin.xlane.f32.xlu1 %v1789_v17  ;;  %v693_v19 = vshra.s32 %v1792_v18, 16 }
 0x210   : > { %v565_v20 = vpop.xlane.xlu1 %564 }
 0x211   : > { %vm594_vm7 = vcmp.eq.f32.partialorder %v1726_v38, %v565_v20  ;;  %v1176_v21 = vadd.f32 %v1175_v15, %v565_v20  ;;  %v1797_v22 = vcvt.s32.f32 %v693_v19 }
 0x212   : > { %v1800_v23 = vsel %vm594_vm7, %v1760_v60, 128 }
 0x213   : > { %696 = vmin.xlane.f32.xlu1 %v1797_v22  ;;  %v679_v24 = vshra.s32 %v1800_v23, 16  ;;  %v1177_v25 = vadd.f32 %v1176_v21, %v567_v16 }
 0x214   : > { %v571_v26 = vpop.xlane.xlu1 %570 }
 0x215   : > { %vm597_vm8 = vcmp.eq.f32.partialorder %v1730_v40, %v571_v26  ;;  %v1805_v27 = vcvt.s32.f32 %v679_v24 }
 0x216   : > { %v1808_v28 = vsel %vm597_vm8, %v1760_v60, 128 }
 0x217   : > { %682 = vmin.xlane.f32.xlu1 %v1805_v27  ;;  %v721_v29 = vshra.s32 %v1808_v28, 16 }
 0x218   : > { %v569_v30 = vpop.xlane.xlu1 %568 }
 0x219   : > { %vm596_vm9 = vcmp.eq.f32.partialorder %v1732_v42, %v569_v30  ;;  %v1178_v31 = vadd.f32 %v1177_v25, %v569_v30  ;;  %v1813_v32 = vcvt.s32.f32 %v721_v29 }
 0x21a   : > { %v1816_v33 = vsel %vm596_vm9, %v1760_v60, 128 }
 0x21b   : > { %724 = vmin.xlane.f32.xlu1 %v1813_v32  ;;  %v707_v34 = vshra.s32 %v1816_v33, 16  ;;  %v1179_v35 = vadd.f32 %v1178_v31, %v571_v26  ;;  %v636_v26 = vand.u32 65535, %v1763_v63 }
 0x21c   : > { %v575_v36 = vpop.xlane.xlu1 %574 }
 0x21d   : > { %vm599_vm10 = vcmp.eq.f32.partialorder %v1736_v44, %v575_v36  ;;  %v1821_v37 = vcvt.s32.f32 %v707_v34  ;;  %v638_v30 = vcvt.s32.f32 %v636_v26 }
 0x21e   : > { %v1824_v38 = vsel %vm599_vm10, %v1760_v60, 128 }
 0x21f   : > { %710 = vmin.xlane.f32.xlu1 %v1821_v37  ;;  %v749_v39 = vshra.s32 %v1824_v38, 16 }
 0x220   : > { %v573_v40 = vpop.xlane.xlu1 %572 }
 0x221   : > { %vm598_vm11 = vcmp.eq.f32.partialorder %v1738_v46, %v573_v40  ;;  %v1180_v41 = vadd.f32 %v1179_v35, %v573_v40  ;;  %v1829_v42 = vcvt.s32.f32 %v749_v39 }
 0x222   : > { %v1832_v43 = vsel %vm598_vm11, %v1760_v60, 128 }
 0x223   : > { %752 = vmin.xlane.f32.xlu1 %v1829_v42  ;;  %v735_v44 = vshra.s32 %v1832_v43, 16  ;;  %v1181_v45 = vadd.f32 %v1180_v41, %v575_v36  ;;  %v664_v36 = vand.u32 65535, %v1776_v7  ;;  %v692_v7 = vand.u32 65535, %v1792_v18 }
 0x224   : > { %v579_v47 = vpop.xlane.xlu1 %578  ;;  %v720_v18 = vand.u32 65535, %v1808_v28  ;;  %v748_v28 = vand.u32 65535, %v1824_v38 }
 0x225   : > { %vm601_vm12 = vcmp.eq.f32.partialorder %v1742_v48, %v579_v47  ;;  %v1837_v49 = vcvt.s32.f32 %v735_v44  ;;  %v666_v40 = vcvt.s32.f32 %v664_v36 }
 0x226   : > { %v1840_v51 = vsel %vm601_vm12, %v1760_v60, 128 }
 0x227   : > { %738 = vmin.xlane.f32.xlu1 %v1837_v49  ;;  %v777_v46 = vshra.s32 %v1840_v51, 16  ;;  %v776_v38 = vand.u32 65535, %v1840_v51 }
 0x228   : > { %v577_v53 = vpop.xlane.xlu1 %576 }
 0x229   : > { %vm600_vm13 = vcmp.eq.f32.partialorder %v1744_v50, %v577_v53  ;;  %v1182_v55 = vadd.f32 %v1181_v45, %v577_v53  ;;  %v1845_v57 = vcvt.s32.f32 %v777_v46 }
 0x22a   : > { %v1848_v59 = vsel %vm600_vm13, %v1760_v60, 128 }
 0x22b   : > { %780 = vmin.xlane.f32.xlu1 %v1845_v57  ;;  %v763_v48 = vshra.s32 %v1848_v59, 16  ;;  %v1183_v61 = vadd.f32 %v1182_v55, %v579_v47  ;;  %v694_v47 = vcvt.s32.f32 %v692_v7 }
 0x22c   : > { %v583_v62 = vpop.xlane.xlu1 %582 }
 0x22d   : > { %vm603_vm14 = vcmp.eq.f32.partialorder %v1748_v52, %v583_v62  ;;  %v1853_v2 = vcvt.s32.f32 %v763_v48  ;;  %v722_v48 = vcvt.s32.f32 %v720_v18 }
 0x22e   : > { %v1856_v4 = vsel %vm603_vm14, %v1760_v60, 128 }
 0x22f   : > { %766 = vmin.xlane.f32.xlu1 %v1853_v2  ;;  %v805_v50 = vshra.s32 %v1856_v4, 16  ;;  %v804_v51 = vand.u32 65535, %v1856_v4 }
 0x230   : > { %v581_v5 = vpop.xlane.xlu1 %580 }
 0x231   : > { %vm602_vm15 = vcmp.eq.f32.partialorder %v1750_v54, %v581_v5  ;;  %v1184_v8 = vadd.f32 %v1183_v61, %v581_v5  ;;  %v1861_v9 = vcvt.s32.f32 %v805_v50  ;;  %v750_v5 = vcvt.s32.f32 %v748_v28 }
 0x232   : > { %v1864_v10 = vsel %vm602_vm15, %v1760_v60, 128 }
 0x233   : > { %808 = vmin.xlane.f32.xlu0 %v1861_v9  ;;  %v1185_v52 = vadd.f32 %v1184_v8, %v583_v62  ;;  %v791_v11 = vshra.s32 %v1864_v10, 16 }
 0x235   : > { %v585_v14 = vpop.xlane.xlu1 %584  ;;  %v1868_v15 = vcvt.s32.f32 %v791_v11 }
 0x236   : > { %vm604_vm2 = vcmp.eq.f32.partialorder %v1756_v58, %v585_v14  ;;  %v1871_v16 = vadd.f32 %v1185_v52, %v585_v14  ;;  %v778_v14 = vcvt.s32.f32 %v776_v38 }
 0x237   : > { %v1874_v54 = vsel %vm604_vm2, %v1760_v60, 128  ;;  %794 = vmin.xlane.f32.xlu1 %v1868_v15 }
 0x238   : > { %v819_v19 = vshra.s32 %v1874_v54, 16 }
 0x239   : > { %v1878_v20 = vpop.xlane.xlu1 %586 }
 0x23a   : > { %vm605_vm3 = vcmp.eq.f32.partialorder %v1754_v56, %v1878_v20  ;;  %v1882_v21 = vcvt.s32.f32 %v819_v19  ;;  %v622_v56 = vand.u32 65535, %v1766_v1  ;;  %v650_v1 = vand.u32 65535, %v1784_v13 }
 0x23b   : > { %v1885_v24 = vsel %vm605_vm3, %v1760_v60, 128  ;;  %v678_v13 = vand.u32 65535, %v1800_v23  ;;  %v706_v23 = vand.u32 65535, %v1816_v33  ;;  %v734_v33 = vand.u32 65535, %v1832_v43 }
 0x23c   : > { %822 = vmin.xlane.f32.xlu1 %v1882_v21  ;;  %v833_v58 = vshra.s32 %v1885_v24, 16  ;;  %v624_v35 = vcvt.s32.f32 %v622_v56  ;;  %v652_v44 = vcvt.s32.f32 %v650_v1  ;;  %v762_v43 = vand.u32 65535, %v1848_v59 }
 0x23d   : > { %v680_v53 = vcvt.s32.f32 %v678_v13  ;;  %v708_v62 = vcvt.s32.f32 %v706_v23  ;;  %v736_v52 = vcvt.s32.f32 %v734_v33  ;;  %v790_v59 = vand.u32 65535, %v1864_v10 }
 0x23e   : > { %v1889_v25 = vcvt.s32.f32 %v833_v58  ;;  %v764_v58 = vcvt.s32.f32 %v762_v43  ;;  %v1161_v10 = vmul.f32 %v1694_v0, %v1694_v0 }
 0x240   : > { %836 = vmin.xlane.f32.xlu0 %v1889_v25 }
 0x290   : > { %v1893_v29 = vpop.xlane.xlu1 %640 }
 0x291   : > { %vm642_vm4 = vcmp.eq.f32.partialorder %v1769_v3, %v1893_v29 }
 0x292   : > { %v643_v31 = vsel %vm642_vm4, %v638_v30, inf  ;;  %v806_v30 = vcvt.s32.f32 %v804_v51 }
 0x293   : > { %644 = vmin.xlane.f32.xlu0 %v643_v31  ;;  %v792_v31 = vcvt.s32.f32 %v790_v59 }
 0x294   : > { %v1898_v34 = vpop.xlane.xlu1 %626 }
 0x295   : > { %vm628_vm5 = vcmp.eq.f32.partialorder %v1773_v6, %v1898_v34 }
 0x296   : > { %v629_v39 = vsel %vm628_vm5, %v624_v35, inf }
 0x297   : > { %630 = vmin.xlane.f32.xlu1 %v629_v39 }
 0x298   : > { %v1903_v63 = vpop.xlane.xlu1 %668 }
 0x299   : > { %vm670_vm6 = vcmp.eq.f32.partialorder %v1781_v12, %v1903_v63  ;;  %v675_v18 = vcvt.f32.s32 %v1903_v63 }
 0x29a   : > { %v671_v3 = vsel %vm670_vm6, %v666_v40, inf  ;;  %vm297_vm6 = vcmask 0  }
 0x29b   : > { %672 = vmin.xlane.f32.xlu0 %v671_v3 }
 0x29c   : > { %v1908_v41 = vpop.xlane.xlu1 %654 }
 0x29d   : > { %vm656_vm7 = vcmp.eq.f32.partialorder %v1789_v17, %v1908_v41 }
 0x29e   : > { %v657_v6 = vsel %vm656_vm7, %v652_v44, inf  ;;  %v633_v44 = vcvt.f32.s32 %v1898_v34 }
 0x29f   : > { %658 = vmin.xlane.f32.xlu1 %v657_v6 }
 0x2a0   : > { %v1913_v45 = vpop.xlane.xlu1 %696 }
 0x2a1   : > { %vm698_vm8 = vcmp.eq.f32.partialorder %v1797_v22, %v1913_v45  ;;  %v703_v63 = vcvt.f32.s32 %v1913_v45 }
 0x2a2   : > { %v699_v12 = vsel %vm698_vm8, %v694_v47, inf  ;;  %v634_v47 = vshll.u32 %v633_v44, 16 }
 0x2a3   : > { %700 = vmin.xlane.f32.xlu0 %v699_v12 }
 0x2a4   : > { %v1918_v46 = vpop.xlane.xlu1 %682 }
 0x2a5   : > { %vm684_vm9 = vcmp.eq.f32.partialorder %v1805_v27, %v1918_v46 }
 0x2a6   : > { %v685_v17 = vsel %vm684_vm9, %v680_v53, inf }
 0x2a7   : > { %686 = vmin.xlane.f32.xlu1 %v685_v17 }
 0x2a8   : > { %v1923_v55 = vpop.xlane.xlu1 %724 }
 0x2a9   : > { %vm726_vm10 = vcmp.eq.f32.partialorder %v1813_v32, %v1923_v55  ;;  %v731_v45 = vcvt.f32.s32 %v1923_v55 }
 0x2aa   : > { %v727_v22 = vsel %vm726_vm10, %v722_v48, inf  ;;  %v661_v48 = vcvt.f32.s32 %v1908_v41  ;;  %v689_v41 = vcvt.f32.s32 %v1918_v46 }
 0x2ab   : > { %728 = vmin.xlane.f32.xlu0 %v727_v22  ;;  %v1631_v22 = vmov 1.0  }
 0x2ac   : > { %v1928_v61 = vpop.xlane.xlu1 %710 }
 0x2ad   : > { %vm712_vm11 = vcmp.eq.f32.partialorder %v1821_v37, %v1928_v61  ;;  %v717_v46 = vcvt.f32.s32 %v1928_v61 }
 0x2ae   : > { %v713_v27 = vsel %vm712_vm11, %v708_v62, inf  ;;  %v662_v62 = vshll.u32 %v661_v48, 16 }
 0x2af   : > { %714 = vmin.xlane.f32.xlu1 %v713_v27  ;;  %v718_v59 = vshll.u32 %v717_v46, 16 }
 0x2b0   : > { %v1933_v50 = vpop.xlane.xlu1 %752 }
 0x2b1   : > { %vm754_vm12 = vcmp.eq.f32.partialorder %v1829_v42, %v1933_v50  ;;  %v759_v55 = vcvt.f32.s32 %v1933_v50 }
 0x2b2   : > { %v755_v32 = vsel %vm754_vm12, %v750_v5, inf }
 0x2b3   : > { %756 = vmin.xlane.f32.xlu0 %v755_v32 }
 0x2b4   : > { %v1938_v8 = vpop.xlane.xlu1 %738 }
 0x2b5   : > { %vm740_vm13 = vcmp.eq.f32.partialorder %v1837_v49, %v1938_v8  ;;  %v745_v61 = vcvt.f32.s32 %v1938_v8 }
 0x2b6   : > { %v741_v37 = vsel %vm740_vm13, %v736_v52, inf  ;;  %v704_v52 = vshll.u32 %v703_v63, 16 }
 0x2b7   : > { %742 = vmin.xlane.f32.xlu1 %v741_v37  ;;  %v690_v37 = vshll.u32 %v689_v41, 16 }
 0x2b8   : > { %v1943_v11 = vpop.xlane.xlu1 %780 }
 0x2b9   : > { %vm782_vm14 = vcmp.eq.f32.partialorder %v1845_v57, %v1943_v11  ;;  %v787_v50 = vcvt.f32.s32 %v1943_v11 }
 0x2ba   : > { %v783_v42 = vsel %vm782_vm14, %v778_v14, inf }
 0x2bb   : > { %784 = vmin.xlane.f32.xlu0 %v783_v42  ;;  %v788_v44 = vshll.u32 %v787_v50, 16 }
 0x2bc   : > { %v1948_v19 = vpop.xlane.xlu1 %766 }
 0x2bd   : > { %vm768_vm15 = vcmp.eq.f32.partialorder %v1853_v2, %v1948_v19  ;;  %v818_v2 = vand.u32 65535, %v1874_v54  ;;  %v773_v8 = vcvt.f32.s32 %v1948_v19  ;;  %v1187_v19 = vadd.f32 %v1871_v16, %v1878_v20 }
 0x2be   : > { %v769_v49 = vsel %vm768_vm15, %v764_v58, inf }
 0x2bf   : > { %770 = vmin.xlane.f32.xlu1 %v769_v49  ;;  %v820_v36 = vcvt.s32.f32 %v818_v2  ;;  %v732_v49 = vshll.u32 %v731_v45, 16 }
 0x2c0   : > { %v1953_v26 = vpop.xlane.xlu0 %808 }
 0x2c1   : > { %vm810_vm2 = vcmp.eq.f32.partialorder %v1861_v9, %v1953_v26  ;;  %v832_v9 = vand.u32 65535, %v1885_v24  ;;  %v647_v24 = vcvt.f32.s32 %v1893_v29  ;;  %v676_v29 = vshll.u32 %v675_v18, 16 }
 0x2c2   : > { %v811_v57 = vsel %vm810_vm2, %v806_v30, inf  ;;  %v815_v11 = vcvt.f32.s32 %v1953_v26 }
 0x2c3   : > { %812 = vmin.xlane.f32.xlu0 %v811_v57  ;;  %v834_v54 = vcvt.s32.f32 %v832_v9  ;;  %v648_v7 = vshll.u32 %v647_v24, 16 }
 0x2c4   : > { %v1958_v56 = vpop.xlane.xlu1 %794 }
 0x2c5   : > { %vm796_vm3 = vcmp.eq.f32.partialorder %v1868_v15, %v1958_v56  ;;  %v1162_v15 = vsel %vm383_vm0, %v1161_v10, 0.0  ;;  %v760_v10 = vshll.u32 %v759_v55, 16 }
 0x2c6   : > { %v797_v4 = vsel %vm796_vm3, %v792_v31, inf }
 0x2c7   : > { %798 = vmin.xlane.f32.xlu1 %v797_v4 }
 0x2c9   : > { %v1963_v35 = vpop.xlane.xlu1 %822 }
 0x2ca   : > { %vm824_vm4 = vcmp.eq.f32.partialorder %v1882_v21, %v1963_v35  ;;  %v1630_v21 = vmov 0.0  }
 0x2cb   : > { %v825_v39 = vsel %vm824_vm4, %v820_v36, inf  ;;  %298 = vst.msk [vmem:[%s1979_s6] sm:$0x1] %vm297_vm6, %v1630_v21 }
 0x2cc   : > { %826 = vmin.xlane.f32.xlu1 %v825_v39  ;;  %v746_v39 = vshll.u32 %v745_v61, 16 }
 0x2cd   : > { %v1970_v40 = vpop.xlane.xlu0 %836 }
 0x2ce   : > { %vm838_vm5 = vcmp.eq.f32.partialorder %v1889_v25, %v1970_v40 }
 0x2cf   : > { %v839_v1 = vsel %vm838_vm5, %v834_v54, inf }
 0x2d0   : > { %1163 = vadd.xlane.f32.xlu1 %v1162_v15  ;;  %840 = vmin.xlane.f32.xlu0 %v839_v1 }
 0x320   : > { %v645_v3 = vpop.xlane.xlu0 %644 }
 0x321   : > { %v646_v25 = vcvt.f32.s32 %v645_v3 }
 0x323   : > { %v649_v12 = vadd.s32 %v648_v7, %v646_v25  ;;  %v774_v7 = vshll.u32 %v773_v8, 16 }
 0x324   : > { %v631_v6 = vpop.xlane.xlu1 %630 }
 0x325   : > { %v632_v13 = vcvt.f32.s32 %v631_v6  ;;  %vm847_vm8 = vcmp.eq.s32.totalorder %v1760_v60, %v649_v12 }
 0x327   : > { %v635_v53 = vadd.s32 %v634_v47, %v632_v13 }
 0x328   : > { %v673_v17 = vpop.xlane.xlu0 %672 }
 0x329   : > { %vm846_vm7 = vcmp.eq.s32.totalorder %v1760_v60, %v635_v53  ;;  %v674_v23 = vcvt.f32.s32 %v673_v17  ;;  %v801_v53 = vcvt.f32.s32 %v1958_v56  ;;  %v816_v17 = vshll.u32 %v815_v11, 16 }
 0x32a   : > { %1494 = vmatprep.mubr.msk.f32.mxu1 %vm846_vm7, %v1631_v22 }
 0x32b   : > { %1495 = vmatmul.mubr.msk.f32.vlgmr.msra.gmra.mrb[0].mxu1 %vm847_vm8, %v1631_v22  ;;  %v677_v27 = vadd.s32 %v676_v29, %v674_v23  ;;  %v1188_v23 = vrot.slane %v1187_v19, 4  ;;  %v802_v29 = vshll.u32 %v801_v53, 16 }
 0x32c   : > { %v659_v34 = vpop.xlane.xlu1 %658 }
 0x32d   : > { %v660_v28 = vcvt.f32.s32 %v659_v34  ;;  %vm849_vm10 = vcmp.eq.s32.totalorder %v1760_v60, %v677_v27  ;;  %v829_v34 = vcvt.f32.s32 %v1963_v35  ;;  %v1189_v20 = vadd.f32 %v1188_v23, %v1187_v19 }
 0x32e   : > { %v843_v27 = vcvt.f32.s32 %v1970_v40 }
 0x32f   : > { %v663_v5 = vadd.s32 %v662_v62, %v660_v28  ;;  %v830_v28 = vshll.u32 %v829_v34, 16 }
 0x330   : > { %v701_v33 = vpop.xlane.xlu0 %700 }
 0x331   : > { %vm848_vm9 = vcmp.eq.s32.totalorder %v1760_v60, %v663_v5  ;;  %v702_v32 = vcvt.f32.s32 %v701_v33  ;;  %v1190_v33 = vrot.slane %v1189_v20, 2 }
 0x332   : > { %1497 = vmatprep.mubr.msk.f32.mxu1 %vm848_vm9, %v1631_v22 }
 0x333   : > { %1498 = vmatmul.mubr.msk.f32.gmra.mrb[2].mxu1 %vm849_vm10, %v1631_v22  ;;  %v705_v43 = vadd.s32 %v704_v52, %v702_v32  ;;  %v844_v32 = vshll.u32 %v843_v27, 16  ;;  %vm1633_vm10 = vmmov 0  }
 0x334   : > { %v687_v38 = vpop.xlane.xlu1 %686  ;;  %1550 = vmatprep.mubr.msk.f32.mxu0 %vm1633_vm10, %v1630_v21 }
 0x335   : > { %v688_v14 = vcvt.f32.s32 %v687_v38  ;;  %vm851_vm12 = vcmp.eq.s32.totalorder %v1760_v60, %v705_v43 }
 0x337   : > { %v691_v42 = vadd.s32 %v690_v37, %v688_v14  ;;  %v1191_v14 = vadd.f32 %v1190_v33, %v1189_v20 }
 0x338   : > { %v729_v58 = vpop.xlane.xlu0 %728 }
 0x339   : > { %vm850_vm11 = vcmp.eq.s32.totalorder %v1760_v60, %v691_v42  ;;  %v730_v51 = vcvt.f32.s32 %v729_v58  ;;  %v1192_v45 = vrot.slane %v1191_v14, 1 }
 0x33a   : > { %1500 = vmatprep.mubr.msk.f32.mxu1 %vm850_vm11, %v1631_v22  ;;  %vm295_vm11 = vcmask 16384  }
 0x33b   : > { %1501 = vmatmul.mubr.msk.f32.gmra.mrb[4].mxu1 %vm851_vm12, %v1631_v22  ;;  %v733_v31 = vadd.s32 %v732_v49, %v730_v51  ;;  %v1193_v51 = vadd.f32 %v1192_v45, %v1191_v14  ;;  %296 = vst.msk [vmem:[%s2044_s9] sm:$0x1] %vm295_vm11, %v1630_v21 }
 0x33c   : > { %v715_v30 = vpop.xlane.xlu1 %714 }
 0x33d   : > { %v716_v57 = vcvt.f32.s32 %v715_v30  ;;  %vm853_vm14 = vcmp.eq.s32.totalorder %v1760_v60, %v733_v31  ;;  %v1172_v30 = vld [vmem:[%s1979_s6] sm:$0x1]  ;;  %v1632_v31 = vmov 0.0|0.0  }
 0x33e   : > { %1553 = vmatprep.subr.bf16.mxu0 %v1632_v31 }
 0x33f   : > { %v719_v2 = vadd.s32 %v718_v59, %v716_v57 }
 0x340   : > { %v757_v4 = vpop.xlane.xlu0 %756 }
 0x341   : > { %vm852_vm13 = vcmp.eq.s32.totalorder %v1760_v60, %v719_v2  ;;  %v758_v36 = vcvt.f32.s32 %v757_v4 }
 0x342   : > { %1503 = vmatprep.mubr.msk.f32.mxu1 %vm852_vm13, %v1631_v22 }
 0x343   : > { %1504 = vmatmul.mubr.msk.f32.gmra.mrb[6].mxu1 %vm853_vm14, %v1631_v22  ;;  %v761_v54 = vadd.s32 %v760_v10, %v758_v36 }
 0x344   : > { %v743_v9 = vpop.xlane.xlu1 %742 }
 0x345   : > { %v744_v15 = vcvt.f32.s32 %v743_v9  ;;  %vm855_vm2 = vcmp.eq.s32.totalorder %v1760_v60, %v761_v54 }
 0x347   : > { %v747_v1 = vadd.s32 %v746_v39, %v744_v15 }
 0x348   : > { %v785_v24 = vpop.xlane.xlu0 %784 }
 0x349   : > { %vm854_vm15 = vcmp.eq.s32.totalorder %v1760_v60, %v747_v1  ;;  %v786_v3 = vcvt.f32.s32 %v785_v24 }
 0x34a   : > { %1506 = vmatprep.mubr.msk.f32.mxu1 %vm854_vm15, %v1631_v22 }
 0x34b   : > { %1507 = vmatmul.mubr.msk.f32.gmra.mrb[8].mxu1 %vm855_vm2, %v1631_v22  ;;  %v789_v47 = vadd.s32 %v788_v44, %v786_v3 }
 0x34c   : > { %v771_v25 = vpop.xlane.xlu1 %770 }
 0x34d   : > { %v772_v6 = vcvt.f32.s32 %v771_v25  ;;  %vm857_vm4 = vcmp.eq.s32.totalorder %v1760_v60, %v789_v47 }
 0x34f   : > { %v775_v13 = vadd.s32 %v774_v7, %v772_v6 }
 0x350   : > { %v813_v12 = vpop.xlane.xlu0 %812 }
 0x351   : > { %vm856_vm3 = vcmp.eq.s32.totalorder %v1760_v60, %v775_v13  ;;  %v814_v18 = vcvt.f32.s32 %v813_v12 }
 0x352   : > { %1509 = vmatprep.mubr.msk.f32.mxu1 %vm856_vm3, %v1631_v22 }
 0x353   : > { %1510 = vmatmul.mubr.msk.f32.gmra.mrb[10].mxu1 %vm857_vm4, %v1631_v22  ;;  %v817_v62 = vadd.s32 %v816_v17, %v814_v18 }
 0x354   : > { %v799_v48 = vpop.xlane.xlu1 %798 }
 0x355   : > { %v800_v26 = vcvt.f32.s32 %v799_v48  ;;  %vm859_vm7 = vcmp.eq.s32.totalorder %v1760_v60, %v817_v62 }
 0x357   : > { %v803_v16 = vadd.s32 %v802_v29, %v800_v26 }
 0x359   : > { %v827_v56 = vpop.xlane.xlu1 %826  ;;  %vm858_vm5 = vcmp.eq.s32.totalorder %v1760_v60, %v803_v16 }
 0x35a   : > { %v828_v5 = vcvt.f32.s32 %v827_v56  ;;  %1512 = vmatprep.mubr.msk.f32.mxu1 %vm858_vm5, %v1631_v22 }
 0x35b   : > { %1513 = vmatmul.mubr.msk.f32.gmra.mrb[12].mxu1 %vm859_vm7, %v1631_v22 }
 0x35c   : > { %v831_v63 = vadd.s32 %v830_v28, %v828_v5 }
 0x35d   : > { %v1164_v41 = vpop.xlane.xlu1 %1163  ;;  %v841_v35 = vpop.xlane.xlu0 %840 }
 0x35e   : > { %v1165_v52 = vsel %vm383_vm0, %v1164_v41, 0.0  ;;  %v842_v38 = vcvt.f32.s32 %v841_v35  ;;  %vm860_vm8 = vcmp.eq.s32.totalorder %v1760_v60, %v831_v63 }
 0x35f   : > { %v1166_v37 = vrot.slane %v1165_v52, 4  ;;  %1515 = vmatprep.mubr.msk.f32.mxu1 %vm860_vm8, %v1631_v22 }
 0x360   : > { %v845_v40 = vadd.s32 %v844_v32, %v842_v38 }
 0x361   : > { %v1167_v43 = vadd.f32 %v1166_v37, %v1165_v52 }
 0x362   : > { %vm861_vm9 = vcmp.eq.s32.totalorder %v1760_v60, %v845_v40  ;;  %v1114_v60 = vsel %vm383_vm0, %v1694_v0, 0.0  ;;  %vm293_vm0 = vcmask 2048  }
 0x363   : > { %v1168_v42 = vrot.slane %v1167_v43, 2  ;;  %1516 = vmatmul.mubr.msk.f32.gmra.mrb[14].mxu1 %vm861_vm9, %v1631_v22  ;;  %1115 = vadd.xlane.f32.xlu0 %v1114_v60  ;;  %294 = vst.msk [vmem:[%s280_s15] sm:$0x7] %vm293_vm0, %v1630_v21 }
 0x365   : > { %v1169_v58 = vadd.f32 %v1168_v42, %v1167_v43 }
 0x367   : > { %v1170_v46 = vrot.slane %v1169_v58, 1 }
 0x369   : > { %v1171_v49 = vadd.f32 %v1170_v46, %v1169_v58 }
 0x36b   : > { %v1194_v59 = vsub.f32 %v1193_v51, %v1171_v49  ;;  %v1605_v51 = vld [vmem:[%s1691_s25] sm:$0x7] }
 0x36d   : > { %v1195_v57 = vadd.f32 %v1194_v59, %v1172_v30 }
 0x36f   : > { %1197 = vst.msk [vmem:[%s1979_s6] sm:$0x1] %vm297_vm6, %v1195_v57  ;;  %vm291_vm6 = vcmask 18432  }
 0x370   : > { %292 = vst.msk [vmem:[%s2055_s12] sm:$0x7] %vm291_vm6, %v1630_v21 }
 0x3fe   : > { %v1496_v22 = vpop.f32.mrb[0].mxu1 }
 0x3ff   : > { %v1122_v2 = vsel %vm334_vm1, %v1496_v22, 0.0  ;;  %v960_v55 = vpop.f32.mrb[1].mxu1 }
 0x400   : > { %v1554_v4 = vpack.c.bf16 %v1496_v22, %v960_v55  ;;  %v1121_v61 = vsel %vm334_vm1, %v960_v55, 0.0  ;;  %v1116_v55 = vpop.xlane.xlu0 %1115 }
 0x401   : > { %v1123_v36 = vadd.f32 %v1122_v2, %v1121_v61  ;;  %v1113_v2 = vld [vmem:[%s280_s15] sm:$0x7] }
 0x402   : > { %1555 = vmatpush3.bf16.msra.mxu0 %v1554_v4  ;;  %v1117_v4 = vadd.f32 %v1116_v55, %v1113_v2  ;;  %v1039_v61 = vld [vmem:[%s2055_s12] sm:$0x7] }
 0x403   : > { %1556 = vmatprep.subr.bf16.mxu0 %v1632_v31 }
 0x404   : > { %1119 = vst.msk [vmem:[%s280_s15] sm:$0x7] %vm293_vm0, %v1117_v4 }
 0x406   : > { %v1499_v0 = vpop.f32.mrb[2].mxu1 }
 0x407   : > { %v970_v10 = vpop.f32.mrb[3].mxu1  ;;  %v1126_v54 = vsel %vm334_vm1, %v1499_v0, 0.0 }
 0x408   : > { %v1557_v9 = vpack.c.bf16 %v1499_v0, %v970_v10  ;;  %v1124_v39 = vsel %vm334_vm1, %v970_v10, 0.0 }
 0x409   : > { %v1125_v15 = vadd.f32 %v1124_v39, %v1123_v36 }
 0x40a   : > { %1558 = vmatpush3.bf16.msra.mxu0 %v1557_v9 }
 0x40b   : > { %v1127_v1 = vadd.f32 %v1126_v54, %v1125_v15  ;;  %1559 = vmatprep.subr.bf16.mxu0 %v1632_v31 }
 0x40e   : > { %v1502_v50 = vpop.f32.mrb[4].mxu1 }
 0x40f   : > { %v980_v24 = vpop.f32.mrb[5].mxu1  ;;  %v1130_v25 = vsel %vm334_vm1, %v1502_v50, 0.0 }
 0x410   : > { %v1560_v8 = vpack.c.bf16 %v1502_v50, %v980_v24  ;;  %v1128_v3 = vsel %vm334_vm1, %v980_v24, 0.0 }
 0x411   : > { %v1129_v44 = vadd.f32 %v1128_v3, %v1127_v1 }
 0x412   : > { %1561 = vmatpush3.bf16.msra.mxu0 %v1560_v8 }
 0x413   : > { %v1131_v7 = vadd.f32 %v1130_v25, %v1129_v44  ;;  %1562 = vmatprep.subr.bf16.mxu0 %v1632_v31 }
 0x416   : > { %v1505_v6 = vpop.f32.mrb[6].mxu1 }
 0x417   : > { %v990_v47 = vpop.f32.mrb[7].mxu1  ;;  %v1134_v19 = vsel %vm334_vm1, %v1505_v6, 0.0 }
 0x418   : > { %v1563_v13 = vpack.c.bf16 %v1505_v6, %v990_v47  ;;  %v1132_v11 = vsel %vm334_vm1, %v990_v47, 0.0 }
 0x419   : > { %v1133_v12 = vadd.f32 %v1132_v11, %v1131_v7 }
 0x41a   : > { %1564 = vmatpush3.bf16.msra.mxu0 %v1563_v13 }
 0x41b   : > { %v1135_v53 = vadd.f32 %v1134_v19, %v1133_v12  ;;  %1565 = vmatprep.subr.bf16.mxu0 %v1632_v31 }
 0x41e   : > { %v1508_v18 = vpop.f32.mrb[8].mxu1 }
 0x41f   : > { %v1000_v17 = vpop.f32.mrb[9].mxu1  ;;  %v1138_v26 = vsel %vm334_vm1, %v1508_v18, 0.0 }
 0x420   : > { %v1566_v48 = vpack.c.bf16 %v1508_v18, %v1000_v17  ;;  %v1136_v23 = vsel %vm334_vm1, %v1000_v17, 0.0 }
 0x421   : > { %v1137_v29 = vadd.f32 %v1136_v23, %v1135_v53 }
 0x422   : > { %1567 = vmatpush3.bf16.msra.mxu0 %v1566_v48 }
 0x423   : > { %v1139_v34 = vadd.f32 %v1138_v26, %v1137_v29  ;;  %1568 = vmatprep.subr.bf16.mxu0 %v1632_v31 }
 0x426   : > { %v1511_v62 = vpop.f32.mrb[10].mxu1 }
 0x427   : > { %v1010_v16 = vpop.f32.mrb[11].mxu1  ;;  %v1142_v27 = vsel %vm334_vm1, %v1511_v62, 0.0 }
 0x428   : > { %v1569_v20 = vpack.c.bf16 %v1511_v62, %v1010_v16  ;;  %v1140_v56 = vsel %vm334_vm1, %v1010_v16, 0.0 }
 0x429   : > { %v1141_v28 = vadd.f32 %v1140_v56, %v1139_v34 }
 0x42a   : > { %1570 = vmatpush3.bf16.msra.mxu0 %v1569_v20 }
 0x42b   : > { %v1143_v5 = vadd.f32 %v1142_v27, %v1141_v28  ;;  %1571 = vmatprep.subr.bf16.mxu0 %v1632_v31 }
 0x42e   : > { %v1514_v63 = vpop.f32.mrb[12].mxu1 }
 0x42f   : > { %v1020_v33 = vpop.f32.mrb[13].mxu1  ;;  %v1146_v52 = vsel %vm334_vm1, %v1514_v63, 0.0 }
 0x430   : > { %v1572_v41 = vpack.c.bf16 %v1514_v63, %v1020_v33  ;;  %v1144_v35 = vsel %vm334_vm1, %v1020_v33, 0.0 }
 0x431   : > { %v1145_v32 = vadd.f32 %v1144_v35, %v1143_v5 }
 0x432   : > { %1573 = vmatpush3.bf16.msra.mxu0 %v1572_v41 }
 0x433   : > { %v1147_v38 = vadd.f32 %v1146_v52, %v1145_v32  ;;  %1574 = vmatprep.subr.bf16.mxu0 %v1632_v31  ;;  %v1120_v31 = vld [vmem:[%s2044_s9] sm:$0x1] }
 0x436   : > { %v1517_v37 = vpop.f32.mrb[14].mxu1 }
 0x437   : > { %v1030_v40 = vpop.f32.mrb[15].mxu1  ;;  %v1150_v45 = vsel %vm334_vm1, %v1517_v37, 0.0 }
 0x438   : > { %v1575_v14 = vpack.c.bf16 %v1517_v37, %v1030_v40  ;;  %v1148_v43 = vsel %vm334_vm1, %v1030_v40, 0.0 }
 0x439   : > { %v1149_v42 = vadd.f32 %v1148_v43, %v1147_v38 }
 0x43a   : > { %1576 = vmatpush3.bf16.msra.mxu0 %v1575_v14 }
 0x43b   : > { %v1151_v58 = vadd.f32 %v1150_v45, %v1149_v42 }
 0x43d   : > { %v1152_v46 = vrot.slane %v1151_v58, 4  ;;  %1551 = vmatmul.mubr.f32.vlgmr.msra.gmra.mrb[16].mxu0 %v1605_v51 }
 0x43f   : > { %v1153_v49 = vadd.f32 %v1152_v46, %v1151_v58 }
 0x441   : > { %v1154_v30 = vrot.slane %v1153_v49, 2 }
 0x443   : > { %v1155_v59 = vadd.f32 %v1154_v30, %v1153_v49 }
 0x445   : > { %v1156_v57 = vrot.slane %v1155_v59, 1 }
 0x447   : > { %v1157_v60 = vadd.f32 %v1156_v57, %v1155_v59 }
 0x449   : > { %v1158_v22 = vadd.f32 %v1157_v60, %v1120_v31 }
 0x44b   : > { %1160 = vst.msk [vmem:[%s2044_s9] sm:$0x1] %vm295_vm11, %v1158_v22 }
 0x510   : > { %v1106_v36 = vpop.f32.mrb[16].mxu0 }
 0x511   : > { %v1110_v0 = vadd.f32 %v1106_v36, %v1039_v61  ;;  %v1552_v10 = vpop.f32.mrb[17].mxu0 }
 0x513   : > { %1112 = vst.msk [vmem:[%s2055_s12] sm:$0x7] %vm291_vm6, %v1110_v0 }
 0x514 PF: > { %s16_s20 = sadd.s32 1, %s1628_s20   ;;  %s2110_s18 = smov %s1624_s19 }
 0x515   : > { %p13_p5 = scmp.ge.s32.totalorder %s16_s20, 4   ;;  %s2111_s19 = smov %s2113_s21 }
 0x517   :  { %15 = sbr.rel (!%p13_p5) target bundleno = 2 (0x2), region = 101 }

// kernel: reverse.11
= control target key start
LH: loop header
LB: loop body
LE: loop exit
PB: predicated region body
PF: predicated region fallthrough
CT: control target
= control target key end

     0   :  { %v2_v0 = vlaneseq  ;;  %s105_s0 = inlined_call_operand.vmem [shape: f32[2,3], index: 0, kind: input, shape index: {}]   ;;  %s106_s1 = inlined_call_operand.vmem [shape: f32[2,3], index: 1, kind: output, shape index: {}]  }
   0x2   :  { %v3_v1 = vsub.s32 2, %v2_v0 }
   0x4   :  { %4 = vset.pattern.permute.xlu0 %v3_v1 }
   0x5   :  { %v20_v2 = vld [vmem:[%s105_s0] sm:$0x3] }
   0x6   :  { %21 = vst [vmem:[#allocation1] sm:$0x3] %v20_v2 }
   0xd   :  { %v38_v3 = vld [vmem:[#allocation1] sm:$0x3] }
   0xe   :  { %39 = vst [vmem:[#allocation0] sm:$0x3] %v38_v3 }
  0x15   :  { %v40_v4 = vld [vmem:[#allocation0] sm:$0xff] }
  0x16   :  { %41 = vperm.xlu0 %4, %v40_v4  }
  0x95   :  { %v42_v5 = vpop.permute.xlu0 %41 }
  0x96   :  { %43 = vst [vmem:[#allocation2] sm:$0xff] %v42_v5 }
  0x9d   :  { %v47_v6 = vld [vmem:[#allocation2] sm:$0x3] }
  0x9e   :  { %49 = vst [vmem:[#allocation3] sm:$0x3] %v47_v6 }
  0xa5   :  { %v65_v7 = vld [vmem:[#allocation3] sm:$0x3] }
  0xa6   :  { %66 = vst [vmem:[%s106_s1] sm:$0x3] %v65_v7 }

// kernel: custom-call.279
= control target key start
LH: loop header
LB: loop body
LE: loop exit
PB: predicated region body
PF: predicated region fallthrough
CT: control target
= control target key end

     0   :  { %s1704_s30 = smov 0   ;;  %s1706_s10 = smov 0   ;;  %s2030_s0 = inlined_call_operand.vmem [shape: f32[2,2,2], index: 0, kind: input, shape index: {}]   ;;  %s2031_s1 = inlined_call_operand.vmem [shape: f32[2,2,2], index: 1, kind: input, shape index: {}]   ;;  %s2032_s2 = inlined_call_operand.vmem [shape: f32[2,2,2], index: 2, kind: input, shape index: {}]   ;;  %s2033_s3 = inlined_call_operand.vmem [shape: f32[2,2,2], index: 3, kind: input, shape index: {}]   ;;  %s2034_s4 = inlined_call_operand.vmem [shape: f32[2,2], index: 4, kind: output, shape index: {0}]   ;;  %s2035_s5 = inlined_call_operand.vmem [shape: f32[2,2], index: 5, kind: output, shape index: {1}]   ;;  %s2036_s6 = inlined_call_operand.vmem [shape: f32[2,2,2], index: 6, kind: output, shape index: {2}]   ;;  %s2037_s7 = inlined_call_operand.vmem [shape: f32[2,2,2], index: 7, kind: output, shape index: {3}]   ;;  %s2038_s8 = inlined_call_operand.vmem [shape: f32[2,2,2], index: 8, kind: output, shape index: {4}]   ;;  %s2039_s9 = inlined_call_operand.vmem [shape: f32[2,2,2], index: 9, kind: output, shape index: {5}]  }
   0x1   :  { %s1708_s11 = smov 0  }
   0x2 LB: > { %s1720_s12 = sadd.s32 4294967295, %s1641_s11   ;;  %s1723_s13 = sadd.s32 1, %s1641_s11   ;;  %s1641_s11 = sphi %s1708_s11, %s2058_s11   ;;  %s1637_s10 = sphi %s1706_s10, %s2057_s10   ;;  %s1633_s30 = sphi %s1704_s30, %s2056_s30  }
   0x3   : > { %s20_s14 = sshrl.u32 %s1641_s11, 3  ;;  %s21_s15 = sshrl.u32 %s1723_s13, 3 }
   0x4   : > { %s22_s16 = ssub.s32 %s20_s14, %s21_s15  ;;  %s25_s17 = sadd.s32 1, %s1637_s10 }
   0x5   : > { %p23_p0 = scmp.eq.s32.totalorder %s22_s16, 0  ;;  %p35_p1 = scmp.ne.s32.totalorder %s1637_s10, %s1633_s30 }
   0x6   : > { %p36_p2 = scmp.eq.s32.totalorder %s1720_s12, 1  ;;  %p1502_p4 = scmp.ge.s32.totalorder %s1641_s11, 2 }
   0x7   : > { %s1732_s18 = scalar_select %p23_p0, %s1637_s10, %s25_s17  }
   0x8   : > { %p1734_p3 = por %p36_p2, %p35_p1  ;;  %86 = sbr.rel (%p1502_p4) target bundleno = 17 (0x11), region = 16 }
   0x9   : > { %2040 = sst [smem:[#allocation33_spill]] %s1732_s18  ;;  %s88_s20 = sand.u32 (!%p1502_p4), 1, %s1641_s11  }
   0xa   : > { %s1504_s21 = sshll.u32 (!%p1502_p4), %s1641_s11, 1  ;;  %s1503_s22 = sshll.u32 (!%p1502_p4), %s88_s20, 1 }
   0xb   : > { %s92_s25 = scalar_lea.vmem (!%p1502_p4), %s2030_s0, %s1504_s21  ;;  %s90_s26 = scalar_lea.vmem (!%p1502_p4), [#allocation1], %s1503_s22 }
   0xc   : > { %v108_v0 = vld [vmem:[%s92_s25] sm:$0x3] (!%p1502_p4)  ;;  %s129_s29 = scalar_lea.vmem (!%p1502_p4), %s2031_s1, %s1504_s21  ;;  %s166_s16 = scalar_lea.vmem (!%p1502_p4), %s2032_s2, %s1504_s21 }
   0xd   : > { %109 = vst [vmem:[%s90_s26] sm:$0x3] (!%p1502_p4), %v108_v0  ;;  %v145_v1 = vld [vmem:[%s129_s29] sm:$0x3] (!%p1502_p4)  ;;  %s127_s17 = scalar_lea.vmem (!%p1502_p4), [#allocation3], %s1503_s22  ;;  %s203_s23 = scalar_lea.vmem (!%p1502_p4), %s2033_s3, %s1504_s21 }
   0xe   : > { %146 = vst [vmem:[%s127_s17] sm:$0x3] (!%p1502_p4), %v145_v1  ;;  %v182_v2 = vld [vmem:[%s166_s16] sm:$0x3] (!%p1502_p4)  ;;  %s164_s24 = scalar_lea.vmem (!%p1502_p4), [#allocation5], %s1503_s22  ;;  %s201_s25 = scalar_lea.vmem (!%p1502_p4), [#allocation7], %s1503_s22 }
   0xf   : > { %183 = vst [vmem:[%s164_s24] sm:$0x3] %v182_v2  ;;  %v219_v3 = vld [vmem:[%s203_s23] sm:$0x3] }
  0x10   : > { %220 = vst [vmem:[%s201_s25] sm:$0x3] %v219_v3 }
  0x11 PF: > { %p1511_p5 = scmp.ge.s32.totalorder %s1641_s11, 1  ;;  %p236_p6 = scmp.lt.s32.totalorder %s1641_s11, 3 }
  0x13   : > { %p237_p7 = pnand %p1511_p5, %p236_p6 }
  0x15   : > { %240 = sbr.rel (%p237_p7) target bundleno = 999 (0x3e7), region = 140 }
  0x1c   : > { %s259_s26 = sand.u32 1, %s1720_s12   ;;  %s277_s27 = sand.u32 1, %s1633_s30   ;;  %v337_v4 = vlaneseq  ;;  %v1651_v5 = vmov 0.0  }
  0x1d   : > { %s1757_s28 = sshll.u32 %s259_s26, 1  ;;  %s1759_s18 = sshll.u32 %s277_s27, 1  ;;  %332 = vst [vmem:[#allocation12] sm:$0xff] %v1651_v5  ;;  %333 = vst [vmem:[#allocation14] sm:$0xff] %v1651_v5 }
  0x1e   : > { %334 = vst [vmem:[#allocation16] sm:$0xff] %v1651_v5  ;;  %335 = vst [vmem:[#allocation18] sm:$0xff] %v1651_v5  ;;  %v1761_v6 = vand.u32 127, %v337_v4  ;;  %v1763_v7 = vshrl.u32 %v337_v4, 7  ;;  %s261_s11 = scalar_lea.vmem [#allocation1], %s1757_s28  ;;  %s265_s30 = scalar_lea.vmem [#allocation3], %s1757_s28 }
  0x1f   : > { %v304_v8 = vld [vmem:[%s261_s11] sm:$0x3]  ;;  %v308_v9 = vld [vmem:[%s265_s30] sm:$0x3]  ;;  %s269_s21 = scalar_lea.vmem [#allocation5], %s1757_s28  ;;  %s273_s22 = scalar_lea.vmem [#allocation7], %s1757_s28 }
  0x20   : > { %305 = vst [vmem:[#allocation0] sm:$0x3] %v304_v8  ;;  %309 = vst [vmem:[#allocation2] sm:$0x3] %v308_v9  ;;  %v312_v10 = vld [vmem:[%s269_s21] sm:$0x3]  ;;  %v339_v6 = vmov %v1761_v6  ;;  %v342_v7 = vmov %v1763_v7 }
  0x21   : > { %v316_v11 = vld [vmem:[%s273_s22] sm:$0x3]  ;;  %313 = vst [vmem:[#allocation4] sm:$0x3] %v312_v10  ;;  %v352_v6 = vmov %v1761_v6  ;;  %v355_v7 = vmov %v1763_v7  ;;  %s320_s29 = smov [#allocation20]  ;;  %s323_s14 = smov [#allocation21]  ;;  %vm346_vm0 = vcmp.eq.s32.totalorder %v342_v7, %v339_v6 }
  0x22   : > { %317 = vst [vmem:[#allocation6] sm:$0x3] %v316_v11  ;;  %vm359_vm1 = vcmp.eq.s32.totalorder %v355_v7, %v352_v6  ;;  %s336_s15 = smov [#allocation12]  ;;  %s349_s16 = smov [#allocation18]  ;;  %vm1391_vm2 = vcmp.lt.s32.totalorder %v1761_v6, 2  ;;  %v1383_v6 = vmov %v1761_v6  ;;  %v1386_v7 = vmov %v1763_v7 }
  0x23   : > { %s326_s17 = smov [#allocation22]  ;;  %s329_s20 = smov [#allocation23]  ;;  %vm1396_vm3 = vcmp.eq.s32.totalorder %v1386_v7, %v1383_v6  ;;  %v1434_v6 = vmov %v1761_v6  ;;  %v1403_v7 = vmov %v1763_v7 }
  0x24   : > { %v343_v12 = vld [vmem:[%s336_s15] sm:$0x3]  ;;  %s1387_s30 = smov [#allocation20]  ;;  %s1404_s21 = smov [#allocation21]  ;;  %v1400_v6 = vmov %v1761_v6  ;;  %v1437_v7 = vmov %v1763_v7 }
  0x25   : > { %v356_v13 = vld [vmem:[%s349_s16] sm:$0x3]  ;;  %v347_v16 = vsel %vm346_vm0, 1.0, %v343_v12  ;;  %s1421_s22 = smov [#allocation22]  ;;  %v1417_v6 = vmov %v1761_v6  ;;  %v1420_v7 = vmov %v1763_v7  ;;  %vm1447_vm4 = vcmp.eq.s32.totalorder %v1437_v7, %v1434_v6 }
  0x26   : > { %v360_v17 = vsel %vm359_vm1, 1.0, %v356_v13  ;;  %348 = vst [vmem:[%s336_s15] sm:$0x3] %v347_v16 }
  0x27   : > { %v321_v14 = vld [vmem:[#allocation0] sm:$0xff]  ;;  %v324_v15 = vld [vmem:[#allocation2] sm:$0xff]  ;;  %361 = vst [vmem:[%s349_s16] sm:$0x3] %v360_v17 }
  0x28   : > { %322 = vst [vmem:[%s320_s29] sm:$0xff] %v321_v14  ;;  %325 = vst [vmem:[%s323_s14] sm:$0xff] %v324_v15  ;;  %v327_v18 = vld [vmem:[#allocation4] sm:$0xff]  ;;  %s1438_s29 = smov [#allocation23] }
  0x29   : > { %v330_v19 = vld [vmem:[#allocation6] sm:$0xff]  ;;  %328 = vst [vmem:[%s326_s17] sm:$0xff] %v327_v18 }
  0x2a   : > { %331 = vst [vmem:[%s329_s20] sm:$0xff] %v330_v19 }
  0x2f   : > { %v1393_v20 = vld [vmem:[%s1387_s30] sm:$0x3] }
  0x30   : > { %v1410_v21 = vld [vmem:[%s1404_s21] sm:$0x3]  ;;  %v1394_v22 = vsel %vm1391_vm2, %v1393_v20, 0.0 }
  0x31   : > { %v1411_v23 = vsel %vm1391_vm2, %v1410_v21, 0.0  ;;  %v1427_v24 = vld [vmem:[%s1421_s22] sm:$0x3]  ;;  %v1395_v26 = vmul.f32 %v1394_v22, %v1394_v22 }
  0x32   : > { %v1444_v25 = vld [vmem:[%s1438_s29] sm:$0x3]  ;;  %v1412_v27 = vmul.f32 %v1411_v23, %v1411_v23  ;;  %v1428_v28 = vsel %vm1391_vm2, %v1427_v24, 0.0 }
  0x33   : > { %v1445_v29 = vsel %vm1391_vm2, %v1444_v25, 0.0  ;;  %v1429_v30 = vmul.f32 %v1428_v28, %v1428_v28  ;;  %v1397_v33 = vsel %vm1396_vm3, 0.0, %v1395_v26 }
  0x34   : > { %v1414_v31 = vadd.f32 %v1412_v27, %v1395_v26  ;;  %v1446_v32 = vmul.f32 %v1445_v29, %v1445_v29  ;;  %v1413_v34 = vadd.f32 %v1412_v27, %v1397_v33 }
  0x36   : > { %v1431_v35 = vadd.f32 %v1429_v30, %v1414_v31  ;;  %v1430_v36 = vadd.f32 %v1429_v30, %v1413_v34  ;;  %v1448_v37 = vsel %vm1447_vm4, 0.0, %v1446_v32 }
  0x38   : > { %v1450_v38 = vadd.f32 %v1446_v32, %v1431_v35  ;;  %v1449_v39 = vadd.f32 %v1448_v37, %v1430_v36 }
  0x3a   : > { %1451 = vadd.xlane.f32.xlu0 %v1450_v38 }
  0x3e   : > { %1459 = vadd.xlane.f32.xlu0 %v1449_v39 }
  0xc7   : > { %v1452_v40 = vpop.xlane.xlu0 %1451 }
  0xc8   : > { %v1453_v41 = vrot.slane %v1452_v40, 4 }
  0xca   : > { %v1454_v42 = vadd.f32 %v1453_v41, %v1452_v40 }
  0xcb   : > { %v1460_v43 = vpop.xlane.xlu0 %1459 }
  0xcc   : > { %v1455_v44 = vrot.slane %v1454_v42, 2  ;;  %v1461_v45 = vrot.slane %v1460_v43, 4 }
  0xce   : > { %v1462_v46 = vadd.f32 %v1461_v45, %v1460_v43  ;;  %v1456_v47 = vadd.f32 %v1455_v44, %v1454_v42 }
  0xd0   : > { %v1463_v48 = vrot.slane %v1462_v46, 2  ;;  %v1457_v50 = vrot.slane %v1456_v47, 1 }
  0xd2   : > { %v1464_v49 = vadd.f32 %v1463_v48, %v1462_v46  ;;  %v1458_v53 = vadd.f32 %v1457_v50, %v1456_v47 }
  0xd4   : > { %v1465_v51 = vrot.slane %v1464_v49, 1 }
  0xd6   : > { %v1466_v52 = vadd.f32 %v1465_v51, %v1464_v49 }
  0xd8   : > { %1552 = vpush %v1466_v52 }
  0xd9   : > { %1554 = vpush %v1458_v53 }
 0x109   : > { %s1553_s14 = spop %1552 }
 0x10a   : > { %s1555_s15 = spop %1554 }
 0x10b   : > { %s1469_s16 = smul.f32 1e-10, %s1555_s15 }
 0x10d   : > { %p1470_p8 = scmp.le.f32.partialorder %s1553_s14, %s1469_s16 }
 0x10e   : > { %s1797_s17 = smov (!%p1470_p8), 0  }
 0x10f   : > { %1473 = sbr.rel (%p1470_p8) target bundleno = 953 (0x3b9), region = 467 }
 0x116 LB: >> { %s1802_s20 = smov 0   ;;  %s1645_s17 = sphi %s1797_s17, %s2042_s17  }
 0x117 LB: >>> { %s466_s30 = smov [#allocation20]  ;;  %v470_v6 = vmov %v1761_v6  ;;  %v473_v7 = vmov %v1763_v7  ;;  %s486_s21 = smov [#allocation21]  ;;  %vm789_vm14 = vcmp.eq.s32.totalorder %v1763_v7, 0  ;;  %vm801_vm15 = vcmp.eq.s32.totalorder %v1763_v7, 1  ;;  %s1649_s20 = sphi %s1802_s20, %s465_s20  }
 0x118   : >>> { %v490_v6 = vmov %v1761_v6  ;;  %v493_v7 = vmov %v1763_v7  ;;  %v474_v54 = vld [vmem:[%s466_s30] sm:$0x3]  ;;  %vm477_vm5 = vcmp.eq.s32.totalorder %v473_v7, %v470_v6  ;;  %s506_s22 = smov [#allocation23]  ;;  %s467_s29 = smov [#allocation24] }
 0x119   : >>> { %vm497_vm6 = vcmp.eq.s32.totalorder %v493_v7, %v490_v6  ;;  %v510_v6 = vmov %v1761_v6  ;;  %v513_v7 = vmov %v1763_v7  ;;  %v478_v55 = vsel %vm477_vm5, %v474_v54, 0.0  ;;  %v494_v56 = vld [vmem:[%s486_s21] sm:$0x3]  ;;  %s487_s14 = smov [#allocation25]  ;;  %s507_s15 = smov [#allocation26] }
 0x11a   : >>> { %vm517_vm7 = vcmp.eq.s32.totalorder %v513_v7, %v510_v6  ;;  %v479_v57 = vrot.slane %v478_v55, 4  ;;  %v498_v58 = vsel %vm497_vm6, %v494_v56, 0.0  ;;  %v514_v59 = vld [vmem:[%s506_s22] sm:$0x3]  ;;  %s530_s16 = smov [#allocation25]  ;;  %s528_s30 = smov [#allocation24]  ;;  %v579_v6 = vmov %v1761_v6 }
 0x11b   : >>> { %v499_v60 = vrot.slane %v498_v58, 4  ;;  %v518_v61 = vsel %vm517_vm7, %v514_v59, 0.0  ;;  %s532_s21 = smov [#allocation26]  ;;  %s567_s22 = smov [#allocation27]  ;;  %v582_v7 = vmov %v1763_v7  ;;  %v594_v6 = vmov %v1761_v6 }
 0x11c   : >>> { %v480_v62 = vadd.f32 %v479_v57, %v478_v55  ;;  %v519_v63 = vrot.slane %v518_v61, 4  ;;  %v597_v7 = vmov %v1763_v7  ;;  %vm584_vm12 = vcmp.eq.s32.totalorder %v582_v7, %v579_v6  ;;  %s1821_s24 = smov [#allocation22]  ;;  %s1827_s23 = smov [#allocation14] }
 0x11d   : >>> { %v500_v0 = vadd.f32 %v499_v60, %v498_v58  ;;  %vm599_vm13 = vcmp.eq.s32.totalorder %v597_v7, %v594_v6  ;;  %s829_s11 = smov [#allocation31]  ;;  %s1833_s27 = smov [#allocation18]  ;;  %v615_v55 = vld [vmem:[%s1821_s24] sm:$0x3]  ;;  %v692_v6 = vmov %v1761_v6  ;;  %v695_v7 = vmov %v1763_v7 }
 0x11e   : >>> { %v481_v1 = vrot.slane %v480_v62, 2  ;;  %v520_v2 = vadd.f32 %v519_v63, %v518_v61  ;;  %v838_v58 = vld [vmem:[%s1827_s23] sm:$0x3]  ;;  %s607_s26 = smov [#allocation32]  ;;  %s831_s25 = smov [#allocation32]  ;;  %v706_v6 = vmov %v1761_v6  ;;  %v709_v7 = vmov %v1763_v7 }
 0x11f   : >>> { %v501_v3 = vrot.slane %v500_v0, 2  ;;  %v840_v61 = vld [vmem:[%s1833_s27] sm:$0x3]  ;;  %vm699_vm0 = vcmp.eq.s32.totalorder %v695_v7, %v692_v6  ;;  %v665_v6 = vmov %v1761_v6  ;;  %v668_v7 = vmov %v1763_v7  ;;  %s465_s20 = sadd.s32 1, %s1649_s20  }
 0x120   : >>> { %v482_v4 = vadd.f32 %v481_v1, %v480_v62  ;;  %v521_v5 = vrot.slane %v520_v2, 2  ;;  %v679_v6 = vmov %v1761_v6  ;;  %v682_v7 = vmov %v1763_v7  ;;  %p462_p9 = scmp.ge.s32.totalorder %s465_s20, 3  }
 0x121   : >>> { %v502_v8 = vadd.f32 %v501_v3, %v500_v0  ;;  %vm714_vm1 = vcmp.eq.s32.totalorder %v709_v7, %v706_v6  ;;  %vm673_vm3 = vcmp.eq.s32.totalorder %v668_v7, %v665_v6  ;;  %vm686_vm4 = vcmp.eq.s32.totalorder %v682_v7, %v679_v6 }
 0x122   : >>> { %v483_v9 = vrot.slane %v482_v4, 1  ;;  %v522_v10 = vadd.f32 %v521_v5, %v520_v2  ;;  %vm728_vm5 = vcmp.eq.s32.totalorder %v1761_v6, 0  ;;  %vm732_vm6 = vcmp.eq.s32.totalorder %v1761_v6, 1 }
 0x123   : >>> { %v503_v11 = vrot.slane %v502_v8, 1  ;;  %v366_v6 = vmov (%p462_p9), %v1761_v6  ;;  %v369_v7 = vmov (%p462_p9), %v1763_v7 }
 0x124   : >>> { %v484_v12 = vadd.f32 %v483_v9, %v482_v4  ;;  %v523_v13 = vrot.slane %v522_v10, 1  ;;  %v419_v6 = vmov (%p462_p9), %v1761_v6  ;;  %vm381_vm7 = vcmp.eq.s32.totalorder (%p462_p9), %v369_v7, %v366_v6 }
 0x125   : >>> { %v504_v14 = vadd.f32 %v503_v11, %v502_v8  ;;  %v422_v7 = vmov (%p462_p9), %v1763_v7  ;;  %v385_v6 = vmov (%p462_p9), %v1761_v6 }
 0x126   : >>> { %485 = vst [vmem:[%s467_s29] sm:$0x1] %v484_v12  ;;  %v524_v15 = vadd.f32 %v523_v13, %v522_v10  ;;  %s569_s29 = smov [#allocation28]  ;;  %v388_v7 = vmov (%p462_p9), %v1763_v7  ;;  %v402_v6 = vmov (%p462_p9), %v1761_v6 }
 0x127   : >>> { %505 = vst [vmem:[%s487_s14] sm:$0x1] %v504_v14  ;;  %s526_s14 = smov [#allocation29]  ;;  %v405_v7 = vmov (%p462_p9), %v1763_v7 }
 0x128   : >>> { %525 = vst [vmem:[%s507_s15] sm:$0x1] %v524_v15  ;;  %s527_s15 = smov [#allocation30]  ;;  %s571_s14 = smov %s526_s14 }
 0x129   : >>> { %s573_s15 = smov %s527_s15 }
 0x12d   : >>> { %v529_v18 = vld [vmem:[%s528_s30] sm:$0xff]  ;;  %s590_s30 = smov [#allocation30] }
 0x12e   : >>> { %v531_v16 = vld [vmem:[%s530_s16] sm:$0xff]  ;;  %v552_v31 = vand.u32 2147483647, %v529_v18  ;;  %s575_s16 = smov [#allocation29] }
 0x12f   : >>> { %v535_v17 = vmul.f32 2.0, %v531_v16  ;;  %v533_v19 = vld [vmem:[%s532_s21] sm:$0xff]  ;;  %v553_v36 = vand.u32 2147483647, %v531_v16  ;;  %s588_s21 = smov [#allocation31] }
 0x130   : >>> { %v534_v20 = vsub.f32 %v533_v19, %v529_v18  ;;  %v554_v32 = vand.u32 2147483647, %v533_v19 }
 0x131   : >>> { %1603 = vrcp.f32 %v535_v17 }
 0x132   : >>> { %v555_v35 = vmin.f32 %v552_v31, %v554_v32 }
 0x134   : >>> { %v556_v37 = vmul.f32 1.1920929e-08, %v555_v35 }
 0x136   : >>> { %vm557_vm11 = vcmp.le.f32.partialorder %v553_v36, %v556_v37 }
 0x13b   : >>> { %v1604_v21 = vpop.eup %1603 }
 0x13c   : >>> { %v537_v22 = vmul.f32 %v1604_v21, %v534_v20 }
 0x13e   : >>> { %v539_v23 = vmul.f32 %v537_v22, %v537_v22  ;;  %vm538_vm10 = vcmp.ge.f32.partialorder %v537_v22, 0.0 }
 0x140   : >>> { %v540_v24 = vadd.f32 1.0, %v539_v23 }
 0x142   : >>> { %1605 = vrsqrt.f32 %v540_v24  ;;  %vm543_vm8 = vcmp.eq.f32.partialorder %v540_v24, inf  ;;  %v546_v26 = vand.u32 2147483648, %v540_v24  ;;  %vm545_vm9 = vcmp.eq.f32.partialorder %v540_v24, 0.0 }
 0x14c   : >>> { %v1606_v25 = vpop.eup %1605 }
 0x14d   : >>> { %v542_v27 = vmul.f32 %v1606_v25, %v540_v24 }
 0x14f   : >>> { %v544_v28 = vsel %vm543_vm8, %v540_v24, %v542_v27  ;;  %vm434_vm8 = vcmp.eq.s32.totalorder (%p462_p9), %v422_v7, %v419_v6 }
 0x150   : >>> { %v547_v29 = vsel %vm545_vm9, %v546_v26, %v544_v28 }
 0x151   : >>> { %v548_v30 = vxor.u32 2147483648, %v547_v29 }
 0x153   : >>> { %v549_v33 = vsel %vm538_vm10, %v547_v29, %v548_v30 }
 0x154   : >>> { %v550_v34 = vadd.f32 %v549_v33, %v537_v22 }
 0x156   : >>> { %1607 = vrcp.f32 %v550_v34 }
 0x160   : >>> { %v1608_v38 = vpop.eup %1607 }
 0x161   : >>> { %v558_v39 = vsel %vm557_vm11, 0.0, %v1608_v38 }
 0x162   : >>> { %v559_v40 = vmul.f32 %v558_v39, %v558_v39  ;;  %v563_v41 = vmul.f32 %v558_v39, %v531_v16 }
 0x164   : >>> { %v560_v42 = vadd.f32 1.0, %v559_v40  ;;  %v564_v43 = vsub.f32 %v529_v18, %v563_v41  ;;  %v566_v44 = vadd.f32 %v563_v41, %v533_v19 }
 0x166   : >>> { %1609 = vrsqrt.f32 %v560_v42  ;;  %568 = vst [vmem:[%s567_s22] sm:$0xff] %v564_v43  ;;  %570 = vst [vmem:[%s569_s29] sm:$0xff] %v566_v44  ;;  %s605_s22 = smov [#allocation31]  ;;  %s1817_s29 = smov [#allocation20] }
 0x167   : >>> { %v613_v53 = vld [vmem:[%s1817_s29] sm:$0x3] }
 0x170   : >>> { %v1610_v45 = vpop.eup %1609 }
 0x171   : >>> { %572 = vst [vmem:[%s571_s14] sm:$0xff] %v1610_v45  ;;  %v562_v46 = vmul.f32 %v1610_v45, %v558_v39  ;;  %s603_s14 = smov [#allocation32] }
 0x173   : >>> { %574 = vst [vmem:[%s573_s15] sm:$0xff] %v562_v46  ;;  %s1819_s15 = smov [#allocation21] }
 0x174   : >>> { %v614_v54 = vld [vmem:[%s1819_s15] sm:$0x3] }
 0x178   : >>> { %v576_v47 = vld [vmem:[%s575_s16] ss:$0 sm:$0xff]  ;;  %s1823_s16 = smov [#allocation23] }
 0x179   : >>> { %v585_v48 = vsel %vm584_vm12, %v576_v47, 0.0  ;;  %v616_v56 = vld [vmem:[%s1823_s16] sm:$0x3] }
 0x17a   : >>> { %586 = vadd.xlane.f32.xlu0 %v585_v48  ;;  %v591_v49 = vld [vmem:[%s590_s30] ss:$0 sm:$0xff]  ;;  %s1825_s30 = smov [#allocation12] }
 0x17b   : >>> { %v600_v50 = vsel %vm599_vm13, %v591_v49, 0.0  ;;  %v837_v57 = vld [vmem:[%s1825_s30] sm:$0x3] }
 0x17e   : >>> { %601 = vadd.xlane.f32.xlu0 %v600_v50 }
 0x207   : >>> { %v587_v51 = vpop.xlane.xlu0 %586 }
 0x208   : >>> { %589 = vst [vmem:[%s588_s21] sm:$0xff] %v587_v51  ;;  %s1829_s21 = smov [#allocation16] }
 0x209   : >>> { %v839_v59 = vld [vmem:[%s1829_s21] sm:$0x3] }
 0x20b   : >>> { %v602_v52 = vpop.xlane.xlu0 %601 }
 0x20c   : >>> { %604 = vst [vmem:[%s603_s14] sm:$0xff] %v602_v52  ;;  %s1853_s14 = smov [#allocation23] }
 0x20f   : >>> { %v606_v60 = vld [vmem:[%s605_s22] sm:$0xff]  ;;  %s1851_s22 = smov [#allocation22] }
 0x210   : >>> { %v830_v62 = vld [vmem:[%s829_s11] sm:$0xff]  ;;  %v617_v63 = vmul.f32 %v613_v53, %v606_v60  ;;  %v620_v0 = vmul.f32 %v614_v54, %v606_v60  ;;  %v624_v1 = vmul.f32 %v615_v55, %v606_v60  ;;  %v627_v2 = vmul.f32 %v616_v56, %v606_v60  ;;  %s1849_s11 = smov [#allocation12] }
 0x211   : >>> { %v841_v3 = vmul.f32 %v837_v57, %v830_v62  ;;  %v844_v4 = vmul.f32 %v838_v58, %v830_v62  ;;  %v848_v5 = vmul.f32 %v839_v59, %v830_v62  ;;  %v851_v8 = vmul.f32 %v840_v61, %v830_v62 }
 0x213   : >>> { %v608_v9 = vld [vmem:[%s607_s26] sm:$0xff]  ;;  %s635_s26 = smov [#allocation30] }
 0x214   : >>> { %v832_v10 = vld [vmem:[%s831_s25] sm:$0xff]  ;;  %v618_v11 = vmul.f32 %v615_v55, %v608_v9  ;;  %v621_v12 = vmul.f32 %v616_v56, %v608_v9  ;;  %v623_v13 = vmul.f32 %v613_v53, %v608_v9  ;;  %v626_v14 = vmul.f32 %v614_v54, %v608_v9  ;;  %s633_s25 = smov [#allocation29] }
 0x215   : >>> { %v842_v15 = vmul.f32 %v839_v59, %v832_v10  ;;  %v845_v16 = vmul.f32 %v840_v61, %v832_v10  ;;  %v847_v17 = vmul.f32 %v837_v57, %v832_v10  ;;  %v850_v18 = vmul.f32 %v838_v58, %v832_v10  ;;  %v634_v27 = vld [vmem:[%s633_s25] ss:$0 sm:$0xff]  ;;  %s662_s25 = smov [#allocation27] }
 0x216   : >>> { %v619_v19 = vsub.f32 %v617_v63, %v618_v11  ;;  %v622_v20 = vsub.f32 %v620_v0, %v621_v12  ;;  %v625_v21 = vadd.f32 %v624_v1, %v623_v13  ;;  %v628_v22 = vadd.f32 %v627_v2, %v626_v14  ;;  %v636_v28 = vld [vmem:[%s635_s26] ss:$0 sm:$0xff]  ;;  %s661_s26 = smov [#allocation20] }
 0x217   : >>> { %v843_v23 = vsub.f32 %v841_v3, %v842_v15  ;;  %v846_v24 = vsub.f32 %v844_v4, %v845_v16  ;;  %v849_v25 = vadd.f32 %v848_v5, %v847_v17  ;;  %v852_v26 = vadd.f32 %v851_v8, %v850_v18  ;;  %v669_v63 = vld [vmem:[%s662_s25] ss:$0 sm:$0xff]  ;;  %s905_s25 = sadd.s32 (%p462_p9), 1, %s1645_s17  }
 0x218   : >>> { %630 = vst [vmem:[%s1819_s15] sm:$0x3] %v622_v20  ;;  %632 = vst [vmem:[%s1823_s16] sm:$0x3] %v628_v22  ;;  %s1855_s15 = smov [#allocation20]  ;;  %s703_s16 = smov [#allocation28] }
 0x219   : >>> { %629 = vst [vmem:[%s1817_s29] sm:$0x3] %v619_v19  ;;  %631 = vst [vmem:[%s1821_s24] sm:$0x3] %v625_v21  ;;  %s1857_s24 = smov [#allocation16]  ;;  %s1865_s29 = smov [#allocation21]  ;;  %v710_v59 = vld [vmem:[%s703_s16] ss:$0 sm:$0xff] }
 0x21a   : >>> { %853 = vst [vmem:[%s1825_s30] sm:$0x3] %v843_v23  ;;  %854 = vst [vmem:[%s1827_s23] sm:$0x3] %v846_v24  ;;  %s1859_s23 = smov [#allocation14]  ;;  %s689_s30 = smov [#allocation22] }
 0x21b   : >>> { %855 = vst [vmem:[%s1829_s21] sm:$0x3] %v849_v25  ;;  %856 = vst [vmem:[%s1833_s27] sm:$0x3] %v852_v26  ;;  %s1863_s27 = smov [#allocation18]  ;;  %s702_s21 = smov [#allocation23] }
 0x21c   : >>> { %s805_s16 = smov [#allocation21]  ;;  %p458_p10 = scmp.ge.s32.totalorder (%p462_p9), %s905_s25, 15 }
 0x21d   : >> { %s2042_s17 = smov (%p462_p9), %s905_s25 }
 0x21f   : >>> { %v644_v30 = vld [vmem:[%s1853_s14] sm:$0x3] }
 0x220   : >>> { %v643_v29 = vld [vmem:[%s1851_s22] sm:$0x3]  ;;  %v652_v36 = vmul.f32 %v644_v30, %v636_v28  ;;  %v655_v42 = vmul.f32 %v644_v30, %v634_v27 }
 0x221   : >>> { %v641_v31 = vld [vmem:[%s1855_s15] sm:$0x3]  ;;  %v651_v35 = vmul.f32 %v643_v29, %v634_v27  ;;  %v654_v37 = vmul.f32 %v643_v29, %v636_v28 }
 0x222   : >>> { %v859_v32 = vld [vmem:[%s1849_s11] ss:$0 sm:$0xff]  ;;  %v1531_v34 = vld [vmem:[%s1849_s11 + $0x1] ss:$0 sm:$0xff]  ;;  %v645_v48 = vmul.f32 %v641_v31, %v634_v27  ;;  %v648_v49 = vmul.f32 %v641_v31, %v636_v28 }
 0x223   : >>> { %v1530_v33 = vld [vmem:[%s1849_s11 - $0x1] sm:$0x2]  ;;  %v1533_v40 = vld [vmem:[%s1857_s24 + $0x1] sm:$0x1]  ;;  %v653_v47 = vsub.f32 %v651_v35, %v652_v36  ;;  %v656_v53 = vadd.f32 %v655_v42, %v654_v37 }
 0x224   : >>> { %v866_v38 = vsel %vm789_vm14, %v859_v32, %v1530_v33  ;;  %v870_v39 = vld [vmem:[%s1857_s24] ss:$0 sm:$0xff]  ;;  %v878_v43 = vsel %vm801_vm15, %v1531_v34, %v1533_v40  ;;  %v1535_v45 = vld [vmem:[%s1859_s23 + $0x1] ss:$0 sm:$0xff] }
 0x225   : >>> { %v883_v41 = vld [vmem:[%s1859_s23] ss:$0 sm:$0xff]  ;;  %869 = vst [vmem:[%s1849_s11] sm:$0x3] %v866_v38  ;;  %880 = vst [vmem:[%s1857_s24] sm:$0x3] %v878_v43  ;;  %v1537_v51 = vld [vmem:[%s1863_s27 + $0x1] sm:$0x1] }
 0x226   : >>> { %v1534_v44 = vld [vmem:[%s1859_s23 - $0x1] sm:$0x2]  ;;  %1532 = vst [vmem:[%s1849_s11 + $0x1] sm:$0x1] %v870_v39  ;;  %v902_v54 = vsel %vm801_vm15, %v1535_v45, %v1537_v51  ;;  %659 = vst [vmem:[%s1851_s22] sm:$0x3] %v653_v47  ;;  %s676_s11 = smov [#allocation21] }
 0x227   : >>> { %v894_v46 = vld [vmem:[%s1863_s27] ss:$0 sm:$0xff]  ;;  %v890_v50 = vsel %vm789_vm14, %v883_v41, %v1534_v44  ;;  %660 = vst [vmem:[%s1853_s14] sm:$0x3] %v656_v53  ;;  %s1907_s22 = smov [#allocation22]  ;;  %s1652_s14 = smov 1  }
 0x228   : >>> { %v642_v52 = vld [vmem:[%s1865_s29] sm:$0x3]  ;;  %893 = vst [vmem:[%s1859_s23] sm:$0x3] %v890_v50  ;;  %904 = vst [vmem:[%s1863_s27] sm:$0x3] %v902_v54  ;;  %s718_s24 = smov [#allocation21]  ;;  %s1910_s27 = smov [#allocation23] }
 0x229   : >>> { %v646_v55 = vmul.f32 %v642_v52, %v636_v28  ;;  %v649_v56 = vmul.f32 %v642_v52, %v634_v27  ;;  %1536 = vst [vmem:[%s1859_s23 + $0x1] sm:$0x1] %v894_v46  ;;  %s1653_s23 = smov 127  }
 0x22b   : >>> { %v647_v57 = vsub.f32 %v645_v48, %v646_v55  ;;  %v650_v58 = vadd.f32 %v649_v56, %v648_v49 }
 0x22d   : >>> { %657 = vst [vmem:[%s1855_s15] sm:$0x3] %v647_v57  ;;  %658 = vst [vmem:[%s1865_s29] sm:$0x3] %v650_v58  ;;  %v696_v60 = vld [vmem:[%s689_s30] sm:$0x3]  ;;  %s717_s15 = smov [#allocation20]  ;;  %s781_s29 = smov [#allocation20] }
 0x22e   : >>> { %v700_v61 = vsel %vm699_vm0, 0.0, %v696_v60  ;;  %v711_v62 = vld [vmem:[%s702_s21] sm:$0x3] }
 0x22f   : >>> { %701 = vst [vmem:[%s689_s30] sm:$0x3] %v700_v61  ;;  %v715_v0 = vsel %vm714_vm1, %v710_v59, %v711_v62  ;;  %s782_s30 = smov [#allocation22] }
 0x230   : >>> { %716 = vst [vmem:[%s702_s21] sm:$0x3] %v715_v0  ;;  %s806_s21 = smov [#allocation23] }
 0x234   : >>> { %v670_v1 = vld [vmem:[%s661_s26] sm:$0x3] }
 0x235   : >>> { %v683_v2 = vld [vmem:[%s676_s11] sm:$0x3]  ;;  %v674_v3 = vsel %vm673_vm3, %v669_v63, %v670_v1 }
 0x236   : >>> { %v687_v4 = vsel %vm686_vm4, 0.0, %v683_v2  ;;  %675 = vst [vmem:[%s661_s26] sm:$0x3] %v674_v3  ;;  %v755_v5 = vld [vmem:[%s1907_s22] sm:$0x3]  ;;  %s370_s26 = smov (%p462_p9), [#allocation20] }
 0x237   : >>> { %688 = vst [vmem:[%s676_s11] sm:$0x3] %v687_v4  ;;  %756 = vrot.lane.b32.xlu0 %v755_v5, %s1652_s14  ;;  %v751_v11 = vld [vmem:[%s1910_s27] sm:$0x3]  ;;  %s389_s11 = smov (%p462_p9), [#allocation21] }
 0x238   : >>> { %v772_v12 = vld [vmem:[%s1910_s27] sm:$0x3] }
 0x239   : >>> { %v754_v30 = vld [vmem:[%s1907_s22] sm:$0x3] }
 0x23d   : >>> { %v723_v8 = vld [vmem:[%s717_s15] sm:$0x3] }
 0x23e   : >>> { %724 = vrot.lane.b32.xlu1 %v723_v8, %s1652_s14  ;;  %v719_v9 = vld [vmem:[%s718_s24] sm:$0x3] }
 0x23f   : >>> { %v740_v10 = vld [vmem:[%s718_s24] sm:$0x3] }
 0x240   : >>> { %v722_v18 = vld [vmem:[%s717_s15] sm:$0x3] }
 0x242   : >>> { %720 = vrot.lane.b32.xlu1 %v719_v9, %s1652_s14 }
 0x246   : >>> { %741 = vrot.lane.b32.xlu1 %v740_v10, %s1653_s23 }
 0x24a   : >>> { %752 = vrot.lane.b32.xlu1 %v751_v11, %s1652_s14  ;;  %s423_s14 = smov (%p462_p9), [#allocation23] }
 0x24e   : >>> { %773 = vrot.lane.b32.xlu1 %v772_v12, %s1653_s23 }
 0x2a9   : >>> { %v757_v20 = vpop.permute.xlu0 %756 }
 0x2aa   : >>> { %v761_v22 = vsel %vm728_vm5, %v755_v5, %v757_v20 }
 0x2b0   : >>> { %v725_v13 = vpop.permute.xlu1 %724 }
 0x2b1   : >>> { %v729_v14 = vsel %vm728_vm5, %v723_v8, %v725_v13 }
 0x2b4   : >>> { %v721_v15 = vpop.permute.xlu1 %720 }
 0x2b5   : >>> { %v733_v16 = vsel %vm732_vm6, %v721_v15, %v729_v14 }
 0x2b6   : >>> { %v739_v17 = vsel %vm1391_vm2, %v733_v16, 0.0 }
 0x2b7   : >>> { %747 = vst [vmem:[%s717_s15] sm:$0x3] %v739_v17 }
 0x2b8   : >>> { %v742_v19 = vpop.permute.xlu1 %741 }
 0x2b9   : >>> { %v746_v21 = vsel %vm732_vm6, %v722_v18, %v742_v19 }
 0x2ba   : >>> { %748 = vst [vmem:[%s718_s24] sm:$0x3] %v746_v21 }
 0x2bc   : >>> { %v753_v23 = vpop.permute.xlu1 %752 }
 0x2bd   : >>> { %v765_v24 = vsel %vm732_vm6, %v753_v23, %v761_v22 }
 0x2be   : >>> { %v783_v25 = vld [vmem:[%s781_s29] ss:$0 sm:$0xff]  ;;  %v1523_v27 = vld [vmem:[%s781_s29 + $0x1] ss:$0 sm:$0xff]  ;;  %v771_v29 = vsel %vm1391_vm2, %v765_v24, 0.0 }
 0x2bf   : >>> { %v1522_v26 = vld [vmem:[%s781_s29 - $0x1] sm:$0x2]  ;;  %779 = vst [vmem:[%s1907_s22] sm:$0x3] %v771_v29  ;;  %s406_s22 = smov (%p462_p9), [#allocation22] }
 0x2c0   : >>> { %v790_v28 = vsel %vm789_vm14, %v783_v25, %v1522_v26  ;;  %v774_v31 = vpop.permute.xlu1 %773 }
 0x2c1   : >>> { %793 = vst [vmem:[%s781_s29] sm:$0x3] %v790_v28  ;;  %v807_v32 = vld [vmem:[%s805_s16] ss:$0 sm:$0xff]  ;;  %v1527_v34 = vld [vmem:[%s805_s16 + $0x1] ss:$0 sm:$0xff]  ;;  %v778_v35 = vsel %vm732_vm6, %v754_v30, %v774_v31 }
 0x2c2   : >>> { %v1526_v33 = vld [vmem:[%s805_s16 - $0x1] sm:$0x2]  ;;  %780 = vst [vmem:[%s1910_s27] sm:$0x3] %v778_v35 }
 0x2c3   : >>> { %v814_v36 = vsel %vm789_vm14, %v807_v32, %v1526_v33 }
 0x2c4   : >>> { %817 = vst [vmem:[%s805_s16] sm:$0x3] %v814_v36 }
 0x2c6   : >>> { %v794_v37 = vld [vmem:[%s782_s30] ss:$0 sm:$0xff]  ;;  %v1525_v38 = vld [vmem:[%s782_s30 + $0x1] sm:$0x1] }
 0x2c7   : >>> { %1524 = vst [vmem:[%s781_s29 + $0x1] sm:$0x1] %v794_v37  ;;  %v802_v39 = vsel %vm801_vm15, %v1523_v27, %v1525_v38  ;;  %464 = sbr.rel (!%p462_p9) target bundleno = 279 (0x117), region = 462 }
 0x2c8   : >>> { %804 = vst [vmem:[%s782_s30] sm:$0x3] %v802_v39 }
 0x2c9   : >>> { %v818_v40 = vld [vmem:[%s806_s21] ss:$0 sm:$0xff]  ;;  %v1529_v41 = vld [vmem:[%s806_s21 + $0x1] sm:$0x1] }
 0x2ca   : >>> { %1528 = vst [vmem:[%s805_s16 + $0x1] sm:$0x1] %v818_v40  ;;  %v826_v42 = vsel %vm801_vm15, %v1527_v34, %v1529_v41 }
 0x2cb   : >>> { %828 = vst [vmem:[%s806_s21] sm:$0x3] %v826_v42 }
 0x2ce   : >> { %v376_v43 = vld [vmem:[%s370_s26] sm:$0x3] }
 0x2cf   : >> { %v377_v45 = vsel %vm1391_vm2, %v376_v43, 0.0  ;;  %v412_v47 = vld [vmem:[%s406_s22] sm:$0x3] }
 0x2d0   : >> { %v378_v49 = vmul.f32 %v377_v45, %v377_v45  ;;  %v413_v51 = vsel %vm1391_vm2, %v412_v47, 0.0 }
 0x2d1   : >> { %v395_v44 = vld [vmem:[%s389_s11] sm:$0x3]  ;;  %v414_v53 = vmul.f32 %v413_v51, %v413_v51 }
 0x2d2   : >> { %v396_v46 = vsel %vm1391_vm2, %v395_v44, 0.0  ;;  %v429_v48 = vld [vmem:[%s423_s14] sm:$0x3]  ;;  %v382_v56 = vsel %vm381_vm7, 0.0, %v378_v49 }
 0x2d3   : >> { %v397_v50 = vmul.f32 %v396_v46, %v396_v46  ;;  %v430_v52 = vsel %vm1391_vm2, %v429_v48, 0.0 }
 0x2d4   : >> { %v431_v55 = vmul.f32 %v430_v52, %v430_v52 }
 0x2d5   : >> { %v399_v54 = vadd.f32 %v397_v50, %v378_v49  ;;  %v398_v57 = vadd.f32 %v397_v50, %v382_v56 }
 0x2d6   : >> { %v435_v60 = vsel %vm434_vm8, 0.0, %v431_v55 }
 0x2d7   : >> { %v416_v58 = vadd.f32 %v414_v53, %v399_v54  ;;  %v415_v59 = vadd.f32 %v414_v53, %v398_v57 }
 0x2d9   : >> { %v437_v61 = vadd.f32 %v431_v55, %v416_v58  ;;  %v436_v62 = vadd.f32 %v435_v60, %v415_v59 }
 0x2db   : >> { %438 = vadd.xlane.f32.xlu0 %v437_v61 }
 0x2df   : >> { %446 = vadd.xlane.f32.xlu0 %v436_v62 }
 0x368   : >> { %v439_v63 = vpop.xlane.xlu0 %438 }
 0x369   : >> { %v440_v0 = vrot.slane %v439_v63, 4 }
 0x36b   : >> { %v441_v1 = vadd.f32 %v440_v0, %v439_v63 }
 0x36c   : >> { %v447_v2 = vpop.xlane.xlu0 %446 }
 0x36d   : >> { %v442_v3 = vrot.slane %v441_v1, 2  ;;  %v448_v4 = vrot.slane %v447_v2, 4 }
 0x36f   : >> { %v449_v5 = vadd.f32 %v448_v4, %v447_v2  ;;  %v443_v8 = vadd.f32 %v442_v3, %v441_v1 }
 0x371   : >> { %v450_v9 = vrot.slane %v449_v5, 2  ;;  %v444_v11 = vrot.slane %v443_v8, 1 }
 0x373   : >> { %v451_v10 = vadd.f32 %v450_v9, %v449_v5  ;;  %v445_v14 = vadd.f32 %v444_v11, %v443_v8 }
 0x375   : >> { %v452_v12 = vrot.slane %v451_v10, 1 }
 0x377   : >> { %v453_v13 = vadd.f32 %v452_v12, %v451_v10 }
 0x379   : >> { %1556 = vpush %v453_v13 }
 0x37a   : >> { %1558 = vpush %v445_v14 }
 0x3aa   : >> { %s1557_s20 = spop %1556 }
 0x3ab   : >> { %s1559_s15 = spop %1558 }
 0x3ac   : >> { %s456_s24 = smul.f32 1e-10, %s1559_s15 }
 0x3ae   : >> { %p457_p11 = scmp.le.f32.partialorder %s1557_s20, %s456_s24 }
 0x3b0   : >> { %p459_p12 = por %p458_p10, %p457_p11 }
 0x3b2   : > { %907 = sbr.rel (!%p459_p12) target bundleno = 278 (0x116), region = 473 }
 0x3b9 PF: > { %s912_s23 = smov [#allocation20]  ;;  %v916_v6 = vmov %v1761_v6  ;;  %v919_v7 = vmov %v1763_v7  ;;  %v967_v15 = vld [vmem:[#allocation12] sm:$0x3]  ;;  %v973_v16 = vld [vmem:[#allocation14] sm:$0x3]  ;;  %s2043_s17 = scalar_lea.vmem [#allocation13], %s1757_s28 }
 0x3ba   : > { %v936_v6 = vmov %v1761_v6  ;;  %v939_v7 = vmov %v1763_v7  ;;  %v920_v17 = vld [vmem:[%s912_s23] sm:$0x3]  ;;  %vm923_vm9 = vcmp.eq.s32.totalorder %v919_v7, %v916_v6  ;;  %969 = vst [vmem:[%s2043_s17] sm:$0x3] %v967_v15  ;;  %s2044_s27 = scalar_lea.vmem [#allocation15], %s1757_s28  ;;  %s932_s29 = smov [#allocation23] }
 0x3bb   : > { %vm943_vm10 = vcmp.eq.s32.totalorder %v939_v7, %v936_v6  ;;  %975 = vst [vmem:[%s2044_s27] sm:$0x3] %v973_v16  ;;  %v979_v18 = vld [vmem:[#allocation16] sm:$0x3]  ;;  %v924_v19 = vsel %vm923_vm9, %v920_v17, 0.0  ;;  %s2045_s16 = scalar_lea.vmem [#allocation17], %s1757_s28  ;;  %s2046_s30 = scalar_lea.vmem [#allocation19], %s1757_s28 }
 0x3bc   : > { %981 = vst [vmem:[%s2045_s16] sm:$0x3] %v979_v18  ;;  %v985_v20 = vld [vmem:[#allocation18] sm:$0x3]  ;;  %v925_v21 = vrot.slane %v924_v19, 4  ;;  %v940_v22 = vld [vmem:[%s932_s29] sm:$0x3] }
 0x3bd   : > { %987 = vst [vmem:[%s2046_s30] sm:$0x3] %v985_v20  ;;  %v944_v23 = vsel %vm943_vm10, %v940_v22, 0.0  ;;  %s908_s21 = sand.u32 7, %s1720_s12   ;;  %s2047_s11 = scalar_lea.vmem [#allocation9], %s1759_s18 }
 0x3be   : > { %v926_v24 = vadd.f32 %v925_v21, %v924_v19  ;;  %v945_v25 = vrot.slane %v944_v23, 4  ;;  %s909_s25 = scalar_lea.vmem [#allocation8], %s908_s21  ;;  %s911_s26 = scalar_lea.vmem [#allocation10], %s908_s21 }
 0x3bf   : > { %s913_s25 = smov %s909_s25  ;;  %s933_s26 = smov %s911_s26 }
 0x3c0   : > { %v927_v26 = vrot.slane %v926_v24, 2  ;;  %v946_v6 = vadd.f32 %v945_v25, %v944_v23  ;;  %s2048_s22 = scalar_lea.vmem [#allocation11], %s1759_s18  ;;  %s1015_s14 = sshrl.u32 (%p1734_p3), %s1720_s12, 3 }
 0x3c1   : > { %s2049_s20 = scalar_lea.vmem (%p1734_p3), [#allocation9], %s1759_s18  ;;  %s1544_s15 = sshll.u32 (%p1734_p3), %s1015_s14, 1 }
 0x3c2   : > { %v928_v7 = vadd.f32 %v927_v26, %v926_v24  ;;  %v947_v27 = vrot.slane %v946_v6, 2  ;;  %s1017_s17 = scalar_lea.vmem (%p1734_p3), %s2034_s4, %s1544_s15 }
 0x3c4   : > { %v929_v28 = vrot.slane %v928_v7, 1  ;;  %v948_v29 = vadd.f32 %v947_v27, %v946_v6 }
 0x3c6   : > { %v930_v30 = vadd.f32 %v929_v28, %v928_v7  ;;  %v949_v31 = vrot.slane %v948_v29, 1 }
 0x3c8   : > { %931 = vst [vmem:[%s913_s25] sm:$0x1] %v930_v30  ;;  %v950_v32 = vadd.f32 %v949_v31, %v948_v29 }
 0x3ca   : > { %951 = vst [vmem:[%s933_s26] sm:$0x1] %v950_v32 }
 0x3cc   : > { %1014 = sbr.rel (!%p1734_p3) target bundleno = 985 (0x3d9), region = 158 }
 0x3cf   : > { %v955_v33 = vld [vmem:[#allocation8] sm:$0x3] }
 0x3d0   : > { %957 = vst [vmem:[%s2047_s11] sm:$0x3] %v955_v33 }
 0x3d1   : > { %v961_v34 = vld [vmem:[#allocation10] sm:$0x3] }
 0x3d2   : > { %963 = vst [vmem:[%s2048_s22] sm:$0x3] %v961_v34 }
 0x3d7   : > { %v1033_v35 = vld [vmem:[%s2049_s20] sm:$0x3] }
 0x3d8   : > { %1034 = vst [vmem:[%s1017_s17] sm:$0x3] %v1033_v35 }
 0x3d9 PF: > { %1051 = sbr.rel (!%p1734_p3) target bundleno = 993 (0x3e1), region = 192  ;;  %s1052_s27 = sshrl.u32 (%p1734_p3), %s1720_s12, 3 }
 0x3da   : > { %s2050_s29 = scalar_lea.vmem (%p1734_p3), [#allocation11], %s1759_s18  ;;  %s1545_s16 = sshll.u32 (%p1734_p3), %s1052_s27, 1 }
 0x3db   : > { %s1054_s25 = scalar_lea.vmem (%p1734_p3), %s2035_s5, %s1545_s16 }
 0x3df   : > { %v1070_v36 = vld [vmem:[%s2050_s29] sm:$0x3] (%p1734_p3) }
 0x3e0   : > { %1071 = vst [vmem:[%s1054_s25] sm:$0x3] %v1070_v36 }
 0x3e1 PF: > { %s1546_s26 = sshll.u32 %s1720_s12, 1  ;;  %s2051_s19 = scalar_lea.vmem [#allocation13], %s1757_s28 }
 0x3e2   : > { %v1103_v37 = vld [vmem:[%s2051_s19] sm:$0x3]  ;;  %s2052_s11 = scalar_lea.vmem [#allocation15], %s1757_s28  ;;  %s1087_s14 = scalar_lea.vmem %s2036_s6, %s1546_s26 }
 0x3e3   : > { %v1136_v38 = vld [vmem:[%s2052_s11] sm:$0x3]  ;;  %s1120_s24 = scalar_lea.vmem %s2037_s7, %s1546_s26  ;;  %s2053_s23 = scalar_lea.vmem [#allocation17], %s1757_s28  ;;  %1104 = vst [vmem:[%s1087_s14] sm:$0x3] %v1103_v37 }
 0x3e4   : > { %v1169_v39 = vld [vmem:[%s2053_s23] sm:$0x3]  ;;  %s2054_s17 = scalar_lea.vmem [#allocation19], %s1757_s28  ;;  %1137 = vst [vmem:[%s1120_s24] sm:$0x3] %v1136_v38  ;;  %s1153_s29 = scalar_lea.vmem %s2038_s8, %s1546_s26 }
 0x3e5   : > { %v1202_v40 = vld [vmem:[%s2054_s17] sm:$0x3]  ;;  %s1186_s21 = scalar_lea.vmem %s2039_s9, %s1546_s26  ;;  %1170 = vst [vmem:[%s1153_s29] sm:$0x3] %v1169_v39 }
 0x3e6   : > { %1203 = vst [vmem:[%s1186_s21] sm:$0x3] %v1202_v40 }
 0x3e7 PF: > { %s2055_s25 = sld [smem:[#allocation33_spill]]  ;;  %p13_p13 = scmp.ge.s32.totalorder %s1723_s13, 4  }
 0x3e8   : > { %s2056_s30 = smov %s1637_s10  ;;  %s2058_s11 = smov %s1723_s13 }
 0x3e9   :  { %15 = sbr.rel (!%p13_p13) target bundleno = 2 (0x2), region = 484 }
 0x3ed   : > { %s2057_s10 = smov %s2055_s25 }

// kernel: custom-call.16
= control target key start
LH: loop header
LB: loop body
LE: loop exit
PB: predicated region body
PF: predicated region fallthrough
CT: control target
= control target key end

     0   :  { %s653_s9 = smov 0   ;;  %s655_s10 = smov 0   ;;  %s799_s0 = inlined_call_operand.vmem [shape: f32[2,3,3], index: 0, kind: input, shape index: {}]   ;;  %s800_s1 = inlined_call_operand.vmem [shape: f32[2,3,3], index: 1, kind: output, shape index: {0}]   ;;  %s801_s2 = inlined_call_operand.vmem [shape: f32[2,3], index: 2, kind: output, shape index: {1}]  }
   0x1   :  { %s657_s11 = smov 0   ;;  %s659_s12 = smov 0  }
   0x2   :  { %s661_s13 = smov 0  }
   0x3 LB: > { %s28_s14 = sadd.s32 1, %s626_s12  ;;  %s508_s15 = sadd.s32 4294967295, %s630_s13   ;;  %s630_s13 = sphi %s661_s13, %s9_s13   ;;  %s626_s12 = sphi %s659_s12, %s808_s12   ;;  %s622_s11 = sphi %s657_s11, %s807_s11   ;;  %s618_s10 = sphi %s655_s10, %s806_s10   ;;  %s614_s9 = sphi %s653_s9, %s805_s9  }
   0x4   : > { %p30_p0 = scmp.ge.s32.totalorder %s28_s14, 2  ;;  %s33_s16 = ssub.s32 0, %s626_s12 }
   0x5   : > { %s510_s17 = smin.u32 %s626_s12, %s33_s16  ;;  %p57_p1 = scmp.ne.s32.totalorder %s618_s10, %s614_s9 }
   0x6   : > { %s810_s14 = smov (%p30_p0, %s28_s14), 0  ;;  %s35_s18 = sshrl.u32 %s510_s17, 3 }
   0x7   : > { %s39_s19 = ssub.s32 0, %s810_s14  ;;  %p58_p2 = scmp.eq.s32.totalorder %s508_s15, 1 }
   0x8   : > { %s511_s20 = smin.u32 %s39_s19, %s810_s14  ;;  %s47_s24 = sadd.s32 1, %s618_s10 }
   0x9   : > { %s41_s21 = sshrl.u32 %s511_s20, 3  ;;  %p688_p3 = por %p58_p2, %p57_p1 }
   0xa   : > { %s44_s23 = ssub.s32 %s35_s18, %s41_s21  ;;  %p513_p5 = scmp.ge.s32.totalorder %s630_s13, 2 }
   0xb   : > { %p45_p4 = scmp.eq.s32.totalorder %s44_s23, 0  ;;  %s82_s26 = sand.u32 (!%p513_p5), 1, %s630_s13  }
   0xc   : > { %80 = sbr.rel (%p513_p5) target bundleno = 19 (0x13), region = 16  ;;  %s515_s27 = sshll.u32 (!%p513_p5), %s626_s12, 2 }
   0xd   : > { %s694_s25 = scalar_select %p45_p4, %s618_s10, %s47_s24  }
   0xe   : > { %s514_s28 = sshll.u32 (!%p513_p5), %s82_s26, 2  ;;  %s88_s3 = scalar_lea.vmem (!%p513_p5), %s799_s0, %s515_s27 }
   0xf   : > { %v104_v0 = vld [vmem:[%s88_s3] sm:$0xf] (!%p513_p5)  ;;  %s84_s4 = scalar_lea.vmem (!%p513_p5), [#allocation1], %s514_s28 }
  0x10   : > { %105 = vst [vmem:[%s84_s4] sm:$0xf] (!%p513_p5), %v104_v0 }
  0x13 PF: > { %p516_p6 = scmp.ge.s32.totalorder %s630_s13, 1  ;;  %p121_p7 = scmp.lt.s32.totalorder %s630_s13, 3 }
  0x15   : > { %p122_p8 = pnand %p516_p6, %p121_p7 }
  0x17   : > { %125 = sbr.rel (%p122_p8) target bundleno = 346 (0x15a), region = 50 }
  0x1e   : > { %s132_s5 = sand.u32 1, %s508_s15   ;;  %s142_s6 = sand.u32 1, %s614_s9   ;;  %v636_v2 = vmov 0.0  }
  0x1f   : > { %s517_s7 = sshll.u32 %s132_s5, 2  ;;  %s705_s8 = sshll.u32 %s142_s6, 1 }
  0x20   : > { %s134_s16 = scalar_lea.vmem [#allocation1], %s517_s7  ;;  %s155_s17 = sand.u32 7, %s622_s11  }
  0x21   : > { %v147_v1 = vld [vmem:[%s134_s16] sm:$0xf]  ;;  %s708_s18 = scalar_lea.vmem [#allocation4], %s155_s17  ;;  %s711_s19 = scalar_lea.vmem [#allocation3], %s517_s7 }
  0x22   : > { %148 = vst [vmem:[#allocation0] sm:$0xf] %v147_v1  ;;  %159 = vst [vmem:[%s708_s18] sm:$0x1] %v636_v2  ;;  %s144_s15 = scalar_lea.vmem [#allocation5], %s705_s8  ;;  %s714_s20 = smov 0  }
  0x29   : > { %v157_v3 = vld [vmem:[#allocation0] sm:$0xff] }
  0x2a   : > { %158 = vst [vmem:[#allocation2] sm:$0xff] %v157_v3 }
  0x2b LB: >> { %v167_v4 = vlaneseq  ;;  %v723_v6 = vstv %s634_s20  ;;  %s194_s9 = scalar_lea.vmem [#allocation2], %s634_s20  ;;  %s230_s21 = smov [#allocation2]  ;;  %v637_v60 = vmov 1.0   ;;  %v265_v61 = vld [vmem:[%s708_s18] ss:$0 sm:$0xff]  ;;  %s634_s20 = sphi %s714_s20, %s165_s20  }
  0x2c   : >> { %s252_s23 = scalar_lea.vmem [#allocation6], %s634_s20  ;;  %s268_s24 = smov [#allocation2] }
  0x2d   : >> { %v720_v5 = vshrl.u32 %v167_v4, 7  ;;  %v246_v49 = vand.u32 127, %v167_v4  ;;  %s269_s26 = smov [#allocation6] }
  0x2f   : >> { %vm171_vm0 = vcmp.gt.s32.totalorder %v720_v5, %v723_v6  ;;  %vm172_vm1 = vcmp.lt.s32.totalorder %v720_v5, 3  ;;  %v233_v5 = vmov %v720_v5  ;;  %vm738_vm12 = vcmp.eq.s32.totalorder %v246_v49, %v723_v6 }
  0x30   : >> { %vm173_vm2 = vmand %vm171_vm0, %vm172_vm1  ;;  %vm237_vm9 = vcmp.gt.s32.totalorder %v233_v5, %v723_v6  ;;  %vm238_vm10 = vcmp.lt.s32.totalorder %v233_v5, 3  ;;  %v272_v5 = vmov %v720_v5  ;;  %vm298_vm15 = vcmp.gt.s32.totalorder %v246_v49, %v723_v6 }
  0x31   : >> { %v166_v7 = vld [vmem:[#allocation2] sm:$0xff]  ;;  %v195_v16 = vld [vmem:[%s194_s9] ss:$0 sm:$0xff]  ;;  %vm239_vm11 = vmand %vm237_vm9, %vm238_vm10  ;;  %vm277_vm13 = vcmp.lt.s32.totalorder %v272_v5, 3  ;;  %v289_v5 = vmov %v720_v5 }
  0x32   : >> { %v174_v8 = vsel %vm173_vm2, %v166_v7, 0.0  ;;  %v196_v17 = vand.u32 2147483647, %v195_v16  ;;  %vm221_vm8 = vcmp.lt.f32.partialorder %v195_v16, 0.0  ;;  %v234_v46 = vld [vmem:[%s230_s21] sm:$0xff]  ;;  %vm306_vm14 = vcmp.ge.s32.totalorder %v289_v5, %v723_v6 }
  0x33   : >> { %v175_v9 = vmul.f32 %v174_v8, %v174_v8  ;;  %v240_v50 = vsel %vm239_vm11, %v234_v46, 0.0  ;;  %v275_v0 = vld [vmem:[%s268_s24] sm:$0xff]  ;;  %s285_s24 = smov %s268_s24  ;;  %vm307_vm0 = vmand %vm738_vm12, %vm306_vm14 }
  0x34   : >> { %v197_v22 = vmax.f32 %v196_v17, 0.0  ;;  %s310_s27 = scalar_lea.vmem %s285_s24, %s634_s20  ;;  %s165_s20 = sadd.s32 1, %s634_s20  }
  0x35   : >> { %v176_v10 = vrot.slane %v175_v9, 4  ;;  %p162_p9 = scmp.ge.s32.totalorder %s165_s20, 3  }
  0x36   : > { %s523_s28 = sshll.u32 (%p162_p9), %s622_s11, 2 }
  0x37   : >> { %v177_v11 = vadd.f32 %v176_v10, %v175_v9  ;;  %s341_s3 = scalar_lea.vmem (%p162_p9), %s800_s1, %s523_s28 }
  0x39   : >> { %v178_v12 = vrot.slane %v177_v11, 2 }
  0x3b   : >> { %v179_v13 = vadd.f32 %v178_v12, %v177_v11 }
  0x3d   : >> { %v180_v14 = vrot.slane %v179_v13, 1 }
  0x3f   : >> { %v181_v15 = vadd.f32 %v180_v14, %v179_v13  ;;  %v296_v14 = vld [vmem:[%s285_s24] sm:$0xff] }
  0x41   : >> { %578 = vrsqrt.f32 %v181_v15  ;;  %vm184_vm3 = vcmp.eq.f32.partialorder %v181_v15, inf  ;;  %v187_v19 = vand.u32 2147483648, %v181_v15  ;;  %vm186_vm4 = vcmp.eq.f32.partialorder %v181_v15, 0.0 }
  0x4b   : >> { %v579_v18 = vpop.eup %578 }
  0x4c   : >> { %v183_v20 = vmul.f32 %v579_v18, %v181_v15 }
  0x4e   : >> { %v185_v21 = vsel %vm184_vm3, %v181_v15, %v183_v20 }
  0x4f   : >> { %v188_v23 = vsel %vm186_vm4, %v187_v19, %v185_v21 }
  0x50   : >> { %v198_v24 = vand.u32 2147483647, %v188_v23 }
  0x52   : >> { %v199_v25 = vmax.f32 %v197_v22, %v198_v24 }
  0x54   : >> { %580 = vrcp.f32 %v199_v25  ;;  %vm211_vm7 = vcmp.eq.f32.partialorder %v199_v25, 0.0 }
  0x5e   : >> { %v581_v26 = vpop.eup %580 }
  0x5f   : >> { %v201_v27 = vmul.f32 %v581_v26, %v196_v17  ;;  %v204_v28 = vmul.f32 0.0, %v581_v26  ;;  %v208_v29 = vmul.f32 %v581_v26, %v198_v24 }
  0x61   : >> { %v202_v30 = vmul.f32 %v201_v27, %v201_v27  ;;  %v205_v31 = vmul.f32 %v204_v28, %v204_v28  ;;  %v209_v32 = vmul.f32 %v208_v29, %v208_v29 }
  0x63   : >> { %v206_v33 = vadd.f32 %v205_v31, %v202_v30 }
  0x65   : >> { %v210_v34 = vadd.f32 %v209_v32, %v206_v33 }
  0x67   : >> { %582 = vrsqrt.f32 %v210_v34  ;;  %vm214_vm5 = vcmp.eq.f32.partialorder %v210_v34, inf  ;;  %v217_v36 = vand.u32 2147483648, %v210_v34  ;;  %vm216_vm6 = vcmp.eq.f32.partialorder %v210_v34, 0.0 }
  0x71   : >> { %v583_v35 = vpop.eup %582 }
  0x72   : >> { %v213_v37 = vmul.f32 %v583_v35, %v210_v34 }
  0x74   : >> { %v215_v38 = vsel %vm214_vm5, %v210_v34, %v213_v37 }
  0x75   : >> { %v218_v39 = vsel %vm216_vm6, %v217_v36, %v215_v38 }
  0x76   : >> { %v219_v40 = vmul.f32 %v218_v39, %v199_v25 }
  0x78   : >> { %v220_v41 = vsel %vm211_vm7, 0.0, %v219_v40 }
  0x79   : >> { %v222_v42 = vxor.u32 2147483648, %v220_v41 }
  0x7b   : >> { %v223_v43 = vsel %vm221_vm8, %v220_v41, %v222_v42 }
  0x7c   : >> { %v731_v44 = vsel %vm186_vm4, %v195_v16, %v223_v43  ;;  %584 = vrcp.f32 %v223_v43  ;;  %v224_v47 = vsub.f32 %v223_v43, %v195_v16 }
  0x7d   : >> { %v229_v45 = vsub.f32 %v195_v16, %v731_v44 }
  0x7f   : >> { %586 = vrcp.f32 %v229_v45 }
  0x86   : >> { %v585_v48 = vpop.eup %584 }
  0x87   : >> { %v226_v51 = vmul.f32 %v585_v48, %v224_v47 }
  0x89   : >> { %v587_v52 = vpop.eup %586  ;;  %v228_v56 = vsel %vm186_vm4, 0.0, %v226_v51 }
  0x8a   : >> { %v242_v53 = vmul.f32 %v587_v52, %v240_v50  ;;  %v258_v58 = vsel %vm738_vm12, %v228_v56, 0.0 }
  0x8c   : >> { %v243_v55 = vsel %vm186_vm4, 0.0, %v242_v53 }
  0x8d   : >> { %v248_v57 = vsel %vm738_vm12, %v243_v55, 0.0 }
  0x8e   : >> { %249 = vadd.xlane.f32.xlu0 %v248_v57 }
  0x92   : >> { %259 = vadd.xlane.f32.xlu0 %v258_v58 }
 0x11b   : >> { %v250_v59 = vpop.xlane.xlu0 %249 }
 0x11c   : >> { %251 = vst [vmem:[#allocation6] sm:$0xff] %v250_v59 }
 0x11d   : >> { %253 = vst [vmem:[%s252_s23] sm:$0x1] %v637_v60 }
 0x11f   : >> { %v260_v62 = vpop.xlane.xlu0 %259 }
 0x120   : >> { %v266_v63 = vsel %vm738_vm12, %v260_v62, %v265_v61 }
 0x121   : >> { %267 = vst [vmem:[%s708_s18] sm:$0x1] %v266_v63 }
 0x124   : >> { %v274_v1 = vld [vmem:[%s269_s26] sm:$0xff]  ;;  %s286_s26 = smov %s269_s26 }
 0x125   : >> { %v276_v2 = vmul.f32 %v275_v0, %v274_v1  ;;  %v294_v13 = vld [vmem:[%s286_s26] sm:$0xff] }
 0x127   : >> { %v278_v3 = vsel %vm277_vm13, %v276_v2, 0.0 }
 0x128   : >> { %v279_v4 = vrot.slane %v278_v3, 4  ;;  %v327_v6 = vld [vmem:[#allocation4] sm:$0x3] (%p162_p9) }
 0x129   : > { %329 = vst [vmem:[%s144_s15] sm:$0x3] (%p162_p9), %v327_v6 }
 0x12a   : >> { %v280_v7 = vadd.f32 %v279_v4, %v278_v3 }
 0x12c   : >> { %v281_v8 = vrot.slane %v280_v7, 2 }
 0x12e   : >> { %v282_v9 = vadd.f32 %v281_v8, %v280_v7 }
 0x130   : >> { %v283_v10 = vrot.slane %v282_v9, 1 }
 0x132   : >> { %v284_v11 = vadd.f32 %v283_v10, %v282_v9 }
 0x134   : >> { %v290_v12 = vmul.f32 %v284_v11, %v260_v62 }
 0x136   : >> { %v295_v15 = vmul.f32 %v294_v13, %v290_v12 }
 0x138   : >> { %v299_v16 = vsub.f32 %v296_v14, %v295_v15 }
 0x13a   : >> { %v300_v17 = vsel %vm298_vm15, %v299_v16, %v296_v14 }
 0x13b   : >> { %v308_v18 = vsel %vm307_vm0, %v294_v13, %v300_v17 }
 0x13c   : >> { %309 = vst [vmem:[%s285_s24] sm:$0xff] %v308_v18 }
 0x13f   : > { %164 = sbr.rel (!%p162_p9) target bundleno = 43 (0x2b), region = 167 }
 0x143   : >> { %v311_v19 = vld [vmem:[%s310_s27] ss:$0 sm:$0xff] }
 0x144   : >> { %v316_v20 = vsel %vm738_vm12, %v731_v44, %v311_v19 }
 0x145   : >> { %317 = vst [vmem:[%s310_s27] sm:$0x1] %v316_v20 }
 0x146   : > { %p376_p10 = scmp.lt.s32.totalorder (%p688_p3), %s622_s11, 0  ;;  %s377_s4 = ssub.s32 (%p688_p3), 0, %s622_s11  ;;  %v399_v22 = vld [vmem:[%s144_s15] sm:$0x3] (%p688_p3) }
 0x147   : > { %s524_s5 = smin.u32 (%p688_p3), %s622_s11, %s377_s4 }
 0x148   : > { %s379_s6 = sshrl.u32 (%p688_p3), %s524_s5, 3 }
 0x149   : > { %s380_s7 = ssub.s32 (%p688_p3), 0, %s379_s6 }
 0x14c   : > { %v321_v5 = vld [vmem:[#allocation2] sm:$0xf] }
 0x14d   : > { %323 = vst [vmem:[%s711_s19] sm:$0xf] %v321_v5 }
 0x14f   : > { %375 = sbr.rel (!%p688_p3) target bundleno = 346 (0x15a), region = 91 }
 0x154   : > { %v357_v21 = vld [vmem:[%s711_s19] sm:$0xf] }
 0x155   : > { %358 = vst [vmem:[%s341_s3] sm:$0xf] %v357_v21 }
 0x156   : > { %s812_s7 = smov (!%p376_p10, %s380_s7), %s379_s6 }
 0x157   : > { %s525_s16 = sshll.u32 %s812_s7, 1 }
 0x158   : > { %s383_s19 = scalar_lea.vmem %s801_s2, %s525_s16 }
 0x159   : > { %400 = vst [vmem:[%s383_s19] sm:$0x3] %v399_v22 }
 0x15a PF: > { %s9_s13 = sadd.s32 1, %s630_s13   ;;  %s805_s9 = smov %s618_s10 }
 0x15b   : > { %p6_p11 = scmp.ge.s32.totalorder %s9_s13, 4   ;;  %s806_s10 = smov %s694_s25 }
 0x15c   : > { %s807_s11 = smov %s626_s12  ;;  %s808_s12 = smov %s810_s14 }
 0x15d   :  { %8 = sbr.rel (!%p6_p11) target bundleno = 3 (0x3), region = 178 }

// kernel: neg.23
= control target key start
LH: loop header
LB: loop body
LE: loop exit
PB: predicated region body
PF: predicated region fallthrough
CT: control target
= control target key end

     0   :  { %2 = vsyncpa [#allocation1], 0  ;;  %s70_s0 = inlined_call_operand.vmem [shape: f32[2,3], index: 0, kind: input, shape index: {}]   ;;  %s71_s1 = inlined_call_operand.hbm [shape: f32[2,3], index: 1, kind: output, shape index: {}]  }
   0x1   :  { %v3_v0 = vld [vmem:[%s70_s0] sm:$0x3]  ;;  %s44_s0 = smov [#allocation0]  }
   0x2   :  { %v6_v1 = vxor.u32 2147483648, %v3_v0  ;;  %s13_s8 = sshll.u32 %s44_s0, 4  ;;  %s14_s8 = int_to_ptr.vmem [resolvable:$true] %s13_s8 }
   0x3   :  { %s20_s9 = scalar_lea.vmem %s14_s8, 32  ;;  %p25_p1 = scmp.lt.s32.totalorder %s14_s8, %s14_s8 }
   0x4   :  { %8 = vst [vmem:[#allocation0] sm:$0x3] %v6_v1  ;;  %p21_p0 = scmp.ne.s32.totalorder %s14_s8, %s20_s9  ;;  %p26_p2 = scmp.lt.s32.totalorder %s20_s9, %s20_s9 }
   0x6   :  { %p27_p3 = por %p26_p2, %p25_p1 }
   0x8   :  { %p28_p4 = pnand %p27_p3, %p21_p0 }
   0xa   :  { %31 = shalt.err (!%p28_p4)
}
   0xb   :  { %s32_s12 = scalar_lea.hbm %s71_s1, 32 }
   0xc   :  { %p33_p5 = scmp.ne.s32.totalorder %s71_s1, %s32_s12  ;;  %p36_p6 = scmp.lt.u32.totalorder %s32_s12, %s71_s1 }
   0xe   :  { %p38_p7 = pnand %p36_p6, %p33_p5 }
  0x10   :  { %41 = shalt.err (!%p38_p7)
}
  0x11   :  { %16 = dma.vmem_to_hbm [thread:$0]  %s14_s8, 32, %s71_s1, [#allocation1]  }
  0x12   :  { %42 = dma.done.wait [#allocation1], 32  }
  0x13   :  { %43 = vsyncadd [#allocation1], 4294967264 }
  0x14   :  { %18 = vsyncpa [#allocation1], 1 }

// kernel: icp_forward.19
= control target key start
LH: loop header
LB: loop body
LE: loop exit
PB: predicated region body
PF: predicated region fallthrough
CT: control target
= control target key end

     0   :  { %11 = vsyncpa [#allocation3], 0  ;;  %s2292_s0 = inlined_call_operand.vmem [shape: f32[2,3,128], index: 0, kind: input, shape index: {}]   ;;  %s2293_s1 = inlined_call_operand.vmem [shape: f32[2,3,128], index: 1, kind: input, shape index: {}]   ;;  %s2294_s2 = inlined_call_operand.vmem [shape: f32[2,3,3], index: 2, kind: output, shape index: {0}]   ;;  %s2295_s3 = inlined_call_operand.vmem [shape: f32[2,3,1], index: 3, kind: output, shape index: {1}]   ;;  %s2296_s4 = inlined_call_operand.vmem [shape: f32[2,1,3], index: 4, kind: output, shape index: {2}]   ;;  %s2297_s5 = inlined_call_operand.hbm [shape: f32[2,1,1], index: 5, kind: output, shape index: {3}]  }
   0x1   :  { %13 = vsyncpa [#allocation3 + $0x1], 0  ;;  %s1775_s18 = smov 0   ;;  %s1777_s19 = smov 0  }
   0x2   :  { %s1779_s20 = smov 0   ;;  %s1781_s21 = smov 0  }
   0x3   :  { %s1783_s22 = smov 0   ;;  %s1785_s23 = smov 0  }
   0x4 LB: > { %s1377_s24 = sadd.s32 4294967295, %s1738_s23   ;;  %s1378_s25 = sadd.s32 4294967294, %s1738_s23   ;;  %s1738_s23 = sphi %s1785_s23, %s19_s23   ;;  %s1734_s22 = sphi %s1783_s22, %s2304_s22   ;;  %s1730_s21 = sphi %s1781_s21, %s2303_s21   ;;  %s1726_s20 = sphi %s1779_s20, %s2302_s20   ;;  %s1722_s19 = sphi %s1777_s19, %s2301_s19   ;;  %s1718_s18 = sphi %s1775_s18, %s2300_s18  }
   0x5   : > { %s31_s26 = sadd.s32 1, %s1734_s22  ;;  %s170_s27 = sadd.s32 1, %s1726_s20 }
   0x6   : > { %p33_p0 = scmp.ge.s32.totalorder %s31_s26, 2  ;;  %p180_p1 = scmp.ne.s32.totalorder %s1726_s20, %s1722_s19 }
   0x7   : > { %p181_p2 = scmp.eq.s32.totalorder %s1377_s24, 1  ;;  %p186_p3 = scmp.ne.s32.totalorder %s1722_s19, %s1718_s18 }
   0x8   : > { %s2306_s26 = smov (%p33_p0, %s31_s26), 0  ;;  %p187_p5 = scmp.eq.s32.totalorder %s1378_s25, 1 }
   0x9   : > { %p1815_p4 = por %p181_p2, %p180_p1  ;;  %s167_s29 = ssub.s32 %s1734_s22, %s2306_s26 }
   0xa   : > { %p1381_p6 = scmp.ge.s32.totalorder %s1738_s23, 1  ;;  %p168_p7 = scmp.eq.s32.totalorder %s167_s29, 0 }
   0xb   : > { %p1822_p8 = por %p187_p5, %p186_p3  ;;  %p222_p9 = scmp.lt.s32.totalorder %s1738_s23, 3 }
   0xc   : > { %s1828_s6 = scalar_select %p168_p7, %s1726_s20, %s170_s27  }
   0xd   : > { %p223_p10 = pnand %p1381_p6, %p222_p9 }
   0xe   : > { %p266_p11 = scmp.lt.s32.totalorder (!%p223_p10), %s1730_s21, 1  ;;  %vm384_vm0 = vcmask (!%p223_p10), 1042432   ;;  %vm335_vm1 = vcmask (!%p223_p10), 23552   ;;  %v589_v59 = vlaneseq (!%p223_p10)  ;;  %s264_s15 = sand.u32 (!%p223_p10), 1, %s1722_s19  }
   0xf   : > { %226 = sbr.rel (%p223_p10) target bundleno = 1309 (0x51d), region = 28  ;;  %s2128_s16 = scalar_lea.vmem (!%p223_p10), [#allocation2], %s264_s15 }
  0x10   : > { %v1910_v60 = vand.u32 (!%p223_p10), 127, %v589_v59  ;;  %s1232_s13 = sshll.u32 (!%p223_p10), %s2128_s16, 4  ;;  %s1233_s13 = int_to_ptr.vmem [resolvable:$true] %s1232_s13 }
  0x11   : > { %s1660_s27 = scalar_lea.vmem (!%p223_p10), %s1233_s13, 16 }
  0x12   : > { %p1661_p12 = scmp.ne.s32.totalorder (!%p223_p10), %s1233_s13, %s1660_s27 }
  0x14   : > { %p1662_p13 = pnand (!%p223_p10), %p1661_p12, %p1815_p4 }
  0x16   : > { %s1832_s7 = scalar_select %p266_p11, %s1730_s21, 1 }
  0x17   : > { %p1663_p0 = pneg %p1662_p13 }
  0x18   : > { %s1835_s8 = sshll.u32 %s1832_s7, 2  ;;  %s2193_s25 = scalar_lea.vmem %s2296_s4, %s1832_s7 }
  0x19   : > { %s1841_s11 = scalar_lea.vmem %s2292_s0, %s1835_s8  ;;  %s276_s14 = scalar_lea.vmem %s2293_s1, %s1835_s8 }
  0x1a   : > { %v1844_v0 = vld [vmem:[%s1841_s11] sm:$0x7]  ;;  %s2204_s9 = scalar_lea.vmem %s2294_s2, %s1835_s8  ;;  %s284_s12 = scalar_lea.vmem %s2295_s3, %s1835_s8 }
  0x1b   : > { %v302_v1 = vadd.f32 %v1844_v0, %v1844_v0  ;;  %v301_v2 = vld [vmem:[%s276_s14] sm:$0x7]  ;;  %s1744_s8 = smov [#allocation2]  }
  0x1c   : > { %1489 = vmatprep.subr.msk.mxu0 %vm384_vm0, %v301_v2  ;;  %1515 = vmatprep.subr.mxu1 %v301_v2  ;;  %v533_v19 = vmul.f32 %v301_v2, %v301_v2  ;;  %s1664_s29 = sshll.u32 %s1744_s8, 4  ;;  %s1665_s29 = int_to_ptr.vmem [resolvable:$false] %s1664_s29 }
  0x1d   : > { %303 = vxpose.xlu0.b32.start.end [1/1] (short) %v302_v1, 128  ;;  %1490 = vmatpush3.msk.msra.mxu0 %vm384_vm0, %v301_v2  ;;  %s1666_s7 = scalar_lea.vmem %s1665_s29, 32  ;;  %p1667_p1 = scmp.lt.s32.totalorder %s1233_s13, %s1665_s29 }
  0x1e   : > { %1516 = vmatpush3.xpose.msra.mxu1 %v301_v2  ;;  %v534_v20 = vsel %vm384_vm0, %v533_v19, 0.0  ;;  %p1668_p2 = scmp.lt.s32.totalorder %s1666_s7, %s1660_s27 }
  0x1f   : > { %v535_v21 = vrot.slane %v534_v20, 4 }
  0x20   : > { %p1669_p3 = por %p1668_p2, %p1667_p1 }
  0x21   : > { %v536_v22 = vadd.f32 %v535_v21, %v534_v20 }
  0x22   : > { %p1670_p5 = pnand %p1669_p3, %p1663_p0 }
  0x23   : > { %v537_v23 = vrot.slane %v536_v22, 2 }
  0x25   : > { %v538_v24 = vadd.f32 %v537_v23, %v536_v22 }
  0x27   : > { %v539_v25 = vrot.slane %v538_v24, 1 }
  0x29   : > { %v540_v26 = vadd.f32 %v539_v25, %v538_v24 }
  0x9d   : > { %v319_v3 = vpop.trf.xlu0 }
  0x9e   : > { %1491 = vmatprep.mubr.msk.f32.mxu0 %vm335_vm1, %v319_v3 }
  0xa1   : > { %v320_v4 = vpop.trf.xlu0 }
  0xa2   : > { %1492 = vmatmul.mubr.msk.f32.vlgmr.msra.gmra.mrb[0].mxu0 %vm335_vm1, %v320_v4 }
  0xa5   : > { %v321_v5 = vpop.trf.xlu0 }
  0xa6   : > { %1494 = vmatprep.mubr.msk.f32.mxu0 %vm335_vm1, %v321_v5 }
  0xa9   : > { %v322_v6 = vpop.trf.xlu0 }
  0xaa   : > { %1495 = vmatmul.mubr.msk.f32.gmra.mrb[2].mxu0 %vm335_vm1, %v322_v6 }
  0xad   : > { %v323_v7 = vpop.trf.xlu0 }
  0xae   : > { %1497 = vmatprep.mubr.msk.f32.mxu0 %vm335_vm1, %v323_v7 }
  0xb1   : > { %v324_v8 = vpop.trf.xlu0 }
  0xb2   : > { %1498 = vmatmul.mubr.msk.f32.gmra.mrb[4].mxu0 %vm335_vm1, %v324_v8 }
  0xb5   : > { %v325_v9 = vpop.trf.xlu0 }
  0xb6   : > { %1500 = vmatprep.mubr.msk.f32.mxu0 %vm335_vm1, %v325_v9 }
  0xb9   : > { %v326_v10 = vpop.trf.xlu0 }
  0xba   : > { %1501 = vmatmul.mubr.msk.f32.gmra.mrb[6].mxu0 %vm335_vm1, %v326_v10 }
  0xbd   : > { %v327_v11 = vpop.trf.xlu0 }
  0xbe   : > { %1503 = vmatprep.mubr.msk.f32.mxu0 %vm335_vm1, %v327_v11 }
  0xc1   : > { %v328_v12 = vpop.trf.xlu0 }
  0xc2   : > { %1504 = vmatmul.mubr.msk.f32.gmra.mrb[8].mxu0 %vm335_vm1, %v328_v12 }
  0xc5   : > { %v329_v13 = vpop.trf.xlu0 }
  0xc6   : > { %1506 = vmatprep.mubr.msk.f32.mxu0 %vm335_vm1, %v329_v13 }
  0xc9   : > { %v330_v14 = vpop.trf.xlu0 }
  0xca   : > { %1507 = vmatmul.mubr.msk.f32.gmra.mrb[10].mxu0 %vm335_vm1, %v330_v14 }
  0xcd   : > { %v331_v15 = vpop.trf.xlu0 }
  0xce   : > { %1509 = vmatprep.mubr.msk.f32.mxu0 %vm335_vm1, %v331_v15 }
  0xd1   : > { %v332_v16 = vpop.trf.xlu0 }
  0xd2   : > { %1510 = vmatmul.mubr.msk.f32.gmra.mrb[12].mxu0 %vm335_vm1, %v332_v16 }
  0xd5   : > { %v333_v17 = vpop.trf.xlu0 }
  0xd6   : > { %1512 = vmatprep.mubr.msk.f32.mxu0 %vm335_vm1, %v333_v17 }
  0xd9   : > { %v334_v18 = vpop.trf.xlu0 }
  0xda   : > { %1513 = vmatmul.mubr.msk.f32.gmra.mrb[14].mxu0 %vm335_vm1, %v334_v18 }
 0x175   : > { %v1493_v27 = vpop.f32.mrb[0].mxu0 }
 0x176   : > { %v542_v28 = vsub.f32 %v1493_v27, %v540_v26  ;;  %v454_v29 = vpop.f32.mrb[1].mxu0 }
 0x177   : > { %v541_v30 = vsub.f32 %v454_v29, %v540_v26 }
 0x178   : > { %559 = vmax.xlane.f32.xlu1 %v542_v28 }
 0x179   : > { %557 = vmax.xlane.f32.xlu0 %v541_v30 }
 0x17d   : > { %v1496_v31 = vpop.f32.mrb[2].mxu0 }
 0x17e   : > { %v544_v32 = vsub.f32 %v1496_v31, %v540_v26  ;;  %v464_v33 = vpop.f32.mrb[3].mxu0 }
 0x17f   : > { %v1871_v34 = vsub.f32 %v464_v33, %v540_v26 }
 0x180   : > { %563 = vmax.xlane.f32.xlu1 %v544_v32 }
 0x184   : > { %561 = vmax.xlane.f32.xlu1 %v1871_v34 }
 0x185   : > { %v1499_v35 = vpop.f32.mrb[4].mxu0 }
 0x186   : > { %v1874_v36 = vsub.f32 %v1499_v35, %v540_v26  ;;  %v474_v37 = vpop.f32.mrb[5].mxu0 }
 0x187   : > { %v1876_v38 = vsub.f32 %v474_v37, %v540_v26 }
 0x188   : > { %567 = vmax.xlane.f32.xlu1 %v1874_v36 }
 0x18c   : > { %565 = vmax.xlane.f32.xlu1 %v1876_v38 }
 0x18d   : > { %v1502_v39 = vpop.f32.mrb[6].mxu0 }
 0x18e   : > { %v1880_v40 = vsub.f32 %v1502_v39, %v540_v26  ;;  %v484_v41 = vpop.f32.mrb[7].mxu0 }
 0x18f   : > { %v1882_v42 = vsub.f32 %v484_v41, %v540_v26 }
 0x190   : > { %571 = vmax.xlane.f32.xlu1 %v1880_v40 }
 0x194   : > { %569 = vmax.xlane.f32.xlu1 %v1882_v42 }
 0x195   : > { %v1505_v43 = vpop.f32.mrb[8].mxu0 }
 0x196   : > { %v1886_v44 = vsub.f32 %v1505_v43, %v540_v26  ;;  %v494_v45 = vpop.f32.mrb[9].mxu0 }
 0x197   : > { %v1888_v46 = vsub.f32 %v494_v45, %v540_v26 }
 0x198   : > { %575 = vmax.xlane.f32.xlu1 %v1886_v44 }
 0x19c   : > { %573 = vmax.xlane.f32.xlu1 %v1888_v46 }
 0x19d   : > { %v1508_v47 = vpop.f32.mrb[10].mxu0 }
 0x19e   : > { %v1892_v48 = vsub.f32 %v1508_v47, %v540_v26  ;;  %v504_v49 = vpop.f32.mrb[11].mxu0 }
 0x19f   : > { %v1894_v50 = vsub.f32 %v504_v49, %v540_v26 }
 0x1a0   : > { %579 = vmax.xlane.f32.xlu1 %v1892_v48 }
 0x1a4   : > { %577 = vmax.xlane.f32.xlu1 %v1894_v50 }
 0x1a5   : > { %v1511_v51 = vpop.f32.mrb[12].mxu0 }
 0x1a6   : > { %v1898_v52 = vsub.f32 %v1511_v51, %v540_v26  ;;  %v514_v53 = vpop.f32.mrb[13].mxu0 }
 0x1a7   : > { %v1900_v54 = vsub.f32 %v514_v53, %v540_v26 }
 0x1a8   : > { %583 = vmax.xlane.f32.xlu1 %v1898_v52 }
 0x1ac   : > { %581 = vmax.xlane.f32.xlu1 %v1900_v54 }
 0x1ad   : > { %v1514_v55 = vpop.f32.mrb[14].mxu0 }
 0x1ae   : > { %v1904_v56 = vsub.f32 %v1514_v55, %v540_v26  ;;  %v524_v57 = vpop.f32.mrb[15].mxu0 }
 0x1af   : > { %v1906_v58 = vsub.f32 %v524_v57, %v540_v26 }
 0x1b1   : > { %585 = vmax.xlane.f32.xlu1 %v1906_v58 }
 0x1b5   : > { %587 = vmax.xlane.f32.xlu1 %v1904_v56 }
 0x205   : > { %v560_v61 = vpop.xlane.xlu1 %559 }
 0x206   : > { %vm592_vm2 = vcmp.eq.f32.partialorder %v542_v28, %v560_v61  ;;  %v558_v62 = vpop.xlane.xlu0 %557 }
 0x207   : > { %v1913_v63 = vsel %vm592_vm2, %v1910_v60, 128  ;;  %vm591_vm3 = vcmp.eq.f32.partialorder %v541_v30, %v558_v62  ;;  %v1174_v8 = vadd.f32 %v560_v61, %v558_v62 }
 0x208   : > { %v1916_v1 = vsel %vm591_vm3, %v1910_v60, 128  ;;  %v638_v2 = vshra.s32 %v1913_v63, 16 }
 0x209   : > { %v624_v4 = vshra.s32 %v1916_v1, 16 }
 0x20a   : > { %v1919_v3 = vcvt.s32.f32 %v638_v2 }
 0x20b   : > { %v1923_v6 = vcvt.s32.f32 %v624_v4 }
 0x20c   : > { %641 = vmin.xlane.f32.xlu1 %v1919_v3 }
 0x20d   : > { %v564_v5 = vpop.xlane.xlu1 %563 }
 0x20e   : > { %vm594_vm4 = vcmp.eq.f32.partialorder %v544_v32, %v564_v5 }
 0x20f   : > { %v1926_v7 = vsel %vm594_vm4, %v1910_v60, 128 }
 0x210   : > { %627 = vmin.xlane.f32.xlu1 %v1923_v6  ;;  %v666_v9 = vshra.s32 %v1926_v7, 16 }
 0x211   : > { %v562_v10 = vpop.xlane.xlu1 %561 }
 0x212   : > { %vm593_vm5 = vcmp.eq.f32.partialorder %v1871_v34, %v562_v10  ;;  %v1175_v11 = vadd.f32 %v1174_v8, %v562_v10  ;;  %v1931_v12 = vcvt.s32.f32 %v666_v9 }
 0x213   : > { %v1934_v13 = vsel %vm593_vm5, %v1910_v60, 128 }
 0x214   : > { %669 = vmin.xlane.f32.xlu1 %v1931_v12  ;;  %v652_v14 = vshra.s32 %v1934_v13, 16  ;;  %v1176_v15 = vadd.f32 %v1175_v11, %v564_v5 }
 0x215   : > { %v568_v16 = vpop.xlane.xlu1 %567 }
 0x216   : > { %vm596_vm6 = vcmp.eq.f32.partialorder %v1874_v36, %v568_v16  ;;  %v1939_v17 = vcvt.s32.f32 %v652_v14 }
 0x217   : > { %v1942_v18 = vsel %vm596_vm6, %v1910_v60, 128 }
 0x218   : > { %655 = vmin.xlane.f32.xlu1 %v1939_v17  ;;  %v694_v19 = vshra.s32 %v1942_v18, 16 }
 0x219   : > { %v566_v20 = vpop.xlane.xlu1 %565 }
 0x21a   : > { %vm595_vm7 = vcmp.eq.f32.partialorder %v1876_v38, %v566_v20  ;;  %v1177_v21 = vadd.f32 %v1176_v15, %v566_v20  ;;  %v1947_v22 = vcvt.s32.f32 %v694_v19 }
 0x21b   : > { %v1950_v23 = vsel %vm595_vm7, %v1910_v60, 128 }
 0x21c   : > { %697 = vmin.xlane.f32.xlu1 %v1947_v22  ;;  %v680_v24 = vshra.s32 %v1950_v23, 16  ;;  %v1178_v25 = vadd.f32 %v1177_v21, %v568_v16 }
 0x21d   : > { %v572_v26 = vpop.xlane.xlu1 %571 }
 0x21e   : > { %vm598_vm8 = vcmp.eq.f32.partialorder %v1880_v40, %v572_v26  ;;  %v1955_v27 = vcvt.s32.f32 %v680_v24 }
 0x21f   : > { %v1958_v28 = vsel %vm598_vm8, %v1910_v60, 128 }
 0x220   : > { %683 = vmin.xlane.f32.xlu1 %v1955_v27  ;;  %v722_v29 = vshra.s32 %v1958_v28, 16 }
 0x221   : > { %v570_v30 = vpop.xlane.xlu1 %569 }
 0x222   : > { %vm597_vm9 = vcmp.eq.f32.partialorder %v1882_v42, %v570_v30  ;;  %v1179_v31 = vadd.f32 %v1178_v25, %v570_v30  ;;  %v1963_v32 = vcvt.s32.f32 %v722_v29 }
 0x223   : > { %v1966_v33 = vsel %vm597_vm9, %v1910_v60, 128 }
 0x224   : > { %725 = vmin.xlane.f32.xlu1 %v1963_v32  ;;  %v708_v34 = vshra.s32 %v1966_v33, 16  ;;  %v1180_v35 = vadd.f32 %v1179_v31, %v572_v26  ;;  %v637_v26 = vand.u32 65535, %v1913_v63 }
 0x225   : > { %v576_v36 = vpop.xlane.xlu1 %575 }
 0x226   : > { %vm600_vm10 = vcmp.eq.f32.partialorder %v1886_v44, %v576_v36  ;;  %v1971_v37 = vcvt.s32.f32 %v708_v34  ;;  %v639_v30 = vcvt.s32.f32 %v637_v26 }
 0x227   : > { %v1974_v38 = vsel %vm600_vm10, %v1910_v60, 128 }
 0x228   : > { %711 = vmin.xlane.f32.xlu1 %v1971_v37  ;;  %v750_v39 = vshra.s32 %v1974_v38, 16 }
 0x229   : > { %v574_v40 = vpop.xlane.xlu1 %573 }
 0x22a   : > { %vm599_vm11 = vcmp.eq.f32.partialorder %v1888_v46, %v574_v40  ;;  %v1181_v41 = vadd.f32 %v1180_v35, %v574_v40  ;;  %v1979_v42 = vcvt.s32.f32 %v750_v39 }
 0x22b   : > { %v1982_v43 = vsel %vm599_vm11, %v1910_v60, 128 }
 0x22c   : > { %753 = vmin.xlane.f32.xlu1 %v1979_v42  ;;  %v736_v44 = vshra.s32 %v1982_v43, 16  ;;  %v1182_v45 = vadd.f32 %v1181_v41, %v576_v36  ;;  %v665_v36 = vand.u32 65535, %v1926_v7  ;;  %v693_v7 = vand.u32 65535, %v1942_v18 }
 0x22d   : > { %v580_v47 = vpop.xlane.xlu1 %579  ;;  %v721_v18 = vand.u32 65535, %v1958_v28  ;;  %v749_v28 = vand.u32 65535, %v1974_v38 }
 0x22e   : > { %vm602_vm12 = vcmp.eq.f32.partialorder %v1892_v48, %v580_v47  ;;  %v1987_v49 = vcvt.s32.f32 %v736_v44  ;;  %v667_v40 = vcvt.s32.f32 %v665_v36 }
 0x22f   : > { %v1990_v51 = vsel %vm602_vm12, %v1910_v60, 128 }
 0x230   : > { %739 = vmin.xlane.f32.xlu1 %v1987_v49  ;;  %v778_v46 = vshra.s32 %v1990_v51, 16  ;;  %v777_v38 = vand.u32 65535, %v1990_v51 }
 0x231   : > { %v578_v53 = vpop.xlane.xlu1 %577 }
 0x232   : > { %vm601_vm13 = vcmp.eq.f32.partialorder %v1894_v50, %v578_v53  ;;  %v1183_v55 = vadd.f32 %v1182_v45, %v578_v53  ;;  %v1995_v57 = vcvt.s32.f32 %v778_v46 }
 0x233   : > { %v1998_v59 = vsel %vm601_vm13, %v1910_v60, 128 }
 0x234   : > { %781 = vmin.xlane.f32.xlu1 %v1995_v57  ;;  %v764_v48 = vshra.s32 %v1998_v59, 16  ;;  %v1184_v61 = vadd.f32 %v1183_v55, %v580_v47  ;;  %v695_v47 = vcvt.s32.f32 %v693_v7 }
 0x235   : > { %v584_v62 = vpop.xlane.xlu1 %583 }
 0x236   : > { %vm604_vm14 = vcmp.eq.f32.partialorder %v1898_v52, %v584_v62  ;;  %v2003_v2 = vcvt.s32.f32 %v764_v48  ;;  %v723_v48 = vcvt.s32.f32 %v721_v18 }
 0x237   : > { %v2006_v4 = vsel %vm604_vm14, %v1910_v60, 128 }
 0x238   : > { %767 = vmin.xlane.f32.xlu1 %v2003_v2  ;;  %v806_v50 = vshra.s32 %v2006_v4, 16  ;;  %v805_v51 = vand.u32 65535, %v2006_v4 }
 0x239   : > { %v582_v5 = vpop.xlane.xlu1 %581 }
 0x23a   : > { %vm603_vm15 = vcmp.eq.f32.partialorder %v1900_v54, %v582_v5  ;;  %v1185_v8 = vadd.f32 %v1184_v61, %v582_v5  ;;  %v2011_v9 = vcvt.s32.f32 %v806_v50  ;;  %v751_v5 = vcvt.s32.f32 %v749_v28 }
 0x23b   : > { %v2014_v10 = vsel %vm603_vm15, %v1910_v60, 128 }
 0x23c   : > { %809 = vmin.xlane.f32.xlu0 %v2011_v9  ;;  %v1186_v52 = vadd.f32 %v1185_v8, %v584_v62  ;;  %v792_v11 = vshra.s32 %v2014_v10, 16 }
 0x23e   : > { %v586_v14 = vpop.xlane.xlu1 %585  ;;  %v2018_v15 = vcvt.s32.f32 %v792_v11 }
 0x23f   : > { %vm605_vm2 = vcmp.eq.f32.partialorder %v1906_v58, %v586_v14  ;;  %v2021_v16 = vadd.f32 %v1186_v52, %v586_v14  ;;  %v779_v14 = vcvt.s32.f32 %v777_v38 }
 0x240   : > { %v2024_v54 = vsel %vm605_vm2, %v1910_v60, 128  ;;  %795 = vmin.xlane.f32.xlu1 %v2018_v15 }
 0x241   : > { %v820_v19 = vshra.s32 %v2024_v54, 16 }
 0x242   : > { %v2028_v20 = vpop.xlane.xlu1 %587 }
 0x243   : > { %vm606_vm3 = vcmp.eq.f32.partialorder %v1904_v56, %v2028_v20  ;;  %v2032_v21 = vcvt.s32.f32 %v820_v19  ;;  %v623_v56 = vand.u32 65535, %v1916_v1  ;;  %v651_v1 = vand.u32 65535, %v1934_v13 }
 0x244   : > { %v2035_v24 = vsel %vm606_vm3, %v1910_v60, 128  ;;  %v679_v13 = vand.u32 65535, %v1950_v23  ;;  %v707_v23 = vand.u32 65535, %v1966_v33  ;;  %v735_v33 = vand.u32 65535, %v1982_v43 }
 0x245   : > { %823 = vmin.xlane.f32.xlu1 %v2032_v21  ;;  %v834_v58 = vshra.s32 %v2035_v24, 16  ;;  %v625_v35 = vcvt.s32.f32 %v623_v56  ;;  %v653_v44 = vcvt.s32.f32 %v651_v1  ;;  %v763_v43 = vand.u32 65535, %v1998_v59 }
 0x246   : > { %v681_v53 = vcvt.s32.f32 %v679_v13  ;;  %v709_v62 = vcvt.s32.f32 %v707_v23  ;;  %v737_v52 = vcvt.s32.f32 %v735_v33  ;;  %v791_v59 = vand.u32 65535, %v2014_v10 }
 0x247   : > { %v2039_v25 = vcvt.s32.f32 %v834_v58  ;;  %v765_v58 = vcvt.s32.f32 %v763_v43  ;;  %v833_v36 = vand.u32 65535, %v2035_v24 }
 0x249   : > { %837 = vmin.xlane.f32.xlu0 %v2039_v25 }
 0x299   : > { %v2043_v29 = vpop.xlane.xlu1 %641 }
 0x29a   : > { %vm643_vm4 = vcmp.eq.f32.partialorder %v1919_v3, %v2043_v29  ;;  %v648_v24 = vcvt.f32.s32 %v2043_v29 }
 0x29b   : > { %v644_v31 = vsel %vm643_vm4, %v639_v30, inf  ;;  %v807_v30 = vcvt.s32.f32 %v805_v51 }
 0x29c   : > { %645 = vmin.xlane.f32.xlu0 %v644_v31  ;;  %v793_v31 = vcvt.s32.f32 %v791_v59 }
 0x29d   : > { %v2048_v34 = vpop.xlane.xlu1 %627 }
 0x29e   : > { %vm629_vm5 = vcmp.eq.f32.partialorder %v1923_v6, %v2048_v34 }
 0x29f   : > { %v630_v39 = vsel %vm629_vm5, %v625_v35, inf }
 0x2a0   : > { %631 = vmin.xlane.f32.xlu1 %v630_v39 }
 0x2a1   : > { %v2053_v63 = vpop.xlane.xlu1 %669 }
 0x2a2   : > { %vm671_vm6 = vcmp.eq.f32.partialorder %v1931_v12, %v2053_v63  ;;  %v676_v18 = vcvt.f32.s32 %v2053_v63 }
 0x2a3   : > { %v672_v3 = vsel %vm671_vm6, %v667_v40, inf  ;;  %v835_v40 = vcvt.s32.f32 %v833_v36  ;;  %vm298_vm6 = vcmask 0  }
 0x2a4   : > { %673 = vmin.xlane.f32.xlu0 %v672_v3  ;;  %v677_v29 = vshll.u32 %v676_v18, 16 }
 0x2a5   : > { %v2058_v41 = vpop.xlane.xlu1 %655 }
 0x2a6   : > { %vm657_vm7 = vcmp.eq.f32.partialorder %v1939_v17, %v2058_v41 }
 0x2a7   : > { %v658_v6 = vsel %vm657_vm7, %v653_v44, inf  ;;  %v634_v44 = vcvt.f32.s32 %v2048_v34 }
 0x2a8   : > { %659 = vmin.xlane.f32.xlu1 %v658_v6 }
 0x2a9   : > { %v2063_v45 = vpop.xlane.xlu1 %697 }
 0x2aa   : > { %vm699_vm8 = vcmp.eq.f32.partialorder %v1947_v22, %v2063_v45  ;;  %v704_v63 = vcvt.f32.s32 %v2063_v45 }
 0x2ab   : > { %v700_v12 = vsel %vm699_vm8, %v695_v47, inf  ;;  %v635_v47 = vshll.u32 %v634_v44, 16 }
 0x2ac   : > { %701 = vmin.xlane.f32.xlu0 %v700_v12 }
 0x2ad   : > { %v2068_v46 = vpop.xlane.xlu1 %683 }
 0x2ae   : > { %vm685_vm9 = vcmp.eq.f32.partialorder %v1955_v27, %v2068_v46 }
 0x2af   : > { %v686_v17 = vsel %vm685_vm9, %v681_v53, inf }
 0x2b0   : > { %687 = vmin.xlane.f32.xlu1 %v686_v17 }
 0x2b1   : > { %v2073_v55 = vpop.xlane.xlu1 %725 }
 0x2b2   : > { %vm727_vm10 = vcmp.eq.f32.partialorder %v1963_v32, %v2073_v55  ;;  %v732_v45 = vcvt.f32.s32 %v2073_v55 }
 0x2b3   : > { %v728_v22 = vsel %vm727_vm10, %v723_v48, inf  ;;  %v662_v48 = vcvt.f32.s32 %v2058_v41  ;;  %v690_v41 = vcvt.f32.s32 %v2068_v46 }
 0x2b4   : > { %729 = vmin.xlane.f32.xlu0 %v728_v22  ;;  %v1741_v22 = vmov 1.0  }
 0x2b5   : > { %v2078_v61 = vpop.xlane.xlu1 %711 }
 0x2b6   : > { %vm713_vm11 = vcmp.eq.f32.partialorder %v1971_v37, %v2078_v61  ;;  %v718_v46 = vcvt.f32.s32 %v2078_v61 }
 0x2b7   : > { %v714_v27 = vsel %vm713_vm11, %v709_v62, inf  ;;  %v663_v62 = vshll.u32 %v662_v48, 16 }
 0x2b8   : > { %715 = vmin.xlane.f32.xlu1 %v714_v27  ;;  %v719_v59 = vshll.u32 %v718_v46, 16 }
 0x2b9   : > { %v2083_v50 = vpop.xlane.xlu1 %753 }
 0x2ba   : > { %vm755_vm12 = vcmp.eq.f32.partialorder %v1979_v42, %v2083_v50  ;;  %v760_v55 = vcvt.f32.s32 %v2083_v50 }
 0x2bb   : > { %v756_v32 = vsel %vm755_vm12, %v751_v5, inf }
 0x2bc   : > { %757 = vmin.xlane.f32.xlu0 %v756_v32 }
 0x2bd   : > { %v2088_v8 = vpop.xlane.xlu1 %739 }
 0x2be   : > { %vm741_vm13 = vcmp.eq.f32.partialorder %v1987_v49, %v2088_v8  ;;  %v746_v61 = vcvt.f32.s32 %v2088_v8 }
 0x2bf   : > { %v742_v37 = vsel %vm741_vm13, %v737_v52, inf  ;;  %v705_v52 = vshll.u32 %v704_v63, 16 }
 0x2c0   : > { %743 = vmin.xlane.f32.xlu1 %v742_v37  ;;  %v691_v37 = vshll.u32 %v690_v41, 16 }
 0x2c1   : > { %v2093_v11 = vpop.xlane.xlu1 %781 }
 0x2c2   : > { %vm783_vm14 = vcmp.eq.f32.partialorder %v1995_v57, %v2093_v11  ;;  %v788_v50 = vcvt.f32.s32 %v2093_v11 }
 0x2c3   : > { %v784_v42 = vsel %vm783_vm14, %v779_v14, inf }
 0x2c4   : > { %785 = vmin.xlane.f32.xlu0 %v784_v42  ;;  %v789_v44 = vshll.u32 %v788_v50, 16 }
 0x2c5   : > { %v2098_v19 = vpop.xlane.xlu1 %767 }
 0x2c6   : > { %vm769_vm15 = vcmp.eq.f32.partialorder %v2003_v2, %v2098_v19  ;;  %v819_v2 = vand.u32 65535, %v2024_v54  ;;  %v774_v8 = vcvt.f32.s32 %v2098_v19  ;;  %v1188_v19 = vadd.f32 %v2021_v16, %v2028_v20 }
 0x2c7   : > { %v770_v49 = vsel %vm769_vm15, %v765_v58, inf }
 0x2c8   : > { %771 = vmin.xlane.f32.xlu1 %v770_v49  ;;  %v821_v10 = vcvt.s32.f32 %v819_v2  ;;  %v733_v49 = vshll.u32 %v732_v45, 16 }
 0x2c9   : > { %v2103_v26 = vpop.xlane.xlu0 %809 }
 0x2ca   : > { %vm811_vm2 = vcmp.eq.f32.partialorder %v2011_v9, %v2103_v26  ;;  %v1162_v9 = vmul.f32 %v1844_v0, %v1844_v0  ;;  %v816_v11 = vcvt.f32.s32 %v2103_v26 }
 0x2cb   : > { %v812_v57 = vsel %vm811_vm2, %v807_v30, inf }
 0x2cc   : > { %813 = vmin.xlane.f32.xlu0 %v812_v57  ;;  %v1163_v54 = vsel %vm384_vm0, %v1162_v9, 0.0  ;;  %v761_v9 = vshll.u32 %v760_v55, 16 }
 0x2cd   : > { %v2108_v56 = vpop.xlane.xlu1 %795 }
 0x2ce   : > { %vm797_vm3 = vcmp.eq.f32.partialorder %v2018_v15, %v2108_v56 }
 0x2cf   : > { %v798_v4 = vsel %vm797_vm3, %v793_v31, inf }
 0x2d0   : > { %799 = vmin.xlane.f32.xlu1 %v798_v4 }
 0x2d2   : > { %v2113_v35 = vpop.xlane.xlu1 %823 }
 0x2d3   : > { %vm825_vm4 = vcmp.eq.f32.partialorder %v2032_v21, %v2113_v35  ;;  %v1740_v21 = vmov 0.0  }
 0x2d4   : > { %v826_v39 = vsel %vm825_vm4, %v821_v10, inf  ;;  %299 = vst.msk [vmem:[%s2128_s16] sm:$0x1] %vm298_vm6, %v1740_v21 }
 0x2d5   : > { %827 = vmin.xlane.f32.xlu1 %v826_v39  ;;  %v747_v39 = vshll.u32 %v746_v61, 16 }
 0x2d6   : > { %v2120_v15 = vpop.xlane.xlu0 %837 }
 0x2d7   : > { %vm839_vm5 = vcmp.eq.f32.partialorder %v2039_v25, %v2120_v15  ;;  %v649_v25 = vshll.u32 %v648_v24, 16 }
 0x2d8   : > { %v840_v1 = vsel %vm839_vm5, %v835_v40, inf }
 0x2d9   : > { %1164 = vadd.xlane.f32.xlu1 %v1163_v54  ;;  %841 = vmin.xlane.f32.xlu0 %v840_v1 }
 0x329   : > { %v646_v3 = vpop.xlane.xlu0 %645 }
 0x32a   : > { %v647_v7 = vcvt.f32.s32 %v646_v3 }
 0x32c   : > { %v650_v12 = vadd.s32 %v649_v25, %v647_v7  ;;  %v775_v25 = vshll.u32 %v774_v8, 16 }
 0x32d   : > { %v632_v6 = vpop.xlane.xlu1 %631 }
 0x32e   : > { %v633_v13 = vcvt.f32.s32 %v632_v6  ;;  %vm848_vm8 = vcmp.eq.s32.totalorder %v1910_v60, %v650_v12 }
 0x330   : > { %v636_v53 = vadd.s32 %v635_v47, %v633_v13 }
 0x331   : > { %v674_v17 = vpop.xlane.xlu0 %673 }
 0x332   : > { %vm847_vm7 = vcmp.eq.s32.totalorder %v1910_v60, %v636_v53  ;;  %v675_v23 = vcvt.f32.s32 %v674_v17  ;;  %v802_v53 = vcvt.f32.s32 %v2108_v56  ;;  %v817_v17 = vshll.u32 %v816_v11, 16 }
 0x333   : > { %1517 = vmatprep.mubr.msk.f32.mxu1 %vm847_vm7, %v1741_v22 }
 0x334   : > { %1518 = vmatmul.mubr.msk.f32.vlgmr.msra.gmra.mrb[0].mxu1 %vm848_vm8, %v1741_v22  ;;  %v678_v27 = vadd.s32 %v677_v29, %v675_v23  ;;  %v1189_v23 = vrot.slane %v1188_v19, 4  ;;  %v803_v29 = vshll.u32 %v802_v53, 16 }
 0x335   : > { %v660_v34 = vpop.xlane.xlu1 %659 }
 0x336   : > { %v661_v28 = vcvt.f32.s32 %v660_v34  ;;  %vm850_vm10 = vcmp.eq.s32.totalorder %v1910_v60, %v678_v27  ;;  %v830_v34 = vcvt.f32.s32 %v2113_v35  ;;  %v1190_v20 = vadd.f32 %v1189_v23, %v1188_v19 }
 0x337   : > { %v844_v27 = vcvt.f32.s32 %v2120_v15 }
 0x338   : > { %v664_v5 = vadd.s32 %v663_v62, %v661_v28  ;;  %v831_v28 = vshll.u32 %v830_v34, 16 }
 0x339   : > { %v702_v33 = vpop.xlane.xlu0 %701 }
 0x33a   : > { %vm849_vm9 = vcmp.eq.s32.totalorder %v1910_v60, %v664_v5  ;;  %v703_v32 = vcvt.f32.s32 %v702_v33  ;;  %v1191_v33 = vrot.slane %v1190_v20, 2 }
 0x33b   : > { %1520 = vmatprep.mubr.msk.f32.mxu1 %vm849_vm9, %v1741_v22 }
 0x33c   : > { %1521 = vmatmul.mubr.msk.f32.gmra.mrb[2].mxu1 %vm850_vm10, %v1741_v22  ;;  %v706_v43 = vadd.s32 %v705_v52, %v703_v32  ;;  %v845_v32 = vshll.u32 %v844_v27, 16  ;;  %vm1743_vm10 = vmmov 0  }
 0x33d   : > { %v688_v38 = vpop.xlane.xlu1 %687  ;;  %1573 = vmatprep.mubr.msk.f32.mxu0 %vm1743_vm10, %v1740_v21 }
 0x33e   : > { %v689_v14 = vcvt.f32.s32 %v688_v38  ;;  %vm852_vm12 = vcmp.eq.s32.totalorder %v1910_v60, %v706_v43 }
 0x340   : > { %v692_v42 = vadd.s32 %v691_v37, %v689_v14  ;;  %v1192_v14 = vadd.f32 %v1191_v33, %v1190_v20 }
 0x341   : > { %v730_v58 = vpop.xlane.xlu0 %729 }
 0x342   : > { %vm851_vm11 = vcmp.eq.s32.totalorder %v1910_v60, %v692_v42  ;;  %v731_v51 = vcvt.f32.s32 %v730_v58  ;;  %v1193_v45 = vrot.slane %v1192_v14, 1 }
 0x343   : > { %1523 = vmatprep.mubr.msk.f32.mxu1 %vm851_vm11, %v1741_v22  ;;  %vm296_vm11 = vcmask 16384  }
 0x344   : > { %1524 = vmatmul.mubr.msk.f32.gmra.mrb[4].mxu1 %vm852_vm12, %v1741_v22  ;;  %v734_v31 = vadd.s32 %v733_v49, %v731_v51  ;;  %v1194_v51 = vadd.f32 %v1193_v45, %v1192_v14  ;;  %297 = vst.msk [vmem:[%s2193_s25] sm:$0x1] %vm296_vm11, %v1740_v21 }
 0x345   : > { %v716_v30 = vpop.xlane.xlu1 %715 }
 0x346   : > { %v717_v57 = vcvt.f32.s32 %v716_v30  ;;  %vm854_vm14 = vcmp.eq.s32.totalorder %v1910_v60, %v734_v31  ;;  %v1173_v30 = vld [vmem:[%s2128_s16] sm:$0x1]  ;;  %v1742_v31 = vmov 0.0|0.0  }
 0x347   : > { %1576 = vmatprep.subr.bf16.mxu0 %v1742_v31 }
 0x348   : > { %v720_v2 = vadd.s32 %v719_v59, %v717_v57 }
 0x349   : > { %v758_v4 = vpop.xlane.xlu0 %757 }
 0x34a   : > { %vm853_vm13 = vcmp.eq.s32.totalorder %v1910_v60, %v720_v2  ;;  %v759_v10 = vcvt.f32.s32 %v758_v4 }
 0x34b   : > { %1526 = vmatprep.mubr.msk.f32.mxu1 %vm853_vm13, %v1741_v22 }
 0x34c   : > { %1527 = vmatmul.mubr.msk.f32.gmra.mrb[6].mxu1 %vm854_vm14, %v1741_v22  ;;  %v762_v40 = vadd.s32 %v761_v9, %v759_v10 }
 0x34d   : > { %v744_v36 = vpop.xlane.xlu1 %743 }
 0x34e   : > { %v745_v54 = vcvt.f32.s32 %v744_v36  ;;  %vm856_vm2 = vcmp.eq.s32.totalorder %v1910_v60, %v762_v40 }
 0x350   : > { %v748_v1 = vadd.s32 %v747_v39, %v745_v54 }
 0x351   : > { %v786_v24 = vpop.xlane.xlu0 %785 }
 0x352   : > { %vm855_vm15 = vcmp.eq.s32.totalorder %v1910_v60, %v748_v1  ;;  %v787_v3 = vcvt.f32.s32 %v786_v24 }
 0x353   : > { %1529 = vmatprep.mubr.msk.f32.mxu1 %vm855_vm15, %v1741_v22 }
 0x354   : > { %1530 = vmatmul.mubr.msk.f32.gmra.mrb[8].mxu1 %vm856_vm2, %v1741_v22  ;;  %v790_v47 = vadd.s32 %v789_v44, %v787_v3 }
 0x355   : > { %v772_v7 = vpop.xlane.xlu1 %771 }
 0x356   : > { %v773_v6 = vcvt.f32.s32 %v772_v7  ;;  %vm858_vm4 = vcmp.eq.s32.totalorder %v1910_v60, %v790_v47 }
 0x358   : > { %v776_v13 = vadd.s32 %v775_v25, %v773_v6 }
 0x359   : > { %v814_v12 = vpop.xlane.xlu0 %813 }
 0x35a   : > { %vm857_vm3 = vcmp.eq.s32.totalorder %v1910_v60, %v776_v13  ;;  %v815_v18 = vcvt.f32.s32 %v814_v12 }
 0x35b   : > { %1532 = vmatprep.mubr.msk.f32.mxu1 %vm857_vm3, %v1741_v22 }
 0x35c   : > { %1533 = vmatmul.mubr.msk.f32.gmra.mrb[10].mxu1 %vm858_vm4, %v1741_v22  ;;  %v818_v62 = vadd.s32 %v817_v17, %v815_v18 }
 0x35d   : > { %v800_v48 = vpop.xlane.xlu1 %799 }
 0x35e   : > { %v801_v26 = vcvt.f32.s32 %v800_v48  ;;  %vm860_vm7 = vcmp.eq.s32.totalorder %v1910_v60, %v818_v62 }
 0x360   : > { %v804_v16 = vadd.s32 %v803_v29, %v801_v26 }
 0x362   : > { %v828_v56 = vpop.xlane.xlu1 %827  ;;  %vm859_vm5 = vcmp.eq.s32.totalorder %v1910_v60, %v804_v16 }
 0x363   : > { %v829_v5 = vcvt.f32.s32 %v828_v56  ;;  %1535 = vmatprep.mubr.msk.f32.mxu1 %vm859_vm5, %v1741_v22 }
 0x364   : > { %1536 = vmatmul.mubr.msk.f32.gmra.mrb[12].mxu1 %vm860_vm7, %v1741_v22 }
 0x365   : > { %v832_v63 = vadd.s32 %v831_v28, %v829_v5 }
 0x366   : > { %v1165_v41 = vpop.xlane.xlu1 %1164  ;;  %v842_v35 = vpop.xlane.xlu0 %841 }
 0x367   : > { %v1166_v52 = vsel %vm384_vm0, %v1165_v41, 0.0  ;;  %v843_v38 = vcvt.f32.s32 %v842_v35  ;;  %vm861_vm8 = vcmp.eq.s32.totalorder %v1910_v60, %v832_v63 }
 0x368   : > { %v1167_v37 = vrot.slane %v1166_v52, 4  ;;  %1538 = vmatprep.mubr.msk.f32.mxu1 %vm861_vm8, %v1741_v22 }
 0x369   : > { %v846_v15 = vadd.s32 %v845_v32, %v843_v38 }
 0x36a   : > { %v1168_v43 = vadd.f32 %v1167_v37, %v1166_v52 }
 0x36b   : > { %vm862_vm9 = vcmp.eq.s32.totalorder %v1910_v60, %v846_v15  ;;  %v1115_v60 = vsel %vm384_vm0, %v1844_v0, 0.0  ;;  %vm294_vm0 = vcmask 2048  }
 0x36c   : > { %v1169_v42 = vrot.slane %v1168_v43, 2  ;;  %1539 = vmatmul.mubr.msk.f32.gmra.mrb[14].mxu1 %vm862_vm9, %v1741_v22  ;;  %1116 = vadd.xlane.f32.xlu0 %v1115_v60  ;;  %295 = vst.msk [vmem:[%s284_s12] sm:$0x7] %vm294_vm0, %v1740_v21 }
 0x36e   : > { %v1170_v58 = vadd.f32 %v1169_v42, %v1168_v43 }
 0x370   : > { %v1171_v46 = vrot.slane %v1170_v58, 1 }
 0x372   : > { %v1172_v49 = vadd.f32 %v1171_v46, %v1170_v58 }
 0x374   : > { %v1195_v59 = vsub.f32 %v1194_v51, %v1172_v49  ;;  %v1659_v51 = vld [vmem:[%s1841_s11] sm:$0x7]  ;;  %s1435_s11 = sshll.u32 %s1730_s21, 4 }
 0x375   : > { %s2246_s24 = scalar_lea.hbm %s2297_s5, %s1435_s11 }
 0x376   : > { %v1196_v57 = vadd.f32 %v1195_v59, %v1173_v30 }
 0x378   : > { %1198 = vst.msk [vmem:[%s2128_s16] sm:$0x1] %vm298_vm6, %v1196_v57  ;;  %vm292_vm6 = vcmask 18432  }
 0x379   : > { %293 = vst.msk [vmem:[%s2204_s9] sm:$0x7] %vm292_vm6, %v1740_v21 }
 0x407   : > { %v1519_v22 = vpop.f32.mrb[0].mxu1 }
 0x408   : > { %v1123_v2 = vsel %vm335_vm1, %v1519_v22, 0.0  ;;  %v961_v55 = vpop.f32.mrb[1].mxu1 }
 0x409   : > { %v1577_v4 = vpack.c.bf16 %v1519_v22, %v961_v55  ;;  %v1122_v61 = vsel %vm335_vm1, %v961_v55, 0.0  ;;  %v1117_v55 = vpop.xlane.xlu0 %1116 }
 0x40a   : > { %v1124_v10 = vadd.f32 %v1123_v2, %v1122_v61  ;;  %v1114_v2 = vld [vmem:[%s284_s12] sm:$0x7] }
 0x40b   : > { %1578 = vmatpush3.bf16.msra.mxu0 %v1577_v4  ;;  %v1118_v4 = vadd.f32 %v1117_v55, %v1114_v2 }
 0x40c   : > { %1579 = vmatprep.subr.bf16.mxu0 %v1742_v31 }
 0x40d   : > { %1120 = vst.msk [vmem:[%s284_s12] sm:$0x7] %vm294_vm0, %v1118_v4 }
 0x40f   : > { %v1522_v0 = vpop.f32.mrb[2].mxu1 }
 0x410   : > { %v971_v9 = vpop.f32.mrb[3].mxu1  ;;  %v1127_v40 = vsel %vm335_vm1, %v1522_v0, 0.0 }
 0x411   : > { %v1580_v36 = vpack.c.bf16 %v1522_v0, %v971_v9  ;;  %v1125_v39 = vsel %vm335_vm1, %v971_v9, 0.0 }
 0x412   : > { %v1126_v54 = vadd.f32 %v1125_v39, %v1124_v10 }
 0x413   : > { %1581 = vmatpush3.bf16.msra.mxu0 %v1580_v36 }
 0x414   : > { %v1128_v1 = vadd.f32 %v1127_v40, %v1126_v54  ;;  %1582 = vmatprep.subr.bf16.mxu0 %v1742_v31 }
 0x417   : > { %v1525_v50 = vpop.f32.mrb[4].mxu1 }
 0x418   : > { %v981_v24 = vpop.f32.mrb[5].mxu1  ;;  %v1131_v7 = vsel %vm335_vm1, %v1525_v50, 0.0 }
 0x419   : > { %v1583_v8 = vpack.c.bf16 %v1525_v50, %v981_v24  ;;  %v1129_v3 = vsel %vm335_vm1, %v981_v24, 0.0 }
 0x41a   : > { %v1130_v44 = vadd.f32 %v1129_v3, %v1128_v1 }
 0x41b   : > { %1584 = vmatpush3.bf16.msra.mxu0 %v1583_v8 }
 0x41c   : > { %v1132_v25 = vadd.f32 %v1131_v7, %v1130_v44  ;;  %1585 = vmatprep.subr.bf16.mxu0 %v1742_v31 }
 0x41f   : > { %v1528_v6 = vpop.f32.mrb[6].mxu1 }
 0x420   : > { %v991_v47 = vpop.f32.mrb[7].mxu1  ;;  %v1135_v19 = vsel %vm335_vm1, %v1528_v6, 0.0 }
 0x421   : > { %v1586_v13 = vpack.c.bf16 %v1528_v6, %v991_v47  ;;  %v1133_v11 = vsel %vm335_vm1, %v991_v47, 0.0 }
 0x422   : > { %v1134_v12 = vadd.f32 %v1133_v11, %v1132_v25 }
 0x423   : > { %1587 = vmatpush3.bf16.msra.mxu0 %v1586_v13 }
 0x424   : > { %v1136_v53 = vadd.f32 %v1135_v19, %v1134_v12  ;;  %1588 = vmatprep.subr.bf16.mxu0 %v1742_v31 }
 0x427   : > { %v1531_v18 = vpop.f32.mrb[8].mxu1 }
 0x428   : > { %v1001_v17 = vpop.f32.mrb[9].mxu1  ;;  %v1139_v26 = vsel %vm335_vm1, %v1531_v18, 0.0 }
 0x429   : > { %v1589_v48 = vpack.c.bf16 %v1531_v18, %v1001_v17  ;;  %v1137_v23 = vsel %vm335_vm1, %v1001_v17, 0.0 }
 0x42a   : > { %v1138_v29 = vadd.f32 %v1137_v23, %v1136_v53 }
 0x42b   : > { %1590 = vmatpush3.bf16.msra.mxu0 %v1589_v48 }
 0x42c   : > { %v1140_v34 = vadd.f32 %v1139_v26, %v1138_v29  ;;  %1591 = vmatprep.subr.bf16.mxu0 %v1742_v31 }
 0x42f   : > { %v1534_v62 = vpop.f32.mrb[10].mxu1 }
 0x430   : > { %v1011_v16 = vpop.f32.mrb[11].mxu1  ;;  %v1143_v27 = vsel %vm335_vm1, %v1534_v62, 0.0 }
 0x431   : > { %v1592_v20 = vpack.c.bf16 %v1534_v62, %v1011_v16  ;;  %v1141_v56 = vsel %vm335_vm1, %v1011_v16, 0.0 }
 0x432   : > { %v1142_v28 = vadd.f32 %v1141_v56, %v1140_v34 }
 0x433   : > { %1593 = vmatpush3.bf16.msra.mxu0 %v1592_v20 }
 0x434   : > { %v1144_v5 = vadd.f32 %v1143_v27, %v1142_v28  ;;  %1594 = vmatprep.subr.bf16.mxu0 %v1742_v31 }
 0x437   : > { %v1537_v63 = vpop.f32.mrb[12].mxu1 }
 0x438   : > { %v1021_v33 = vpop.f32.mrb[13].mxu1  ;;  %v1147_v52 = vsel %vm335_vm1, %v1537_v63, 0.0 }
 0x439   : > { %v1595_v41 = vpack.c.bf16 %v1537_v63, %v1021_v33  ;;  %v1145_v35 = vsel %vm335_vm1, %v1021_v33, 0.0 }
 0x43a   : > { %v1146_v32 = vadd.f32 %v1145_v35, %v1144_v5 }
 0x43b   : > { %1596 = vmatpush3.bf16.msra.mxu0 %v1595_v41 }
 0x43c   : > { %v1148_v38 = vadd.f32 %v1147_v52, %v1146_v32  ;;  %1597 = vmatprep.subr.bf16.mxu0 %v1742_v31  ;;  %v1121_v31 = vld [vmem:[%s2193_s25] sm:$0x1] }
 0x43f   : > { %v1540_v37 = vpop.f32.mrb[14].mxu1 }
 0x440   : > { %v1031_v15 = vpop.f32.mrb[15].mxu1  ;;  %v1151_v45 = vsel %vm335_vm1, %v1540_v37, 0.0 }
 0x441   : > { %v1598_v14 = vpack.c.bf16 %v1540_v37, %v1031_v15  ;;  %v1149_v43 = vsel %vm335_vm1, %v1031_v15, 0.0 }
 0x442   : > { %v1150_v42 = vadd.f32 %v1149_v43, %v1148_v38 }
 0x443   : > { %1599 = vmatpush3.bf16.msra.mxu0 %v1598_v14 }
 0x444   : > { %v1152_v58 = vadd.f32 %v1151_v45, %v1150_v42 }
 0x446   : > { %v1153_v46 = vrot.slane %v1152_v58, 4  ;;  %1574 = vmatmul.mubr.f32.vlgmr.msra.gmra.mrb[16].mxu0 %v1659_v51 }
 0x448   : > { %v1154_v49 = vadd.f32 %v1153_v46, %v1152_v58 }
 0x44a   : > { %v1155_v30 = vrot.slane %v1154_v49, 2 }
 0x44c   : > { %v1156_v59 = vadd.f32 %v1155_v30, %v1154_v49 }
 0x44e   : > { %v1157_v57 = vrot.slane %v1156_v59, 1 }
 0x450   : > { %v1158_v60 = vadd.f32 %v1157_v57, %v1156_v59 }
 0x452   : > { %v1159_v22 = vadd.f32 %v1158_v60, %v1121_v31 }
 0x454   : > { %1161 = vst.msk [vmem:[%s2193_s25] sm:$0x1] %vm296_vm11, %v1159_v22  ;;  %s1211_s25 = scalar_lea.sflag [#allocation3], %s264_s15 }
 0x455   : > { %1673 = shalt.err (!%p1670_p5)
}
 0x456   : > { %s1674_s21 = scalar_lea.hbm %s2246_s24, 16  ;;  %s1678_s10 = scalar_lea.hbm %s2297_s5, 32 }
 0x457   : > { %p1675_p6 = scmp.ne.s32.totalorder %s2246_s24, %s1674_s21  ;;  %p1679_p10 = scmp.lt.u32.totalorder %s2246_s24, %s2297_s5 }
 0x458   : > { %p1680_p11 = scmp.lt.u32.totalorder %s1678_s10, %s1674_s21  ;;  %p1682_p13 = scmp.lt.u32.totalorder %s1674_s21, %s2246_s24 }
 0x459   : > { %p1676_p7 = pnand %p1675_p6, %p1815_p4 }
 0x45a   : > { %p1681_p12 = por %p1680_p11, %p1679_p10 }
 0x45b   : > { %p1677_p9 = pneg %p1676_p7 }
 0x45c   : > { %p1683_p0 = por %p1682_p13, %p1681_p12 }
 0x45e   : > { %p1684_p1 = pnand %p1683_p0, %p1677_p9 }
 0x460   : > { %1687 = shalt.err (!%p1684_p1)
}
 0x461   : > { %1600 = dma.vmem_to_hbm [thread:$0]  (%p1815_p4), %s1233_s13, 16, %s2246_s24, %s1211_s25   ;;  %v1040_v21 = vld [vmem:[%s2204_s9] sm:$0x7] }
 0x519   : > { %v1107_v61 = vpop.f32.mrb[16].mxu0 }
 0x51a   : > { %v1111_v10 = vadd.f32 %v1107_v61, %v1040_v21  ;;  %v1575_v0 = vpop.f32.mrb[17].mxu0 }
 0x51c   : > { %1113 = vst.msk [vmem:[%s2204_s9] sm:$0x7] %vm292_vm6, %v1111_v10 }
 0x51d PF: > { %p1606_p2 = scmp.ge.s32.totalorder %s1738_s23, 2  ;;  %s1264_s14 = sand.u32 1, %s1718_s18  }
 0x51e   : > { %s1265_s17 = scalar_lea.sflag [#allocation3], %s1264_s14 }
 0x51f   : > { %p1603_p3 = pnand %p1606_p2, %p1822_p8 }
 0x521   : > { %1713 = dma.done.wait (!%p1603_p3), %s1265_s17, 16  }
 0x522   : > { %1715 = vsyncadd (!%p1603_p3), %s1265_s17, 4294967280  ;;  %s19_s23 = sadd.s32 1, %s1738_s23   ;;  %s2300_s18 = smov %s1722_s19 }
 0x523   : > { %p16_p4 = scmp.ge.s32.totalorder %s19_s23, 4   ;;  %s2301_s19 = smov %s1726_s20 }
 0x524   : > { %s2302_s20 = smov %s1828_s6  ;;  %s2303_s21 = smov %s1734_s22 }
 0x525   : > { %s2304_s22 = smov %s2306_s26  ;;  %18 = sbr.rel (!%p16_p4) target bundleno = 4 (0x4), region = 106 }
 0x52c   :  { %1269 = vsyncpa [#allocation3], 1 }
 0x52d   :  { %1271 = vsyncpa [#allocation3 + $0x1], 1 }

</bundles_post_ra>
